<compile_context>
chip_gen: v6e
topology: v6e:2x2x1
jax: 0.10.0
libtpu: 0.0.40
codegen_flags: <defaults>
</compile_context>

<pallas_src>
import functools
import math

import jax
import jax.numpy as jnp
from jax.experimental import pallas as pl
from jax.experimental.pallas import tpu as pltpu

EPS = 1e-5


def _round_up(x, m):
    return ((x + m - 1) // m) * m


# ----------------------------------------------------------------------------
# Pallas kernels
# ----------------------------------------------------------------------------
def _fused_matmul_kernel(x_ref, w_ref, b_ref, *rest, relu_cols, has_res):
    """out = relu?((x @ w) + bias (+ residual)) in one shot (full K in VMEM)."""
    if has_res:
        res_ref, o_ref = rest
    else:
        (o_ref,) = rest

    acc = jnp.dot(x_ref[...], w_ref[...], preferred_element_type=jnp.float32)
    acc = acc + b_ref[...]
    if has_res:
        acc = acc + res_ref[...].astype(jnp.float32)
    if relu_cols is None:                       # ReLU on all channels
        acc = jnp.maximum(acc, 0.0)
    elif relu_cols > 0:                         # ReLU on first `relu_cols` only
        col = jax.lax.broadcasted_iota(jnp.int32, acc.shape, 1)
        acc = jnp.where(col < relu_cols, jnp.maximum(acc, 0.0), acc)
    o_ref[...] = acc.astype(o_ref.dtype)        # single store (v5e: 1 vst slot)


def _pick_tm(M):
    if M % 128 == 0:
        # >=2 M tiles when possible (keeps both v7x TensorCores busy).
        return 256 if (M % 256 == 0 and M >= 512) else 128
    if M % 8 == 0 and M <= 512:
        return M                                 # single exact block, no pad
    return 128                                   # ragged last block (masked)


def fused_matmul(x, w, bias, residual=None, relu_cols=None,
                 out_dtype=jnp.bfloat16):
    """(M,Kp) @ (Kp,Cp) + bias (+res) (+relu).  Kp, Cp are 128-multiples;
    the whole weight stays resident in VMEM (constant index_map)."""
    M, K = x.shape
    Kp, Cp = w.shape
    assert K == Kp, (K, Kp)
    x = x.astype(jnp.bfloat16)

    TM = _pick_tm(M)
    grid_m = pl.cdiv(M, TM)
    has_res = residual is not None

    inputs = [x, w, bias]
    in_specs = [
        pl.BlockSpec((TM, Kp), lambda i: (i, 0)),
        pl.BlockSpec((Kp, Cp), lambda i: (0, 0)),   # weight resident
        pl.BlockSpec((1, Cp), lambda i: (0, 0)),    # bias resident
    ]
    if has_res:
        inputs.append(residual.astype(jnp.bfloat16))
        in_specs.append(pl.BlockSpec((TM, Cp), lambda i: (i, 0)))

    flops = 2 * M * Kp * Cp
    bytes_accessed = 2 * (M * Kp + Kp * Cp + M * Cp * (2 if has_res else 1)) + 4 * Cp

    return pl.pallas_call(
        functools.partial(_fused_matmul_kernel, relu_cols=relu_cols,
                          has_res=has_res),
        out_shape=jax.ShapeDtypeStruct((M, Cp), out_dtype),
        grid=(grid_m,),
        in_specs=in_specs,
        out_specs=pl.BlockSpec((TM, Cp), lambda i: (i, 0)),
        compiler_params=pltpu.CompilerParams(
            dimension_semantics=("parallel",)),
        cost_estimate=pl.CostEstimate(flops=flops, transcendentals=0,
                                      bytes_accessed=bytes_accessed),
    )(*inputs)


def _maxpool_kernel(e0_ref, e1_ref, e2_ref, o0_ref, o1_ref, o2_ref, o_ref):
    """3x3/stride-2 max: W-direction already parity-split in the wrapper, the
    three H taps are combined here with leading-dim slices only."""
    we = jnp.maximum(jnp.maximum(e0_ref[0], e1_ref[0]), e2_ref[0])  # (Ho+1,Wo,C)
    wo = jnp.maximum(jnp.maximum(o0_ref[0], o1_ref[0]), o2_ref[0])  # (Ho,  Wo,C)
    Ho = o_ref.shape[1]
    o_ref[0] = jnp.maximum(jnp.maximum(we[:Ho], we[1:Ho + 1]), wo)


def maxpool_3x3_s2_ceil(x):
    """nn.MaxPool2d(kernel_size=3, stride=2, padding=0, ceil_mode=True), NHWC."""
    N, H, W, C = x.shape

    def out_size(L):
        o = -(-(L - 3) // 2) + 1          # ceil mode
        if (o - 1) * 2 >= L:              # last window must start inside input
            o -= 1
        return o

    Ho, Wo = out_size(H), out_size(W)
    Hn, Wn = 2 * Ho + 1, 2 * Wo + 1
    neg = float(jnp.finfo(x.dtype).min)
    xp = jnp.pad(x, ((0, 0), (0, Hn - H), (0, Wn - W), (0, 0)),
                 constant_values=neg)

    # Parity decomposition: 6 quarter-size strided slices replace the old
    # 9 full-size shifted copies (all remaining shifts are in-kernel and on
    # the leading H dim only).
    e0 = xp[:, 0:Hn:2, 0:2 * Wo - 1:2, :]   # (N, Ho+1, Wo, C)
    e1 = xp[:, 0:Hn:2, 1:2 * Wo:2, :]
    e2 = xp[:, 0:Hn:2, 2:2 * Wo + 1:2, :]
    o0 = xp[:, 1:Hn:2, 0:2 * Wo - 1:2, :]   # (N, Ho,   Wo, C)
    o1 = xp[:, 1:Hn:2, 1:2 * Wo:2, :]
    o2 = xp[:, 1:Hn:2, 2:2 * Wo + 1:2, :]

    spec_e = pl.BlockSpec((1, Ho + 1, Wo, C), lambda n: (n, 0, 0, 0))
    spec_o = pl.BlockSpec((1, Ho, Wo, C), lambda n: (n, 0, 0, 0))
    return pl.pallas_call(
        _maxpool_kernel,
        out_shape=jax.ShapeDtypeStruct((N, Ho, Wo, C), x.dtype),
        grid=(N,),
        in_specs=[spec_e, spec_e, spec_e, spec_o, spec_o, spec_o],
        out_specs=pl.BlockSpec((1, Ho, Wo, C), lambda n: (n, 0, 0, 0)),
        compiler_params=pltpu.CompilerParams(dimension_semantics=("parallel",)),
    )(e0, e1, e2, o0, o1, o2)


# ----------------------------------------------------------------------------
# Conv (im2col glue) + fused Pallas matmul
# ----------------------------------------------------------------------------
def conv_bn(x, p, stride, padding, dilation, relu_cols, residual=None):
    """x: (N,H,W,Cs) bf16 NHWC (Cs = stored/padded channels).
    p: dict with 'w' (Kp,Cp) bf16, 'b' (1,Cp) f32, 'k', 'cin' (true cin)."""
    w, b, k, cin = p["w"], p["b"], p["k"], p["cin"]
    N, H, W, Cs = x.shape
    Kp, Cp = w.shape

    if k == 1:
        if stride > 1:
            x = x[:, ::stride, ::stride, :]
        _, Ho, Wo, _ = x.shape
        patches = x.reshape(N * Ho * Wo, Cs)                 # Cs == Kp
    else:
        Ho = (H + 2 * padding - dilation * (k - 1) - 1) // stride + 1
        Wo = (W + 2 * padding - dilation * (k - 1) - 1) // stride + 1
        xs = x[..., :cin] if cin < Cs else x                 # true-cin im2col
        xpad = jnp.pad(xs, ((0, 0), (padding, padding),
                            (padding, padding), (0, 0)))
        cols = []
        for i in range(k):
            for j in range(k):
                cols.append(
                    xpad[:, i * dilation:i * dilation + (Ho - 1) * stride + 1:stride,
                         j * dilation:j * dilation + (Wo - 1) * stride + 1:stride, :])
        kkcin = k * k * cin
        if Kp > kkcin:                                       # pad K once, to 128
            cols.append(jnp.zeros((N, Ho, Wo, Kp - kkcin), x.dtype))
        patches = jnp.concatenate(cols, axis=-1).reshape(N * Ho * Wo, Kp)

    res2d = None
    if residual is not None:
        res2d = residual.reshape(N * Ho * Wo, Cp)

    out = fused_matmul(patches, w, b, residual=res2d, relu_cols=relu_cols)
    return out.reshape(N, Ho, Wo, Cp)


# ----------------------------------------------------------------------------
# Parameter construction (deterministic, matching the module's init scheme)
# ----------------------------------------------------------------------------
def _make_weight(key, cin, cout, k):
    # kaiming_normal_(mode='fan_out', nonlinearity='relu'): std = sqrt(2/(cout*k*k))
    std = math.sqrt(2.0 / (cout * k * k))
    w = std * jax.random.normal(key, (k, k, cin, cout), jnp.float32)
    # BN (eval, default stats): scale = 1/sqrt(1+eps), bias = 0 -> fold scale.
    return w * (1.0 / math.sqrt(1.0 + EPS))


def make_conv_bn_params(key, cin, cout, k, cin_stored=None):
    cout_p = _round_up(cout, 128)
    w = _make_weight(key, cin, cout, k)
    if k == 1:
        cin_p = cin_stored if cin_stored is not None else _round_up(cin, 128)
        w = jnp.pad(w, ((0, 0), (0, 0), (0, cin_p - cin), (0, cout_p - cout)))
        w = w.reshape(cin_p, cout_p)
        Kp = _round_up(cin_p, 128)
        if Kp != cin_p:
            w = jnp.pad(w, ((0, Kp - cin_p), (0, 0)))
    else:
        # k>1 convs contract over the TRUE cin (activation is sliced at call
        # time), padded once to a 128-multiple -> much smaller Kp.
        w = jnp.pad(w, ((0, 0), (0, 0), (0, 0), (0, cout_p - cout)))
        w = w.reshape(k * k * cin, cout_p)
        Kp = _round_up(k * k * cin, 128)
        if Kp != k * k * cin:
            w = jnp.pad(w, ((0, Kp - k * k * cin), (0, 0)))
    bias = jnp.zeros((1, cout_p), jnp.float32)   # beta - mean*scale = 0
    return {"w": w.astype(jnp.bfloat16), "b": bias, "k": k, "cin": cin}


def make_fused_1x1_params(key1, key2, cin, cout1, cout2, cin_stored):
    """conv1 (ReLU) and stride-1 downsample (no ReLU) share x -> one matmul."""
    c1p, c2p = _round_up(cout1, 128), _round_up(cout2, 128)
    w1 = _make_weight(key1, cin, cout1, 1)[0, 0]
    w2 = _make_weight(key2, cin, cout2, 1)[0, 0]
    w1 = jnp.pad(w1, ((0, cin_stored - cin), (0, c1p - cout1)))
    w2 = jnp.pad(w2, ((0, cin_stored - cin), (0, c2p - cout2)))
    w = jnp.concatenate([w1, w2], axis=1)
    bias = jnp.zeros((1, c1p + c2p), jnp.float32)
    return {"w": w.astype(jnp.bfloat16), "b": bias, "k": 1, "cin": cin,
            "split": c1p}


def build_resnet_params(key, layers=(1, 1, 1, 1), base=16):
    keys = iter(jax.random.split(key, 256))
    stem = make_conv_bn_params(next(keys), 3, base, 7)   # input channels as-is
    inplanes = base
    layer_defs = [
        (base * 1, layers[0], 1, 1),
        (base * 2, layers[1], 2, 1),
        (base * 4, layers[2], 1, 2),
        (base * 8, layers[3], 1, 4),
    ]
    all_layers, stage_channels = [], []
    for planes, nblocks, stride, dilation in layer_defs:
        blocks = []
        for b in range(nblocks):
            s = stride if b == 0 else 1
            has_ds = (b == 0) and (stride != 1 or inplanes != planes * 4)
            in_p = _round_up(inplanes, 128)
            mid_p = _round_up(planes, 128)
            out_p = _round_up(planes * 4, 128)
            blk = {"stride": s, "dilation": dilation,
                   "mid_p": mid_p, "out_p": out_p,
                   "fused_c1ds": None, "conv1": None, "downsample": None}
            k1, k2, k3 = next(keys), next(keys), next(keys)
            if has_ds and s == 1:
                blk["fused_c1ds"] = make_fused_1x1_params(
                    k1, next(keys), inplanes, planes, planes * 4, in_p)
            else:
                blk["conv1"] = make_conv_bn_params(k1, inplanes, planes, 1, in_p)
                if has_ds:
                    blk["downsample"] = make_conv_bn_params(
                        next(keys), inplanes, planes * 4, 1, in_p)
            blk["conv2"] = make_conv_bn_params(k2, planes, planes, 3)
            blk["conv3"] = make_conv_bn_params(k3, planes, planes * 4, 1, mid_p)
            blocks.append(blk)
            inplanes = planes * 4
        all_layers.append(blocks)
        stage_channels.append(inplanes)
    return {"stem": stem, "layers": all_layers,
            "stage_channels": stage_channels}


# ----------------------------------------------------------------------------
# Forward pass
# ----------------------------------------------------------------------------
def bottleneck_forward(x, blk):
    s, d = blk["stride"], blk["dilation"]
    mid_p, out_p = blk["mid_p"], blk["out_p"]
    if blk["fused_c1ds"] is not None:
        # conv1 + downsample in one matmul; ReLU applied to conv1 columns only.
        both = conv_bn(x, blk["fused_c1ds"], 1, 0, 1, relu_cols=mid_p)
        residual = both[..., mid_p:mid_p + out_p]
        h = both                       # conv2 slices [..., :planes] internally
    else:
        if blk["downsample"] is not None:
            residual = conv_bn(x, blk["downsample"], s, 0, 1, relu_cols=0)
        else:
            residual = x
        h = conv_bn(x, blk["conv1"], 1, 0, 1, relu_cols=None)
    h = conv_bn(h, blk["conv2"], s, d, d, relu_cols=None)
    out = conv_bn(h, blk["conv3"], 1, 0, 1, relu_cols=None, residual=residual)
    return out


def resnet_forward(x_nchw, params):
    # NCHW -> NHWC, bf16 for the MXU path (f32 accumulation inside the kernel).
    x = jnp.transpose(x_nchw, (0, 2, 3, 1)).astype(jnp.bfloat16)
    x = conv_bn(x, params["stem"], 2, 3, 1, relu_cols=None)
    x = maxpool_3x3_s2_ceil(x)
    stage_outs = []
    for blocks in params["layers"]:
        for blk in blocks:
            x = bottleneck_forward(x, blk)
        stage_outs.append(x)

    def to_nchw(t, c):
        return jnp.transpose(t[..., :c], (0, 3, 1, 2)).astype(jnp.float32)

    sc = params["stage_channels"]
    return {"x2": to_nchw(stage_outs[1], sc[1]),
            "x3": to_nchw(stage_outs[2], sc[2]),
            "x4": to_nchw(stage_outs[3], sc[3])}


if __name__ == "__main__":
    base = 16
    key = jax.random.PRNGKey(0)
    pkey, xkey = jax.random.split(key)
    params = build_resnet_params(pkey, layers=(1, 1, 1, 1), base=base)

    # PyTorch-convention NCHW input
    x = jax.random.normal(xkey, (2, 3, 32, 32), jnp.float32)

    fwd = jax.jit(lambda inp: resnet_forward(inp, params))
    out = fwd(x)
    jax.block_until_ready(out)

    assert out["x2"].shape == (2, base * 2 * 4, 4, 4), out["x2"].shape
    assert out["x3"].shape == (2, base * 4 * 4, 4, 4), out["x3"].shape
    assert out["x4"].shape == (2, base * 8 * 4, 4, 4), out["x4"].shape
    assert all(bool(jnp.isfinite(v).all()) for v in out.values())
    print("KERNEL_OK")
</pallas_src>

<mosaic_0001>
module attributes {stable_mosaic.version = 11 : i64} {
  func.func @_fused_matmul_kernel(%arg0: i32, %arg1: memref<256x256xbf16, #tpu.memory_space<vmem>>, %arg2: memref<256x128xbf16, #tpu.memory_space<vmem>>, %arg3: memref<1x128xf32, #tpu.memory_space<vmem>>, %arg4: memref<256x128xbf16, #tpu.memory_space<vmem>>) attributes {dimension_semantics = [#tpu.dimension_semantics<parallel>], iteration_bounds = array<i64: 2>, scalar_prefetch = 0 : i64, scratch_operands = 0 : i64, tpu.core_type = #tpu.core_type<tc>, window_params = [{transform_indices = @transform_0, window_bounds = array<i64: 256, 256>}, {pipeline_mode = #tpu.pipeline_mode<synchronous>, transform_indices = @transform_1, window_bounds = array<i64: 256, 128>}, {pipeline_mode = #tpu.pipeline_mode<synchronous>, transform_indices = @transform_2, window_bounds = array<i64: 1, 128>}, {transform_indices = @transform_3, window_bounds = array<i64: 256, 128>}]} {
    %c0 = arith.constant 0 : index
    %c0_0 = arith.constant 0 : index
    %0 = vector.load %arg1[%c0, %c0_0] : memref<256x256xbf16, #tpu.memory_space<vmem>>, vector<256x256xbf16>
    %c0_1 = arith.constant 0 : index
    %c0_2 = arith.constant 0 : index
    %1 = vector.load %arg2[%c0_1, %c0_2] : memref<256x128xbf16, #tpu.memory_space<vmem>>, vector<256x128xbf16>
    %cst = arith.constant dense<0.000000e+00> : vector<256x128xf32>
    %2 = tpu.matmul %0, %1, %cst {dimension_numbers = #tpu.dot_dimension_numbers<[1], [0], [0], [1], [0, 0, 1, 1], [], []>} : vector<256x256xbf16>, vector<256x128xbf16>, vector<256x128xf32> -> vector<256x128xf32>
    %c0_3 = arith.constant 0 : index
    %c0_4 = arith.constant 0 : index
    %3 = vector.load %arg3[%c0_3, %c0_4] : memref<1x128xf32, #tpu.memory_space<vmem>>, vector<1x128xf32>
    %4 = vector.broadcast %3 : vector<1x128xf32> to vector<256x128xf32>
    %5 = arith.addf %2, %4 : vector<256x128xf32>
    %cst_5 = arith.constant 0.000000e+00 : f32
    %6 = vector.broadcast %cst_5 : f32 to vector<256x128xf32>
    %7 = arith.maximumf %5, %6 : vector<256x128xf32>
    %8 = arith.truncf %7 : vector<256x128xf32> to vector<256x128xbf16>
    %c0_6 = arith.constant 0 : index
    %c0_7 = arith.constant 0 : index
    %9 = vector.load %arg4[%c0_6, %c0_7] : memref<256x128xbf16, #tpu.memory_space<vmem>>, vector<256x128xbf16>
    tpu.vector_store %arg4[%c0_6, %c0_7], %8 {strides = array<i32>} : memref<256x128xbf16, #tpu.memory_space<vmem>>, vector<256x128xbf16>,
    return
  }
  func.func @transform_0(%arg0: i32) -> (i32, i32) {
    %c0_i32 = arith.constant 0 : i32
    %c0_i32_0 = arith.constant 0 : i32
    return %arg0, %c0_i32 : i32, i32
  }
  func.func @transform_1(%arg0: i32) -> (i32, i32) {
    %c0_i32 = arith.constant 0 : i32
    %c0_i32_0 = arith.constant 0 : i32
    %c0_i32_1 = arith.constant 0 : i32
    return %c0_i32, %c0_i32_0 : i32, i32
  }
  func.func @transform_2(%arg0: i32) -> (i32, i32) {
    %c0_i32 = arith.constant 0 : i32
    %c0_i32_0 = arith.constant 0 : i32
    %c0_i32_1 = arith.constant 0 : i32
    return %c0_i32, %c0_i32_0 : i32, i32
  }
  func.func @transform_3(%arg0: i32) -> (i32, i32) {
    %c0_i32 = arith.constant 0 : i32
    %c0_i32_0 = arith.constant 0 : i32
    return %arg0, %c0_i32 : i32, i32
  }
}

module attributes {stable_mosaic.version = 11 : i64} {
  func.func @_fused_matmul_kernel(%arg0: i32, %arg1: memref<128x128xbf16, #tpu.memory_space<vmem>>, %arg2: memref<128x256xbf16, #tpu.memory_space<vmem>>, %arg3: memref<1x256xf32, #tpu.memory_space<vmem>>, %arg4: memref<128x256xbf16, #tpu.memory_space<vmem>>) attributes {dimension_semantics = [#tpu.dimension_semantics<parallel>], iteration_bounds = array<i64: 1>, scalar_prefetch = 0 : i64, scratch_operands = 0 : i64, tpu.core_type = #tpu.core_type<tc>, window_params = [{transform_indices = @transform_0, window_bounds = array<i64: 128, 128>}, {pipeline_mode = #tpu.pipeline_mode<synchronous>, transform_indices = @transform_1, window_bounds = array<i64: 128, 256>}, {pipeline_mode = #tpu.pipeline_mode<synchronous>, transform_indices = @transform_2, window_bounds = array<i64: 1, 256>}, {transform_indices = @transform_3, window_bounds = array<i64: 128, 256>}]} {
    %c0 = arith.constant 0 : index
    %c0_0 = arith.constant 0 : index
    %0 = vector.load %arg1[%c0, %c0_0] : memref<128x128xbf16, #tpu.memory_space<vmem>>, vector<128x128xbf16>
    %c0_1 = arith.constant 0 : index
    %c0_2 = arith.constant 0 : index
    %1 = vector.load %arg2[%c0_1, %c0_2] : memref<128x256xbf16, #tpu.memory_space<vmem>>, vector<128x256xbf16>
    %cst = arith.constant dense<0.000000e+00> : vector<128x256xf32>
    %2 = tpu.matmul %0, %1, %cst {dimension_numbers = #tpu.dot_dimension_numbers<[1], [0], [0], [1], [0, 0, 1, 1], [], []>} : vector<128x128xbf16>, vector<128x256xbf16>, vector<128x256xf32> -> vector<128x256xf32>
    %c0_3 = arith.constant 0 : index
    %c0_4 = arith.constant 0 : index
    %3 = vector.load %arg3[%c0_3, %c0_4] : memref<1x256xf32, #tpu.memory_space<vmem>>, vector<1x256xf32>
    %4 = vector.broadcast %3 : vector<1x256xf32> to vector<128x256xf32>
    %5 = arith.addf %2, %4 : vector<128x256xf32>
    %6 = tpu.iota {dimensions = array<i32: 1>} : vector<128x256xi32>
    %c128_i32 = arith.constant 128 : i32
    %7 = vector.broadcast %c128_i32 : i32 to vector<128x256xi32>
    %8 = arith.cmpi slt, %6, %7 : vector<128x256xi32>
    %cst_5 = arith.constant 0.000000e+00 : f32
    %9 = vector.broadcast %cst_5 : f32 to vector<128x256xf32>
    %10 = arith.maximumf %5, %9 : vector<128x256xf32>
    %11 = arith.select %8, %10, %5 : vector<128x256xi1>, vector<128x256xf32>
    %12 = arith.truncf %11 : vector<128x256xf32> to vector<128x256xbf16>
    %c0_6 = arith.constant 0 : index
    %c0_7 = arith.constant 0 : index
    %13 = vector.load %arg4[%c0_6, %c0_7] : memref<128x256xbf16, #tpu.memory_space<vmem>>, vector<128x256xbf16>
    tpu.vector_store %arg4[%c0_6, %c0_7], %12 {strides = array<i32>} : memref<128x256xbf16, #tpu.memory_space<vmem>>, vector<128x256xbf16>,
    return
  }
  func.func @transform_0(%arg0: i32) -> (i32, i32) {
    %c0_i32 = arith.constant 0 : i32
    %c0_i32_0 = arith.constant 0 : i32
    return %arg0, %c0_i32 : i32, i32
  }
  func.func @transform_1(%arg0: i32) -> (i32, i32) {
    %c0_i32 = arith.constant 0 : i32
    %c0_i32_0 = arith.constant 0 : i32
    %c0_i32_1 = arith.constant 0 : i32
    return %c0_i32, %c0_i32_0 : i32, i32
  }
  func.func @transform_2(%arg0: i32) -> (i32, i32) {
    %c0_i32 = arith.constant 0 : i32
    %c0_i32_0 = arith.constant 0 : i32
    %c0_i32_1 = arith.constant 0 : i32
    return %c0_i32, %c0_i32_0 : i32, i32
  }
  func.func @transform_3(%arg0: i32) -> (i32, i32) {
    %c0_i32 = arith.constant 0 : i32
    %c0_i32_0 = arith.constant 0 : i32
    return %arg0, %c0_i32 : i32, i32
  }
}

module attributes {stable_mosaic.version = 11 : i64} {
  func.func @_maxpool_kernel(%arg0: i32, %arg1: memref<1x9x8x128xbf16, #tpu.memory_space<vmem>>, %arg2: memref<1x9x8x128xbf16, #tpu.memory_space<vmem>>, %arg3: memref<1x9x8x128xbf16, #tpu.memory_space<vmem>>, %arg4: memref<1x8x8x128xbf16, #tpu.memory_space<vmem>>, %arg5: memref<1x8x8x128xbf16, #tpu.memory_space<vmem>>, %arg6: memref<1x8x8x128xbf16, #tpu.memory_space<vmem>>, %arg7: memref<1x8x8x128xbf16, #tpu.memory_space<vmem>>) attributes {dimension_semantics = [#tpu.dimension_semantics<parallel>], iteration_bounds = array<i64: 2>, scalar_prefetch = 0 : i64, scratch_operands = 0 : i64, tpu.core_type = #tpu.core_type<tc>, window_params = [{transform_indices = @transform_0, window_bounds = array<i64: 1, 9, 8, 128>}, {transform_indices = @transform_1, window_bounds = array<i64: 1, 9, 8, 128>}, {transform_indices = @transform_2, window_bounds = array<i64: 1, 9, 8, 128>}, {transform_indices = @transform_3, window_bounds = array<i64: 1, 8, 8, 128>}, {transform_indices = @transform_4, window_bounds = array<i64: 1, 8, 8, 128>}, {transform_indices = @transform_5, window_bounds = array<i64: 1, 8, 8, 128>}, {transform_indices = @transform_6, window_bounds = array<i64: 1, 8, 8, 128>}]} {
    %c0 = arith.constant 0 : index
    %c0_0 = arith.constant 0 : index
    %c0_1 = arith.constant 0 : index
    %c0_2 = arith.constant 0 : index
    %0 = vector.load %arg1[%c0, %c0_0, %c0_1, %c0_2] : memref<1x9x8x128xbf16, #tpu.memory_space<vmem>>, vector<1x9x8x128xbf16>
    %1 = vector.shape_cast %0 : vector<1x9x8x128xbf16> to vector<9x8x128xbf16>
    %c0_3 = arith.constant 0 : index
    %c0_4 = arith.constant 0 : index
    %c0_5 = arith.constant 0 : index
    %c0_6 = arith.constant 0 : index
    %2 = vector.load %arg2[%c0_3, %c0_4, %c0_5, %c0_6] : memref<1x9x8x128xbf16, #tpu.memory_space<vmem>>, vector<1x9x8x128xbf16>
    %3 = vector.shape_cast %2 : vector<1x9x8x128xbf16> to vector<9x8x128xbf16>
    %4 = arith.maximumf %1, %3 : vector<9x8x128xbf16>
    %c0_7 = arith.constant 0 : index
    %c0_8 = arith.constant 0 : index
    %c0_9 = arith.constant 0 : index
    %c0_10 = arith.constant 0 : index
    %5 = vector.load %arg3[%c0_7, %c0_8, %c0_9, %c0_10] : memref<1x9x8x128xbf16, #tpu.memory_space<vmem>>, vector<1x9x8x128xbf16>
    %6 = vector.shape_cast %5 : vector<1x9x8x128xbf16> to vector<9x8x128xbf16>
    %7 = arith.maximumf %4, %6 : vector<9x8x128xbf16>
    %c0_11 = arith.constant 0 : index
    %c0_12 = arith.constant 0 : index
    %c0_13 = arith.constant 0 : index
    %c0_14 = arith.constant 0 : index
    %8 = vector.load %arg4[%c0_11, %c0_12, %c0_13, %c0_14] : memref<1x8x8x128xbf16, #tpu.memory_space<vmem>>, vector<1x8x8x128xbf16>
    %9 = vector.shape_cast %8 : vector<1x8x8x128xbf16> to vector<8x8x128xbf16>
    %c0_15 = arith.constant 0 : index
    %c0_16 = arith.constant 0 : index
    %c0_17 = arith.constant 0 : index
    %c0_18 = arith.constant 0 : index
    %10 = vector.load %arg5[%c0_15, %c0_16, %c0_17, %c0_18] : memref<1x8x8x128xbf16, #tpu.memory_space<vmem>>, vector<1x8x8x128xbf16>
    %11 = vector.shape_cast %10 : vector<1x8x8x128xbf16> to vector<8x8x128xbf16>
    %12 = arith.maximumf %9, %11 : vector<8x8x128xbf16>
    %c0_19 = arith.constant 0 : index
    %c0_20 = arith.constant 0 : index
    %c0_21 = arith.constant 0 : index
    %c0_22 = arith.constant 0 : index
    %13 = vector.load %arg6[%c0_19, %c0_20, %c0_21, %c0_22] : memref<1x8x8x128xbf16, #tpu.memory_space<vmem>>, vector<1x8x8x128xbf16>
    %14 = vector.shape_cast %13 : vector<1x8x8x128xbf16> to vector<8x8x128xbf16>
    %15 = arith.maximumf %12, %14 : vector<8x8x128xbf16>
    %16 = vector.extract_strided_slice %7 {offsets = [0, 0, 0], sizes = [8, 8, 128], strides = [1, 1, 1]} : vector<9x8x128xbf16> to vector<8x8x128xbf16>
    %17 = vector.extract_strided_slice %7 {offsets = [1, 0, 0], sizes = [8, 8, 128], strides = [1, 1, 1]} : vector<9x8x128xbf16> to vector<8x8x128xbf16>
    %18 = arith.maximumf %16, %17 : vector<8x8x128xbf16>
    %19 = arith.maximumf %18, %15 : vector<8x8x128xbf16>
    %c0_23 = arith.constant 0 : index
    %c0_24 = arith.constant 0 : index
    %c0_25 = arith.constant 0 : index
    %c0_26 = arith.constant 0 : index
    %20 = vector.load %arg7[%c0_23, %c0_24, %c0_25, %c0_26] : memref<1x8x8x128xbf16, #tpu.memory_space<vmem>>, vector<1x8x8x128xbf16>
    %21 = vector.shape_cast %20 : vector<1x8x8x128xbf16> to vector<8x8x128xbf16>
    %22 = vector.shape_cast %19 : vector<8x8x128xbf16> to vector<1x8x8x128xbf16>
    tpu.vector_store %arg7[%c0_23, %c0_24, %c0_25, %c0_26], %22 {strides = array<i32>} : memref<1x8x8x128xbf16, #tpu.memory_space<vmem>>, vector<1x8x8x128xbf16>,
    return
  }
  func.func @transform_0(%arg0: i32) -> (i32, i32, i32, i32) {
    %c0_i32 = arith.constant 0 : i32
    %c0_i32_0 = arith.constant 0 : i32
    %c0_i32_1 = arith.constant 0 : i32
    %c0_i32_2 = arith.constant 0 : i32
    return %arg0, %c0_i32, %c0_i32_0, %c0_i32_1 : i32, i32, i32, i32
  }
  func.func @transform_1(%arg0: i32) -> (i32, i32, i32, i32) {
    %c0_i32 = arith.constant 0 : i32
    %c0_i32_0 = arith.constant 0 : i32
    %c0_i32_1 = arith.constant 0 : i32
    %c0_i32_2 = arith.constant 0 : i32
    return %arg0, %c0_i32, %c0_i32_0, %c0_i32_1 : i32, i32, i32, i32
  }
  func.func @transform_2(%arg0: i32) -> (i32, i32, i32, i32) {
    %c0_i32 = arith.constant 0 : i32
    %c0_i32_0 = arith.constant 0 : i32
    %c0_i32_1 = arith.constant 0 : i32
    %c0_i32_2 = arith.constant 0 : i32
    return %arg0, %c0_i32, %c0_i32_0, %c0_i32_1 : i32, i32, i32, i32
  }
  func.func @transform_3(%arg0: i32) -> (i32, i32, i32, i32) {
    %c0_i32 = arith.constant 0 : i32
    %c0_i32_0 = arith.constant 0 : i32
    %c0_i32_1 = arith.constant 0 : i32
    %c0_i32_2 = arith.constant 0 : i32
    return %arg0, %c0_i32, %c0_i32_0, %c0_i32_1 : i32, i32, i32, i32
  }
  func.func @transform_4(%arg0: i32) -> (i32, i32, i32, i32) {
    %c0_i32 = arith.constant 0 : i32
    %c0_i32_0 = arith.constant 0 : i32
    %c0_i32_1 = arith.constant 0 : i32
    %c0_i32_2 = arith.constant 0 : i32
    return %arg0, %c0_i32, %c0_i32_0, %c0_i32_1 : i32, i32, i32, i32
  }
  func.func @transform_5(%arg0: i32) -> (i32, i32, i32, i32) {
    %c0_i32 = arith.constant 0 : i32
    %c0_i32_0 = arith.constant 0 : i32
    %c0_i32_1 = arith.constant 0 : i32
    %c0_i32_2 = arith.constant 0 : i32
    return %arg0, %c0_i32, %c0_i32_0, %c0_i32_1 : i32, i32, i32, i32
  }
  func.func @transform_6(%arg0: i32) -> (i32, i32, i32, i32) {
    %c0_i32 = arith.constant 0 : i32
    %c0_i32_0 = arith.constant 0 : i32
    %c0_i32_1 = arith.constant 0 : i32
    %c0_i32_2 = arith.constant 0 : i32
    return %arg0, %c0_i32, %c0_i32_0, %c0_i32_1 : i32, i32, i32, i32
  }
}

module attributes {stable_mosaic.version = 11 : i64} {
  func.func @_fused_matmul_kernel(%arg0: i32, %arg1: memref<128x256xbf16, #tpu.memory_space<vmem>>, %arg2: memref<256x128xbf16, #tpu.memory_space<vmem>>, %arg3: memref<1x128xf32, #tpu.memory_space<vmem>>, %arg4: memref<128x128xbf16, #tpu.memory_space<vmem>>) attributes {dimension_semantics = [#tpu.dimension_semantics<parallel>], iteration_bounds = array<i64: 1>, scalar_prefetch = 0 : i64, scratch_operands = 0 : i64, tpu.core_type = #tpu.core_type<tc>, window_params = [{transform_indices = @transform_0, window_bounds = array<i64: 128, 256>}, {pipeline_mode = #tpu.pipeline_mode<synchronous>, transform_indices = @transform_1, window_bounds = array<i64: 256, 128>}, {pipeline_mode = #tpu.pipeline_mode<synchronous>, transform_indices = @transform_2, window_bounds = array<i64: 1, 128>}, {transform_indices = @transform_3, window_bounds = array<i64: 128, 128>}]} {
    %c0 = arith.constant 0 : index
    %c0_0 = arith.constant 0 : index
    %0 = vector.load %arg1[%c0, %c0_0] : memref<128x256xbf16, #tpu.memory_space<vmem>>, vector<128x256xbf16>
    %c0_1 = arith.constant 0 : index
    %c0_2 = arith.constant 0 : index
    %1 = vector.load %arg2[%c0_1, %c0_2] : memref<256x128xbf16, #tpu.memory_space<vmem>>, vector<256x128xbf16>
    %cst = arith.constant dense<0.000000e+00> : vector<128x128xf32>
    %2 = tpu.matmul %0, %1, %cst {dimension_numbers = #tpu.dot_dimension_numbers<[1], [0], [0], [1], [0, 0, 1, 1], [], []>} : vector<128x256xbf16>, vector<256x128xbf16>, vector<128x128xf32> -> vector<128x128xf32>
    %c0_3 = arith.constant 0 : index
    %c0_4 = arith.constant 0 : index
    %3 = vector.load %arg3[%c0_3, %c0_4] : memref<1x128xf32, #tpu.memory_space<vmem>>, vector<1x128xf32>
    %4 = vector.broadcast %3 : vector<1x128xf32> to vector<128x128xf32>
    %5 = arith.addf %2, %4 : vector<128x128xf32>
    %cst_5 = arith.constant 0.000000e+00 : f32
    %6 = vector.broadcast %cst_5 : f32 to vector<128x128xf32>
    %7 = arith.maximumf %5, %6 : vector<128x128xf32>
    %8 = arith.truncf %7 : vector<128x128xf32> to vector<128x128xbf16>
    %c0_6 = arith.constant 0 : index
    %c0_7 = arith.constant 0 : index
    %9 = vector.load %arg4[%c0_6, %c0_7] : memref<128x128xbf16, #tpu.memory_space<vmem>>, vector<128x128xbf16>
    tpu.vector_store %arg4[%c0_6, %c0_7], %8 {strides = array<i32>} : memref<128x128xbf16, #tpu.memory_space<vmem>>, vector<128x128xbf16>,
    return
  }
  func.func @transform_0(%arg0: i32) -> (i32, i32) {
    %c0_i32 = arith.constant 0 : i32
    %c0_i32_0 = arith.constant 0 : i32
    return %arg0, %c0_i32 : i32, i32
  }
  func.func @transform_1(%arg0: i32) -> (i32, i32) {
    %c0_i32 = arith.constant 0 : i32
    %c0_i32_0 = arith.constant 0 : i32
    %c0_i32_1 = arith.constant 0 : i32
    return %c0_i32, %c0_i32_0 : i32, i32
  }
  func.func @transform_2(%arg0: i32) -> (i32, i32) {
    %c0_i32 = arith.constant 0 : i32
    %c0_i32_0 = arith.constant 0 : i32
    %c0_i32_1 = arith.constant 0 : i32
    return %c0_i32, %c0_i32_0 : i32, i32
  }
  func.func @transform_3(%arg0: i32) -> (i32, i32) {
    %c0_i32 = arith.constant 0 : i32
    %c0_i32_0 = arith.constant 0 : i32
    return %arg0, %c0_i32 : i32, i32
  }
}

module attributes {stable_mosaic.version = 11 : i64} {
  func.func @_fused_matmul_kernel(%arg0: i32, %arg1: memref<128x128xbf16, #tpu.memory_space<vmem>>, %arg2: memref<128x128xbf16, #tpu.memory_space<vmem>>, %arg3: memref<1x128xf32, #tpu.memory_space<vmem>>, %arg4: memref<128x128xbf16, #tpu.memory_space<vmem>>, %arg5: memref<128x128xbf16, #tpu.memory_space<vmem>>) attributes {dimension_semantics = [#tpu.dimension_semantics<parallel>], iteration_bounds = array<i64: 1>, scalar_prefetch = 0 : i64, scratch_operands = 0 : i64, tpu.core_type = #tpu.core_type<tc>, window_params = [{transform_indices = @transform_0, window_bounds = array<i64: 128, 128>}, {pipeline_mode = #tpu.pipeline_mode<synchronous>, transform_indices = @transform_1, window_bounds = array<i64: 128, 128>}, {pipeline_mode = #tpu.pipeline_mode<synchronous>, transform_indices = @transform_2, window_bounds = array<i64: 1, 128>}, {transform_indices = @transform_3, window_bounds = array<i64: 128, 128>}, {transform_indices = @transform_4, window_bounds = array<i64: 128, 128>}]} {
    %c0 = arith.constant 0 : index
    %c0_0 = arith.constant 0 : index
    %0 = vector.load %arg1[%c0, %c0_0] : memref<128x128xbf16, #tpu.memory_space<vmem>>, vector<128x128xbf16>
    %c0_1 = arith.constant 0 : index
    %c0_2 = arith.constant 0 : index
    %1 = vector.load %arg2[%c0_1, %c0_2] : memref<128x128xbf16, #tpu.memory_space<vmem>>, vector<128x128xbf16>
    %cst = arith.constant dense<0.000000e+00> : vector<128x128xf32>
    %2 = tpu.matmul %0, %1, %cst {dimension_numbers = #tpu.dot_dimension_numbers<[1], [0], [0], [1], [0, 0, 1, 1], [], []>} : vector<128x128xbf16>, vector<128x128xbf16>, vector<128x128xf32> -> vector<128x128xf32>
    %c0_3 = arith.constant 0 : index
    %c0_4 = arith.constant 0 : index
    %3 = vector.load %arg3[%c0_3, %c0_4] : memref<1x128xf32, #tpu.memory_space<vmem>>, vector<1x128xf32>
    %4 = vector.broadcast %3 : vector<1x128xf32> to vector<128x128xf32>
    %5 = arith.addf %2, %4 : vector<128x128xf32>
    %c0_5 = arith.constant 0 : index
    %c0_6 = arith.constant 0 : index
    %6 = vector.load %arg4[%c0_5, %c0_6] : memref<128x128xbf16, #tpu.memory_space<vmem>>, vector<128x128xbf16>
    %7 = arith.extf %6 : vector<128x128xbf16> to vector<128x128xf32>
    %8 = arith.addf %5, %7 : vector<128x128xf32>
    %cst_7 = arith.constant 0.000000e+00 : f32
    %9 = vector.broadcast %cst_7 : f32 to vector<128x128xf32>
    %10 = arith.maximumf %8, %9 : vector<128x128xf32>
    %11 = arith.truncf %10 : vector<128x128xf32> to vector<128x128xbf16>
    %c0_8 = arith.constant 0 : index
    %c0_9 = arith.constant 0 : index
    %12 = vector.load %arg5[%c0_8, %c0_9] : memref<128x128xbf16, #tpu.memory_space<vmem>>, vector<128x128xbf16>
    tpu.vector_store %arg5[%c0_8, %c0_9], %11 {strides = array<i32>} : memref<128x128xbf16, #tpu.memory_space<vmem>>, vector<128x128xbf16>,
    return
  }
  func.func @transform_0(%arg0: i32) -> (i32, i32) {
    %c0_i32 = arith.constant 0 : i32
    %c0_i32_0 = arith.constant 0 : i32
    return %arg0, %c0_i32 : i32, i32
  }
  func.func @transform_1(%arg0: i32) -> (i32, i32) {
    %c0_i32 = arith.constant 0 : i32
    %c0_i32_0 = arith.constant 0 : i32
    %c0_i32_1 = arith.constant 0 : i32
    return %c0_i32, %c0_i32_0 : i32, i32
  }
  func.func @transform_2(%arg0: i32) -> (i32, i32) {
    %c0_i32 = arith.constant 0 : i32
    %c0_i32_0 = arith.constant 0 : i32
    %c0_i32_1 = arith.constant 0 : i32
    return %c0_i32, %c0_i32_0 : i32, i32
  }
  func.func @transform_3(%arg0: i32) -> (i32, i32) {
    %c0_i32 = arith.constant 0 : i32
    %c0_i32_0 = arith.constant 0 : i32
    return %arg0, %c0_i32 : i32, i32
  }
  func.func @transform_4(%arg0: i32) -> (i32, i32) {
    %c0_i32 = arith.constant 0 : i32
    %c0_i32_0 = arith.constant 0 : i32
    return %arg0, %c0_i32 : i32, i32
  }
}

module attributes {stable_mosaic.version = 11 : i64} {
  func.func @_fused_matmul_kernel(%arg0: i32, %arg1: memref<128x128xbf16, #tpu.memory_space<vmem>>, %arg2: memref<128x128xbf16, #tpu.memory_space<vmem>>, %arg3: memref<1x128xf32, #tpu.memory_space<vmem>>, %arg4: memref<128x128xbf16, #tpu.memory_space<vmem>>) attributes {dimension_semantics = [#tpu.dimension_semantics<parallel>], iteration_bounds = array<i64: 1>, scalar_prefetch = 0 : i64, scratch_operands = 0 : i64, tpu.core_type = #tpu.core_type<tc>, window_params = [{transform_indices = @transform_0, window_bounds = array<i64: 128, 128>}, {pipeline_mode = #tpu.pipeline_mode<synchronous>, transform_indices = @transform_1, window_bounds = array<i64: 128, 128>}, {pipeline_mode = #tpu.pipeline_mode<synchronous>, transform_indices = @transform_2, window_bounds = array<i64: 1, 128>}, {transform_indices = @transform_3, window_bounds = array<i64: 128, 128>}]} {
    %c0 = arith.constant 0 : index
    %c0_0 = arith.constant 0 : index
    %0 = vector.load %arg1[%c0, %c0_0] : memref<128x128xbf16, #tpu.memory_space<vmem>>, vector<128x128xbf16>
    %c0_1 = arith.constant 0 : index
    %c0_2 = arith.constant 0 : index
    %1 = vector.load %arg2[%c0_1, %c0_2] : memref<128x128xbf16, #tpu.memory_space<vmem>>, vector<128x128xbf16>
    %cst = arith.constant dense<0.000000e+00> : vector<128x128xf32>
    %2 = tpu.matmul %0, %1, %cst {dimension_numbers = #tpu.dot_dimension_numbers<[1], [0], [0], [1], [0, 0, 1, 1], [], []>} : vector<128x128xbf16>, vector<128x128xbf16>, vector<128x128xf32> -> vector<128x128xf32>
    %c0_3 = arith.constant 0 : index
    %c0_4 = arith.constant 0 : index
    %3 = vector.load %arg3[%c0_3, %c0_4] : memref<1x128xf32, #tpu.memory_space<vmem>>, vector<1x128xf32>
    %4 = vector.broadcast %3 : vector<1x128xf32> to vector<128x128xf32>
    %5 = arith.addf %2, %4 : vector<128x128xf32>
    %cst_5 = arith.constant 0.000000e+00 : f32
    %6 = vector.broadcast %cst_5 : f32 to vector<128x128xf32>
    %7 = arith.maximumf %5, %6 : vector<128x128xf32>
    %8 = arith.truncf %7 : vector<128x128xf32> to vector<128x128xbf16>
    %c0_6 = arith.constant 0 : index
    %c0_7 = arith.constant 0 : index
    %9 = vector.load %arg4[%c0_6, %c0_7] : memref<128x128xbf16, #tpu.memory_space<vmem>>, vector<128x128xbf16>
    tpu.vector_store %arg4[%c0_6, %c0_7], %8 {strides = array<i32>} : memref<128x128xbf16, #tpu.memory_space<vmem>>, vector<128x128xbf16>,
    return
  }
  func.func @transform_0(%arg0: i32) -> (i32, i32) {
    %c0_i32 = arith.constant 0 : i32
    %c0_i32_0 = arith.constant 0 : i32
    return %arg0, %c0_i32 : i32, i32
  }
  func.func @transform_1(%arg0: i32) -> (i32, i32) {
    %c0_i32 = arith.constant 0 : i32
    %c0_i32_0 = arith.constant 0 : i32
    %c0_i32_1 = arith.constant 0 : i32
    return %c0_i32, %c0_i32_0 : i32, i32
  }
  func.func @transform_2(%arg0: i32) -> (i32, i32) {
    %c0_i32 = arith.constant 0 : i32
    %c0_i32_0 = arith.constant 0 : i32
    %c0_i32_1 = arith.constant 0 : i32
    return %c0_i32, %c0_i32_0 : i32, i32
  }
  func.func @transform_3(%arg0: i32) -> (i32, i32) {
    %c0_i32 = arith.constant 0 : i32
    %c0_i32_0 = arith.constant 0 : i32
    return %arg0, %c0_i32 : i32, i32
  }
}

module attributes {stable_mosaic.version = 11 : i64} {
  func.func @_fused_matmul_kernel(%arg0: i32, %arg1: memref<32x384xbf16, #tpu.memory_space<vmem>>, %arg2: memref<384x128xbf16, #tpu.memory_space<vmem>>, %arg3: memref<1x128xf32, #tpu.memory_space<vmem>>, %arg4: memref<32x128xbf16, #tpu.memory_space<vmem>>) attributes {dimension_semantics = [#tpu.dimension_semantics<parallel>], iteration_bounds = array<i64: 1>, scalar_prefetch = 0 : i64, scratch_operands = 0 : i64, tpu.core_type = #tpu.core_type<tc>, window_params = [{transform_indices = @transform_0, window_bounds = array<i64: 32, 384>}, {pipeline_mode = #tpu.pipeline_mode<synchronous>, transform_indices = @transform_1, window_bounds = array<i64: 384, 128>}, {pipeline_mode = #tpu.pipeline_mode<synchronous>, transform_indices = @transform_2, window_bounds = array<i64: 1, 128>}, {transform_indices = @transform_3, window_bounds = array<i64: 32, 128>}]} {
    %c0 = arith.constant 0 : index
    %c0_0 = arith.constant 0 : index
    %0 = vector.load %arg1[%c0, %c0_0] : memref<32x384xbf16, #tpu.memory_space<vmem>>, vector<32x384xbf16>
    %c0_1 = arith.constant 0 : index
    %c0_2 = arith.constant 0 : index
    %1 = vector.load %arg2[%c0_1, %c0_2] : memref<384x128xbf16, #tpu.memory_space<vmem>>, vector<384x128xbf16>
    %cst = arith.constant dense<0.000000e+00> : vector<32x128xf32>
    %2 = tpu.matmul %0, %1, %cst {dimension_numbers = #tpu.dot_dimension_numbers<[1], [0], [0], [1], [0, 0, 1, 1], [], []>} : vector<32x384xbf16>, vector<384x128xbf16>, vector<32x128xf32> -> vector<32x128xf32>
    %c0_3 = arith.constant 0 : index
    %c0_4 = arith.constant 0 : index
    %3 = vector.load %arg3[%c0_3, %c0_4] : memref<1x128xf32, #tpu.memory_space<vmem>>, vector<1x128xf32>
    %4 = vector.broadcast %3 : vector<1x128xf32> to vector<32x128xf32>
    %5 = arith.addf %2, %4 : vector<32x128xf32>
    %cst_5 = arith.constant 0.000000e+00 : f32
    %6 = vector.broadcast %cst_5 : f32 to vector<32x128xf32>
    %7 = arith.maximumf %5, %6 : vector<32x128xf32>
    %8 = arith.truncf %7 : vector<32x128xf32> to vector<32x128xbf16>
    %c0_6 = arith.constant 0 : index
    %c0_7 = arith.constant 0 : index
    %9 = vector.load %arg4[%c0_6, %c0_7] : memref<32x128xbf16, #tpu.memory_space<vmem>>, vector<32x128xbf16>
    tpu.vector_store %arg4[%c0_6, %c0_7], %8 {strides = array<i32>} : memref<32x128xbf16, #tpu.memory_space<vmem>>, vector<32x128xbf16>,
    return
  }
  func.func @transform_0(%arg0: i32) -> (i32, i32) {
    %c0_i32 = arith.constant 0 : i32
    %c0_i32_0 = arith.constant 0 : i32
    return %arg0, %c0_i32 : i32, i32
  }
  func.func @transform_1(%arg0: i32) -> (i32, i32) {
    %c0_i32 = arith.constant 0 : i32
    %c0_i32_0 = arith.constant 0 : i32
    %c0_i32_1 = arith.constant 0 : i32
    return %c0_i32, %c0_i32_0 : i32, i32
  }
  func.func @transform_2(%arg0: i32) -> (i32, i32) {
    %c0_i32 = arith.constant 0 : i32
    %c0_i32_0 = arith.constant 0 : i32
    %c0_i32_1 = arith.constant 0 : i32
    return %c0_i32, %c0_i32_0 : i32, i32
  }
  func.func @transform_3(%arg0: i32) -> (i32, i32) {
    %c0_i32 = arith.constant 0 : i32
    %c0_i32_0 = arith.constant 0 : i32
    return %arg0, %c0_i32 : i32, i32
  }
}

module attributes {stable_mosaic.version = 11 : i64} {
  func.func @_fused_matmul_kernel(%arg0: i32, %arg1: memref<32x128xbf16, #tpu.memory_space<vmem>>, %arg2: memref<128x128xbf16, #tpu.memory_space<vmem>>, %arg3: memref<1x128xf32, #tpu.memory_space<vmem>>, %arg4: memref<32x128xbf16, #tpu.memory_space<vmem>>) attributes {dimension_semantics = [#tpu.dimension_semantics<parallel>], iteration_bounds = array<i64: 1>, scalar_prefetch = 0 : i64, scratch_operands = 0 : i64, tpu.core_type = #tpu.core_type<tc>, window_params = [{transform_indices = @transform_0, window_bounds = array<i64: 32, 128>}, {pipeline_mode = #tpu.pipeline_mode<synchronous>, transform_indices = @transform_1, window_bounds = array<i64: 128, 128>}, {pipeline_mode = #tpu.pipeline_mode<synchronous>, transform_indices = @transform_2, window_bounds = array<i64: 1, 128>}, {transform_indices = @transform_3, window_bounds = array<i64: 32, 128>}]} {
    %c0 = arith.constant 0 : index
    %c0_0 = arith.constant 0 : index
    %0 = vector.load %arg1[%c0, %c0_0] : memref<32x128xbf16, #tpu.memory_space<vmem>>, vector<32x128xbf16>
    %c0_1 = arith.constant 0 : index
    %c0_2 = arith.constant 0 : index
    %1 = vector.load %arg2[%c0_1, %c0_2] : memref<128x128xbf16, #tpu.memory_space<vmem>>, vector<128x128xbf16>
    %cst = arith.constant dense<0.000000e+00> : vector<32x128xf32>
    %2 = tpu.matmul %0, %1, %cst {dimension_numbers = #tpu.dot_dimension_numbers<[1], [0], [0], [1], [0, 0, 1, 1], [], []>} : vector<32x128xbf16>, vector<128x128xbf16>, vector<32x128xf32> -> vector<32x128xf32>
    %c0_3 = arith.constant 0 : index
    %c0_4 = arith.constant 0 : index
    %3 = vector.load %arg3[%c0_3, %c0_4] : memref<1x128xf32, #tpu.memory_space<vmem>>, vector<1x128xf32>
    %4 = vector.broadcast %3 : vector<1x128xf32> to vector<32x128xf32>
    %5 = arith.addf %2, %4 : vector<32x128xf32>
    %6 = arith.truncf %5 : vector<32x128xf32> to vector<32x128xbf16>
    %c0_5 = arith.constant 0 : index
    %c0_6 = arith.constant 0 : index
    %7 = vector.load %arg4[%c0_5, %c0_6] : memref<32x128xbf16, #tpu.memory_space<vmem>>, vector<32x128xbf16>
    tpu.vector_store %arg4[%c0_5, %c0_6], %6 {strides = array<i32>} : memref<32x128xbf16, #tpu.memory_space<vmem>>, vector<32x128xbf16>,
    return
  }
  func.func @transform_0(%arg0: i32) -> (i32, i32) {
    %c0_i32 = arith.constant 0 : i32
    %c0_i32_0 = arith.constant 0 : i32
    return %arg0, %c0_i32 : i32, i32
  }
  func.func @transform_1(%arg0: i32) -> (i32, i32) {
    %c0_i32 = arith.constant 0 : i32
    %c0_i32_0 = arith.constant 0 : i32
    %c0_i32_1 = arith.constant 0 : i32
    return %c0_i32, %c0_i32_0 : i32, i32
  }
  func.func @transform_2(%arg0: i32) -> (i32, i32) {
    %c0_i32 = arith.constant 0 : i32
    %c0_i32_0 = arith.constant 0 : i32
    %c0_i32_1 = arith.constant 0 : i32
    return %c0_i32, %c0_i32_0 : i32, i32
  }
  func.func @transform_3(%arg0: i32) -> (i32, i32) {
    %c0_i32 = arith.constant 0 : i32
    %c0_i32_0 = arith.constant 0 : i32
    return %arg0, %c0_i32 : i32, i32
  }
}

module attributes {stable_mosaic.version = 11 : i64} {
  func.func @_fused_matmul_kernel(%arg0: i32, %arg1: memref<32x128xbf16, #tpu.memory_space<vmem>>, %arg2: memref<128x384xbf16, #tpu.memory_space<vmem>>, %arg3: memref<1x384xf32, #tpu.memory_space<vmem>>, %arg4: memref<32x384xbf16, #tpu.memory_space<vmem>>) attributes {dimension_semantics = [#tpu.dimension_semantics<parallel>], iteration_bounds = array<i64: 1>, scalar_prefetch = 0 : i64, scratch_operands = 0 : i64, tpu.core_type = #tpu.core_type<tc>, window_params = [{transform_indices = @transform_0, window_bounds = array<i64: 32, 128>}, {pipeline_mode = #tpu.pipeline_mode<synchronous>, transform_indices = @transform_1, window_bounds = array<i64: 128, 384>}, {pipeline_mode = #tpu.pipeline_mode<synchronous>, transform_indices = @transform_2, window_bounds = array<i64: 1, 384>}, {transform_indices = @transform_3, window_bounds = array<i64: 32, 384>}]} {
    %c0 = arith.constant 0 : index
    %c0_0 = arith.constant 0 : index
    %0 = vector.load %arg1[%c0, %c0_0] : memref<32x128xbf16, #tpu.memory_space<vmem>>, vector<32x128xbf16>
    %c0_1 = arith.constant 0 : index
    %c0_2 = arith.constant 0 : index
    %1 = vector.load %arg2[%c0_1, %c0_2] : memref<128x384xbf16, #tpu.memory_space<vmem>>, vector<128x384xbf16>
    %cst = arith.constant dense<0.000000e+00> : vector<32x384xf32>
    %2 = tpu.matmul %0, %1, %cst {dimension_numbers = #tpu.dot_dimension_numbers<[1], [0], [0], [1], [0, 0, 1, 1], [], []>} : vector<32x128xbf16>, vector<128x384xbf16>, vector<32x384xf32> -> vector<32x384xf32>
    %c0_3 = arith.constant 0 : index
    %c0_4 = arith.constant 0 : index
    %3 = vector.load %arg3[%c0_3, %c0_4] : memref<1x384xf32, #tpu.memory_space<vmem>>, vector<1x384xf32>
    %4 = vector.broadcast %3 : vector<1x384xf32> to vector<32x384xf32>
    %5 = arith.addf %2, %4 : vector<32x384xf32>
    %6 = tpu.iota {dimensions = array<i32: 1>} : vector<32x384xi32>
    %c128_i32 = arith.constant 128 : i32
    %7 = vector.broadcast %c128_i32 : i32 to vector<32x384xi32>
    %8 = arith.cmpi slt, %6, %7 : vector<32x384xi32>
    %cst_5 = arith.constant 0.000000e+00 : f32
    %9 = vector.broadcast %cst_5 : f32 to vector<32x384xf32>
    %10 = arith.maximumf %5, %9 : vector<32x384xf32>
    %11 = arith.select %8, %10, %5 : vector<32x384xi1>, vector<32x384xf32>
    %12 = arith.truncf %11 : vector<32x384xf32> to vector<32x384xbf16>
    %c0_6 = arith.constant 0 : index
    %c0_7 = arith.constant 0 : index
    %13 = vector.load %arg4[%c0_6, %c0_7] : memref<32x384xbf16, #tpu.memory_space<vmem>>, vector<32x384xbf16>
    tpu.vector_store %arg4[%c0_6, %c0_7], %12 {strides = array<i32>} : memref<32x384xbf16, #tpu.memory_space<vmem>>, vector<32x384xbf16>,
    return
  }
  func.func @transform_0(%arg0: i32) -> (i32, i32) {
    %c0_i32 = arith.constant 0 : i32
    %c0_i32_0 = arith.constant 0 : i32
    return %arg0, %c0_i32 : i32, i32
  }
  func.func @transform_1(%arg0: i32) -> (i32, i32) {
    %c0_i32 = arith.constant 0 : i32
    %c0_i32_0 = arith.constant 0 : i32
    %c0_i32_1 = arith.constant 0 : i32
    return %c0_i32, %c0_i32_0 : i32, i32
  }
  func.func @transform_2(%arg0: i32) -> (i32, i32) {
    %c0_i32 = arith.constant 0 : i32
    %c0_i32_0 = arith.constant 0 : i32
    %c0_i32_1 = arith.constant 0 : i32
    return %c0_i32, %c0_i32_0 : i32, i32
  }
  func.func @transform_3(%arg0: i32) -> (i32, i32) {
    %c0_i32 = arith.constant 0 : i32
    %c0_i32_0 = arith.constant 0 : i32
    return %arg0, %c0_i32 : i32, i32
  }
}

module attributes {stable_mosaic.version = 11 : i64} {
  func.func @_fused_matmul_kernel(%arg0: i32, %arg1: memref<32x128xbf16, #tpu.memory_space<vmem>>, %arg2: memref<128x128xbf16, #tpu.memory_space<vmem>>, %arg3: memref<1x128xf32, #tpu.memory_space<vmem>>, %arg4: memref<32x128xbf16, #tpu.memory_space<vmem>>, %arg5: memref<32x128xbf16, #tpu.memory_space<vmem>>) attributes {dimension_semantics = [#tpu.dimension_semantics<parallel>], iteration_bounds = array<i64: 1>, scalar_prefetch = 0 : i64, scratch_operands = 0 : i64, tpu.core_type = #tpu.core_type<tc>, window_params = [{transform_indices = @transform_0, window_bounds = array<i64: 32, 128>}, {pipeline_mode = #tpu.pipeline_mode<synchronous>, transform_indices = @transform_1, window_bounds = array<i64: 128, 128>}, {pipeline_mode = #tpu.pipeline_mode<synchronous>, transform_indices = @transform_2, window_bounds = array<i64: 1, 128>}, {transform_indices = @transform_3, window_bounds = array<i64: 32, 128>}, {transform_indices = @transform_4, window_bounds = array<i64: 32, 128>}]} {
    %c0 = arith.constant 0 : index
    %c0_0 = arith.constant 0 : index
    %0 = vector.load %arg1[%c0, %c0_0] : memref<32x128xbf16, #tpu.memory_space<vmem>>, vector<32x128xbf16>
    %c0_1 = arith.constant 0 : index
    %c0_2 = arith.constant 0 : index
    %1 = vector.load %arg2[%c0_1, %c0_2] : memref<128x128xbf16, #tpu.memory_space<vmem>>, vector<128x128xbf16>
    %cst = arith.constant dense<0.000000e+00> : vector<32x128xf32>
    %2 = tpu.matmul %0, %1, %cst {dimension_numbers = #tpu.dot_dimension_numbers<[1], [0], [0], [1], [0, 0, 1, 1], [], []>} : vector<32x128xbf16>, vector<128x128xbf16>, vector<32x128xf32> -> vector<32x128xf32>
    %c0_3 = arith.constant 0 : index
    %c0_4 = arith.constant 0 : index
    %3 = vector.load %arg3[%c0_3, %c0_4] : memref<1x128xf32, #tpu.memory_space<vmem>>, vector<1x128xf32>
    %4 = vector.broadcast %3 : vector<1x128xf32> to vector<32x128xf32>
    %5 = arith.addf %2, %4 : vector<32x128xf32>
    %c0_5 = arith.constant 0 : index
    %c0_6 = arith.constant 0 : index
    %6 = vector.load %arg4[%c0_5, %c0_6] : memref<32x128xbf16, #tpu.memory_space<vmem>>, vector<32x128xbf16>
    %7 = arith.extf %6 : vector<32x128xbf16> to vector<32x128xf32>
    %8 = arith.addf %5, %7 : vector<32x128xf32>
    %cst_7 = arith.constant 0.000000e+00 : f32
    %9 = vector.broadcast %cst_7 : f32 to vector<32x128xf32>
    %10 = arith.maximumf %8, %9 : vector<32x128xf32>
    %11 = arith.truncf %10 : vector<32x128xf32> to vector<32x128xbf16>
    %c0_8 = arith.constant 0 : index
    %c0_9 = arith.constant 0 : index
    %12 = vector.load %arg5[%c0_8, %c0_9] : memref<32x128xbf16, #tpu.memory_space<vmem>>, vector<32x128xbf16>
    tpu.vector_store %arg5[%c0_8, %c0_9], %11 {strides = array<i32>} : memref<32x128xbf16, #tpu.memory_space<vmem>>, vector<32x128xbf16>,
    return
  }
  func.func @transform_0(%arg0: i32) -> (i32, i32) {
    %c0_i32 = arith.constant 0 : i32
    %c0_i32_0 = arith.constant 0 : i32
    return %arg0, %c0_i32 : i32, i32
  }
  func.func @transform_1(%arg0: i32) -> (i32, i32) {
    %c0_i32 = arith.constant 0 : i32
    %c0_i32_0 = arith.constant 0 : i32
    %c0_i32_1 = arith.constant 0 : i32
    return %c0_i32, %c0_i32_0 : i32, i32
  }
  func.func @transform_2(%arg0: i32) -> (i32, i32) {
    %c0_i32 = arith.constant 0 : i32
    %c0_i32_0 = arith.constant 0 : i32
    %c0_i32_1 = arith.constant 0 : i32
    return %c0_i32, %c0_i32_0 : i32, i32
  }
  func.func @transform_3(%arg0: i32) -> (i32, i32) {
    %c0_i32 = arith.constant 0 : i32
    %c0_i32_0 = arith.constant 0 : i32
    return %arg0, %c0_i32 : i32, i32
  }
  func.func @transform_4(%arg0: i32) -> (i32, i32) {
    %c0_i32 = arith.constant 0 : i32
    %c0_i32_0 = arith.constant 0 : i32
    return %arg0, %c0_i32 : i32, i32
  }
}

module attributes {stable_mosaic.version = 11 : i64} {
  func.func @_fused_matmul_kernel(%arg0: i32, %arg1: memref<32x640xbf16, #tpu.memory_space<vmem>>, %arg2: memref<640x128xbf16, #tpu.memory_space<vmem>>, %arg3: memref<1x128xf32, #tpu.memory_space<vmem>>, %arg4: memref<32x128xbf16, #tpu.memory_space<vmem>>) attributes {dimension_semantics = [#tpu.dimension_semantics<parallel>], iteration_bounds = array<i64: 1>, scalar_prefetch = 0 : i64, scratch_operands = 0 : i64, tpu.core_type = #tpu.core_type<tc>, window_params = [{transform_indices = @transform_0, window_bounds = array<i64: 32, 640>}, {pipeline_mode = #tpu.pipeline_mode<synchronous>, transform_indices = @transform_1, window_bounds = array<i64: 640, 128>}, {pipeline_mode = #tpu.pipeline_mode<synchronous>, transform_indices = @transform_2, window_bounds = array<i64: 1, 128>}, {transform_indices = @transform_3, window_bounds = array<i64: 32, 128>}]} {
    %c0 = arith.constant 0 : index
    %c0_0 = arith.constant 0 : index
    %0 = vector.load %arg1[%c0, %c0_0] : memref<32x640xbf16, #tpu.memory_space<vmem>>, vector<32x640xbf16>
    %c0_1 = arith.constant 0 : index
    %c0_2 = arith.constant 0 : index
    %1 = vector.load %arg2[%c0_1, %c0_2] : memref<640x128xbf16, #tpu.memory_space<vmem>>, vector<640x128xbf16>
    %cst = arith.constant dense<0.000000e+00> : vector<32x128xf32>
    %2 = tpu.matmul %0, %1, %cst {dimension_numbers = #tpu.dot_dimension_numbers<[1], [0], [0], [1], [0, 0, 1, 1], [], []>} : vector<32x640xbf16>, vector<640x128xbf16>, vector<32x128xf32> -> vector<32x128xf32>
    %c0_3 = arith.constant 0 : index
    %c0_4 = arith.constant 0 : index
    %3 = vector.load %arg3[%c0_3, %c0_4] : memref<1x128xf32, #tpu.memory_space<vmem>>, vector<1x128xf32>
    %4 = vector.broadcast %3 : vector<1x128xf32> to vector<32x128xf32>
    %5 = arith.addf %2, %4 : vector<32x128xf32>
    %cst_5 = arith.constant 0.000000e+00 : f32
    %6 = vector.broadcast %cst_5 : f32 to vector<32x128xf32>
    %7 = arith.maximumf %5, %6 : vector<32x128xf32>
    %8 = arith.truncf %7 : vector<32x128xf32> to vector<32x128xbf16>
    %c0_6 = arith.constant 0 : index
    %c0_7 = arith.constant 0 : index
    %9 = vector.load %arg4[%c0_6, %c0_7] : memref<32x128xbf16, #tpu.memory_space<vmem>>, vector<32x128xbf16>
    tpu.vector_store %arg4[%c0_6, %c0_7], %8 {strides = array<i32>} : memref<32x128xbf16, #tpu.memory_space<vmem>>, vector<32x128xbf16>,
    return
  }
  func.func @transform_0(%arg0: i32) -> (i32, i32) {
    %c0_i32 = arith.constant 0 : i32
    %c0_i32_0 = arith.constant 0 : i32
    return %arg0, %c0_i32 : i32, i32
  }
  func.func @transform_1(%arg0: i32) -> (i32, i32) {
    %c0_i32 = arith.constant 0 : i32
    %c0_i32_0 = arith.constant 0 : i32
    %c0_i32_1 = arith.constant 0 : i32
    return %c0_i32, %c0_i32_0 : i32, i32
  }
  func.func @transform_2(%arg0: i32) -> (i32, i32) {
    %c0_i32 = arith.constant 0 : i32
    %c0_i32_0 = arith.constant 0 : i32
    %c0_i32_1 = arith.constant 0 : i32
    return %c0_i32, %c0_i32_0 : i32, i32
  }
  func.func @transform_3(%arg0: i32) -> (i32, i32) {
    %c0_i32 = arith.constant 0 : i32
    %c0_i32_0 = arith.constant 0 : i32
    return %arg0, %c0_i32 : i32, i32
  }
}

module attributes {stable_mosaic.version = 11 : i64} {
  func.func @_fused_matmul_kernel(%arg0: i32, %arg1: memref<32x128xbf16, #tpu.memory_space<vmem>>, %arg2: memref<128x256xbf16, #tpu.memory_space<vmem>>, %arg3: memref<1x256xf32, #tpu.memory_space<vmem>>, %arg4: memref<32x256xbf16, #tpu.memory_space<vmem>>, %arg5: memref<32x256xbf16, #tpu.memory_space<vmem>>) attributes {dimension_semantics = [#tpu.dimension_semantics<parallel>], iteration_bounds = array<i64: 1>, scalar_prefetch = 0 : i64, scratch_operands = 0 : i64, tpu.core_type = #tpu.core_type<tc>, window_params = [{transform_indices = @transform_0, window_bounds = array<i64: 32, 128>}, {pipeline_mode = #tpu.pipeline_mode<synchronous>, transform_indices = @transform_1, window_bounds = array<i64: 128, 256>}, {pipeline_mode = #tpu.pipeline_mode<synchronous>, transform_indices = @transform_2, window_bounds = array<i64: 1, 256>}, {transform_indices = @transform_3, window_bounds = array<i64: 32, 256>}, {transform_indices = @transform_4, window_bounds = array<i64: 32, 256>}]} {
    %c0 = arith.constant 0 : index
    %c0_0 = arith.constant 0 : index
    %0 = vector.load %arg1[%c0, %c0_0] : memref<32x128xbf16, #tpu.memory_space<vmem>>, vector<32x128xbf16>
    %c0_1 = arith.constant 0 : index
    %c0_2 = arith.constant 0 : index
    %1 = vector.load %arg2[%c0_1, %c0_2] : memref<128x256xbf16, #tpu.memory_space<vmem>>, vector<128x256xbf16>
    %cst = arith.constant dense<0.000000e+00> : vector<32x256xf32>
    %2 = tpu.matmul %0, %1, %cst {dimension_numbers = #tpu.dot_dimension_numbers<[1], [0], [0], [1], [0, 0, 1, 1], [], []>} : vector<32x128xbf16>, vector<128x256xbf16>, vector<32x256xf32> -> vector<32x256xf32>
    %c0_3 = arith.constant 0 : index
    %c0_4 = arith.constant 0 : index
    %3 = vector.load %arg3[%c0_3, %c0_4] : memref<1x256xf32, #tpu.memory_space<vmem>>, vector<1x256xf32>
    %4 = vector.broadcast %3 : vector<1x256xf32> to vector<32x256xf32>
    %5 = arith.addf %2, %4 : vector<32x256xf32>
    %c0_5 = arith.constant 0 : index
    %c0_6 = arith.constant 0 : index
    %6 = vector.load %arg4[%c0_5, %c0_6] : memref<32x256xbf16, #tpu.memory_space<vmem>>, vector<32x256xbf16>
    %7 = arith.extf %6 : vector<32x256xbf16> to vector<32x256xf32>
    %8 = arith.addf %5, %7 : vector<32x256xf32>
    %cst_7 = arith.constant 0.000000e+00 : f32
    %9 = vector.broadcast %cst_7 : f32 to vector<32x256xf32>
    %10 = arith.maximumf %8, %9 : vector<32x256xf32>
    %11 = arith.truncf %10 : vector<32x256xf32> to vector<32x256xbf16>
    %c0_8 = arith.constant 0 : index
    %c0_9 = arith.constant 0 : index
    %12 = vector.load %arg5[%c0_8, %c0_9] : memref<32x256xbf16, #tpu.memory_space<vmem>>, vector<32x256xbf16>
    tpu.vector_store %arg5[%c0_8, %c0_9], %11 {strides = array<i32>} : memref<32x256xbf16, #tpu.memory_space<vmem>>, vector<32x256xbf16>,
    return
  }
  func.func @transform_0(%arg0: i32) -> (i32, i32) {
    %c0_i32 = arith.constant 0 : i32
    %c0_i32_0 = arith.constant 0 : i32
    return %arg0, %c0_i32 : i32, i32
  }
  func.func @transform_1(%arg0: i32) -> (i32, i32) {
    %c0_i32 = arith.constant 0 : i32
    %c0_i32_0 = arith.constant 0 : i32
    %c0_i32_1 = arith.constant 0 : i32
    return %c0_i32, %c0_i32_0 : i32, i32
  }
  func.func @transform_2(%arg0: i32) -> (i32, i32) {
    %c0_i32 = arith.constant 0 : i32
    %c0_i32_0 = arith.constant 0 : i32
    %c0_i32_1 = arith.constant 0 : i32
    return %c0_i32, %c0_i32_0 : i32, i32
  }
  func.func @transform_3(%arg0: i32) -> (i32, i32) {
    %c0_i32 = arith.constant 0 : i32
    %c0_i32_0 = arith.constant 0 : i32
    return %arg0, %c0_i32 : i32, i32
  }
  func.func @transform_4(%arg0: i32) -> (i32, i32) {
    %c0_i32 = arith.constant 0 : i32
    %c0_i32_0 = arith.constant 0 : i32
    return %arg0, %c0_i32 : i32, i32
  }
}

module attributes {stable_mosaic.version = 11 : i64} {
  func.func @_fused_matmul_kernel(%arg0: i32, %arg1: memref<32x256xbf16, #tpu.memory_space<vmem>>, %arg2: memref<256x640xbf16, #tpu.memory_space<vmem>>, %arg3: memref<1x640xf32, #tpu.memory_space<vmem>>, %arg4: memref<32x640xbf16, #tpu.memory_space<vmem>>) attributes {dimension_semantics = [#tpu.dimension_semantics<parallel>], iteration_bounds = array<i64: 1>, scalar_prefetch = 0 : i64, scratch_operands = 0 : i64, tpu.core_type = #tpu.core_type<tc>, window_params = [{transform_indices = @transform_0, window_bounds = array<i64: 32, 256>}, {pipeline_mode = #tpu.pipeline_mode<synchronous>, transform_indices = @transform_1, window_bounds = array<i64: 256, 640>}, {pipeline_mode = #tpu.pipeline_mode<synchronous>, transform_indices = @transform_2, window_bounds = array<i64: 1, 640>}, {transform_indices = @transform_3, window_bounds = array<i64: 32, 640>}]} {
    %c0 = arith.constant 0 : index
    %c0_0 = arith.constant 0 : index
    %0 = vector.load %arg1[%c0, %c0_0] : memref<32x256xbf16, #tpu.memory_space<vmem>>, vector<32x256xbf16>
    %c0_1 = arith.constant 0 : index
    %c0_2 = arith.constant 0 : index
    %1 = vector.load %arg2[%c0_1, %c0_2] : memref<256x640xbf16, #tpu.memory_space<vmem>>, vector<256x640xbf16>
    %cst = arith.constant dense<0.000000e+00> : vector<32x640xf32>
    %2 = tpu.matmul %0, %1, %cst {dimension_numbers = #tpu.dot_dimension_numbers<[1], [0], [0], [1], [0, 0, 1, 1], [], []>} : vector<32x256xbf16>, vector<256x640xbf16>, vector<32x640xf32> -> vector<32x640xf32>
    %c0_3 = arith.constant 0 : index
    %c0_4 = arith.constant 0 : index
    %3 = vector.load %arg3[%c0_3, %c0_4] : memref<1x640xf32, #tpu.memory_space<vmem>>, vector<1x640xf32>
    %4 = vector.broadcast %3 : vector<1x640xf32> to vector<32x640xf32>
    %5 = arith.addf %2, %4 : vector<32x640xf32>
    %6 = tpu.iota {dimensions = array<i32: 1>} : vector<32x640xi32>
    %c128_i32 = arith.constant 128 : i32
    %7 = vector.broadcast %c128_i32 : i32 to vector<32x640xi32>
    %8 = arith.cmpi slt, %6, %7 : vector<32x640xi32>
    %cst_5 = arith.constant 0.000000e+00 : f32
    %9 = vector.broadcast %cst_5 : f32 to vector<32x640xf32>
    %10 = arith.maximumf %5, %9 : vector<32x640xf32>
    %11 = arith.select %8, %10, %5 : vector<32x640xi1>, vector<32x640xf32>
    %12 = arith.truncf %11 : vector<32x640xf32> to vector<32x640xbf16>
    %c0_6 = arith.constant 0 : index
    %c0_7 = arith.constant 0 : index
    %13 = vector.load %arg4[%c0_6, %c0_7] : memref<32x640xbf16, #tpu.memory_space<vmem>>, vector<32x640xbf16>
    tpu.vector_store %arg4[%c0_6, %c0_7], %12 {strides = array<i32>} : memref<32x640xbf16, #tpu.memory_space<vmem>>, vector<32x640xbf16>,
    return
  }
  func.func @transform_0(%arg0: i32) -> (i32, i32) {
    %c0_i32 = arith.constant 0 : i32
    %c0_i32_0 = arith.constant 0 : i32
    return %arg0, %c0_i32 : i32, i32
  }
  func.func @transform_1(%arg0: i32) -> (i32, i32) {
    %c0_i32 = arith.constant 0 : i32
    %c0_i32_0 = arith.constant 0 : i32
    %c0_i32_1 = arith.constant 0 : i32
    return %c0_i32, %c0_i32_0 : i32, i32
  }
  func.func @transform_2(%arg0: i32) -> (i32, i32) {
    %c0_i32 = arith.constant 0 : i32
    %c0_i32_0 = arith.constant 0 : i32
    %c0_i32_1 = arith.constant 0 : i32
    return %c0_i32, %c0_i32_0 : i32, i32
  }
  func.func @transform_3(%arg0: i32) -> (i32, i32) {
    %c0_i32 = arith.constant 0 : i32
    %c0_i32_0 = arith.constant 0 : i32
    return %arg0, %c0_i32 : i32, i32
  }
}

module attributes {stable_mosaic.version = 11 : i64} {
  func.func @_fused_matmul_kernel(%arg0: i32, %arg1: memref<32x128xbf16, #tpu.memory_space<vmem>>, %arg2: memref<128x512xbf16, #tpu.memory_space<vmem>>, %arg3: memref<1x512xf32, #tpu.memory_space<vmem>>, %arg4: memref<32x512xbf16, #tpu.memory_space<vmem>>, %arg5: memref<32x512xbf16, #tpu.memory_space<vmem>>) attributes {dimension_semantics = [#tpu.dimension_semantics<parallel>], iteration_bounds = array<i64: 1>, scalar_prefetch = 0 : i64, scratch_operands = 0 : i64, tpu.core_type = #tpu.core_type<tc>, window_params = [{transform_indices = @transform_0, window_bounds = array<i64: 32, 128>}, {pipeline_mode = #tpu.pipeline_mode<synchronous>, transform_indices = @transform_1, window_bounds = array<i64: 128, 512>}, {pipeline_mode = #tpu.pipeline_mode<synchronous>, transform_indices = @transform_2, window_bounds = array<i64: 1, 512>}, {transform_indices = @transform_3, window_bounds = array<i64: 32, 512>}, {transform_indices = @transform_4, window_bounds = array<i64: 32, 512>}]} {
    %c0 = arith.constant 0 : index
    %c0_0 = arith.constant 0 : index
    %0 = vector.load %arg1[%c0, %c0_0] : memref<32x128xbf16, #tpu.memory_space<vmem>>, vector<32x128xbf16>
    %c0_1 = arith.constant 0 : index
    %c0_2 = arith.constant 0 : index
    %1 = vector.load %arg2[%c0_1, %c0_2] : memref<128x512xbf16, #tpu.memory_space<vmem>>, vector<128x512xbf16>
    %cst = arith.constant dense<0.000000e+00> : vector<32x512xf32>
    %2 = tpu.matmul %0, %1, %cst {dimension_numbers = #tpu.dot_dimension_numbers<[1], [0], [0], [1], [0, 0, 1, 1], [], []>} : vector<32x128xbf16>, vector<128x512xbf16>, vector<32x512xf32> -> vector<32x512xf32>
    %c0_3 = arith.constant 0 : index
    %c0_4 = arith.constant 0 : index
    %3 = vector.load %arg3[%c0_3, %c0_4] : memref<1x512xf32, #tpu.memory_space<vmem>>, vector<1x512xf32>
    %4 = vector.broadcast %3 : vector<1x512xf32> to vector<32x512xf32>
    %5 = arith.addf %2, %4 : vector<32x512xf32>
    %c0_5 = arith.constant 0 : index
    %c0_6 = arith.constant 0 : index
    %6 = vector.load %arg4[%c0_5, %c0_6] : memref<32x512xbf16, #tpu.memory_space<vmem>>, vector<32x512xbf16>
    %7 = arith.extf %6 : vector<32x512xbf16> to vector<32x512xf32>
    %8 = arith.addf %5, %7 : vector<32x512xf32>
    %cst_7 = arith.constant 0.000000e+00 : f32
    %9 = vector.broadcast %cst_7 : f32 to vector<32x512xf32>
    %10 = arith.maximumf %8, %9 : vector<32x512xf32>
    %11 = arith.truncf %10 : vector<32x512xf32> to vector<32x512xbf16>
    %c0_8 = arith.constant 0 : index
    %c0_9 = arith.constant 0 : index
    %12 = vector.load %arg5[%c0_8, %c0_9] : memref<32x512xbf16, #tpu.memory_space<vmem>>, vector<32x512xbf16>
    tpu.vector_store %arg5[%c0_8, %c0_9], %11 {strides = array<i32>} : memref<32x512xbf16, #tpu.memory_space<vmem>>, vector<32x512xbf16>,
    return
  }
  func.func @transform_0(%arg0: i32) -> (i32, i32) {
    %c0_i32 = arith.constant 0 : i32
    %c0_i32_0 = arith.constant 0 : i32
    return %arg0, %c0_i32 : i32, i32
  }
  func.func @transform_1(%arg0: i32) -> (i32, i32) {
    %c0_i32 = arith.constant 0 : i32
    %c0_i32_0 = arith.constant 0 : i32
    %c0_i32_1 = arith.constant 0 : i32
    return %c0_i32, %c0_i32_0 : i32, i32
  }
  func.func @transform_2(%arg0: i32) -> (i32, i32) {
    %c0_i32 = arith.constant 0 : i32
    %c0_i32_0 = arith.constant 0 : i32
    %c0_i32_1 = arith.constant 0 : i32
    return %c0_i32, %c0_i32_0 : i32, i32
  }
  func.func @transform_3(%arg0: i32) -> (i32, i32) {
    %c0_i32 = arith.constant 0 : i32
    %c0_i32_0 = arith.constant 0 : i32
    return %arg0, %c0_i32 : i32, i32
  }
  func.func @transform_4(%arg0: i32) -> (i32, i32) {
    %c0_i32 = arith.constant 0 : i32
    %c0_i32_0 = arith.constant 0 : i32
    return %arg0, %c0_i32 : i32, i32
  }
}

module attributes {stable_mosaic.version = 11 : i64} {
  func.func @_fused_matmul_kernel(%arg0: i32, %arg1: memref<32x1152xbf16, #tpu.memory_space<vmem>>, %arg2: memref<1152x128xbf16, #tpu.memory_space<vmem>>, %arg3: memref<1x128xf32, #tpu.memory_space<vmem>>, %arg4: memref<32x128xbf16, #tpu.memory_space<vmem>>) attributes {dimension_semantics = [#tpu.dimension_semantics<parallel>], iteration_bounds = array<i64: 1>, scalar_prefetch = 0 : i64, scratch_operands = 0 : i64, tpu.core_type = #tpu.core_type<tc>, window_params = [{transform_indices = @transform_0, window_bounds = array<i64: 32, 1152>}, {pipeline_mode = #tpu.pipeline_mode<synchronous>, transform_indices = @transform_1, window_bounds = array<i64: 1152, 128>}, {pipeline_mode = #tpu.pipeline_mode<synchronous>, transform_indices = @transform_2, window_bounds = array<i64: 1, 128>}, {transform_indices = @transform_3, window_bounds = array<i64: 32, 128>}]} {
    %c0 = arith.constant 0 : index
    %c0_0 = arith.constant 0 : index
    %0 = vector.load %arg1[%c0, %c0_0] : memref<32x1152xbf16, #tpu.memory_space<vmem>>, vector<32x1152xbf16>
    %c0_1 = arith.constant 0 : index
    %c0_2 = arith.constant 0 : index
    %1 = vector.load %arg2[%c0_1, %c0_2] : memref<1152x128xbf16, #tpu.memory_space<vmem>>, vector<1152x128xbf16>
    %cst = arith.constant dense<0.000000e+00> : vector<32x128xf32>
    %2 = tpu.matmul %0, %1, %cst {dimension_numbers = #tpu.dot_dimension_numbers<[1], [0], [0], [1], [0, 0, 1, 1], [], []>} : vector<32x1152xbf16>, vector<1152x128xbf16>, vector<32x128xf32> -> vector<32x128xf32>
    %c0_3 = arith.constant 0 : index
    %c0_4 = arith.constant 0 : index
    %3 = vector.load %arg3[%c0_3, %c0_4] : memref<1x128xf32, #tpu.memory_space<vmem>>, vector<1x128xf32>
    %4 = vector.broadcast %3 : vector<1x128xf32> to vector<32x128xf32>
    %5 = arith.addf %2, %4 : vector<32x128xf32>
    %cst_5 = arith.constant 0.000000e+00 : f32
    %6 = vector.broadcast %cst_5 : f32 to vector<32x128xf32>
    %7 = arith.maximumf %5, %6 : vector<32x128xf32>
    %8 = arith.truncf %7 : vector<32x128xf32> to vector<32x128xbf16>
    %c0_6 = arith.constant 0 : index
    %c0_7 = arith.constant 0 : index
    %9 = vector.load %arg4[%c0_6, %c0_7] : memref<32x128xbf16, #tpu.memory_space<vmem>>, vector<32x128xbf16>
    tpu.vector_store %arg4[%c0_6, %c0_7], %8 {strides = array<i32>} : memref<32x128xbf16, #tpu.memory_space<vmem>>, vector<32x128xbf16>,
    return
  }
  func.func @transform_0(%arg0: i32) -> (i32, i32) {
    %c0_i32 = arith.constant 0 : i32
    %c0_i32_0 = arith.constant 0 : i32
    return %arg0, %c0_i32 : i32, i32
  }
  func.func @transform_1(%arg0: i32) -> (i32, i32) {
    %c0_i32 = arith.constant 0 : i32
    %c0_i32_0 = arith.constant 0 : i32
    %c0_i32_1 = arith.constant 0 : i32
    return %c0_i32, %c0_i32_0 : i32, i32
  }
  func.func @transform_2(%arg0: i32) -> (i32, i32) {
    %c0_i32 = arith.constant 0 : i32
    %c0_i32_0 = arith.constant 0 : i32
    %c0_i32_1 = arith.constant 0 : i32
    return %c0_i32, %c0_i32_0 : i32, i32
  }
  func.func @transform_3(%arg0: i32) -> (i32, i32) {
    %c0_i32 = arith.constant 0 : i32
    %c0_i32_0 = arith.constant 0 : i32
    return %arg0, %c0_i32 : i32, i32
  }
}

</mosaic_0001>

<bundles_post_ra>
// kernel: _lambda_.16
= control target key start
LH: loop header
LB: loop body
LE: loop exit
PB: predicated region body
PF: predicated region fallthrough
CT: control target
= control target key end

     0   :  { %s677_s21 = smov 0   ;;  %s784_s0 = inlined_call_operand.vmem [shape: bf16[2,9,8,128], index: 0, kind: input, shape index: {}]   ;;  %s785_s1 = inlined_call_operand.vmem [shape: bf16[2,9,8,128], index: 1, kind: input, shape index: {}]   ;;  %s786_s2 = inlined_call_operand.vmem [shape: bf16[2,9,8,128], index: 2, kind: input, shape index: {}]   ;;  %s787_s3 = inlined_call_operand.vmem [shape: bf16[2,8,8,128], index: 3, kind: input, shape index: {}]   ;;  %s788_s4 = inlined_call_operand.vmem [shape: bf16[2,8,8,128], index: 4, kind: input, shape index: {}]   ;;  %s789_s5 = inlined_call_operand.vmem [shape: bf16[2,8,8,128], index: 5, kind: input, shape index: {}]   ;;  %s790_s6 = inlined_call_operand.vmem [shape: bf16[2,8,8,128], index: 6, kind: output, shape index: {}]  }
   0x1 LB: > { %s576_s22 = sadd.s32 4294967295, %s640_s21   ;;  %p580_p0 = scmp.ge.s32.totalorder %s640_s21, 1  ;;  %s640_s21 = sphi %s677_s21, %s16_s21  }
   0x2   : > { %p262_p1 = scmp.lt.s32.totalorder %s640_s21, 3 }
   0x4   : > { %p263_p2 = pnand %p580_p0, %p262_p1 }
   0x5   : > { %p317_p3 = scmp.lt.s32.totalorder (!%p263_p2), %s576_s22, 1 }
   0x6   : > { %266 = sbr.rel (%p263_p2) target bundleno = 40 (0x28), region = 44 }
   0xb   : > { %s792_s22 = smov (!%p317_p3, %s576_s22), 1 }
   0xc   : > { %s625_s23 = smul.u32 36, %s792_s22  ;;  %s685_s24 = sshll.u32 %s792_s22, 5 }
   0xd   : > { %s691_s27 = scalar_lea.vmem %s787_s3, %s685_s24  ;;  %s697_s30 = scalar_lea.vmem %s788_s4, %s685_s24 }
   0xe   : > { %s702_s9 = scalar_lea.vmem %s784_s0, %s625_s23  ;;  %s707_s12 = scalar_lea.vmem %s785_s1, %s625_s23  ;;  %v397_v0 = vld [vmem:[%s691_s27] sm:$0xf]  ;;  %v398_v1 = vld [vmem:[%s691_s27 + $0x4] sm:$0xf]  ;;  %v399_v35 = vld [vmem:[%s691_s27 + $0x8] sm:$0xf] }
   0xf   : > { %v405_v2 = vld [vmem:[%s697_s30] sm:$0xf]  ;;  %s715_s15 = scalar_lea.vmem %s786_s2, %s625_s23  ;;  %s721_s18 = scalar_lea.vmem %s789_s5, %s685_s24  ;;  %v353_v4 = vld [vmem:[%s702_s9 + $0x4] sm:$0xf]  ;;  %v354_v5 = vld [vmem:[%s702_s9 + $0x8] sm:$0xf] }
  0x10   : > { %v352_v3 = vld [vmem:[%s702_s9] sm:$0xf]  ;;  %v362_v7 = vld [vmem:[%s707_s12 + $0x4] sm:$0xf]  ;;  %v363_v8 = vld [vmem:[%s707_s12 + $0x8] sm:$0xf]  ;;  %v413_v9 = vmax.bf16 %v405_v2, %v397_v0  ;;  %s754_s22 = scalar_lea.vmem %s790_s6, %s685_s24 }
  0x11   : > { %v361_v6 = vld [vmem:[%s707_s12] sm:$0xf]  ;;  %v371_v11 = vmax.bf16 %v362_v7, %v353_v4  ;;  %v372_v12 = vmax.bf16 %v363_v8, %v354_v5  ;;  %v380_v14 = vld [vmem:[%s715_s15 + $0x4] sm:$0xf]  ;;  %v381_v15 = vld [vmem:[%s715_s15 + $0x8] sm:$0xf] }
  0x12   : > { %v370_v10 = vmax.bf16 %v361_v6, %v352_v3  ;;  %v379_v13 = vld [vmem:[%s715_s15] sm:$0xf]  ;;  %v406_v16 = vld [vmem:[%s697_s30 + $0x4] sm:$0xf]  ;;  %v355_v23 = vld [vmem:[%s702_s9 + $0xc] sm:$0xf] }
  0x13   : > { %v421_v17 = vld [vmem:[%s721_s18] sm:$0xf]  ;;  %v422_v18 = vld [vmem:[%s721_s18 + $0x4] sm:$0xf]  ;;  %v389_v20 = vmax.bf16 %v380_v14, %v371_v11  ;;  %v390_v21 = vmax.bf16 %v381_v15, %v372_v12  ;;  %v414_v22 = vmax.bf16 %v406_v16, %v398_v1  ;;  %v356_v24 = vld [vmem:[%s702_s9 + $0x10] sm:$0xf] }
  0x14   : > { %v388_v19 = vmax.bf16 %v379_v13, %v370_v10  ;;  %v364_v25 = vld [vmem:[%s707_s12 + $0xc] sm:$0xf]  ;;  %v429_v26 = vmax.bf16 %v421_v17, %v413_v9  ;;  %v365_v27 = vld [vmem:[%s707_s12 + $0x10] sm:$0xf]  ;;  %v407_v37 = vld [vmem:[%s697_s30 + $0x8] sm:$0xf] }
  0x15   : > { %v373_v28 = vmax.bf16 %v364_v25, %v355_v23  ;;  %v382_v29 = vld [vmem:[%s715_s15 + $0xc] sm:$0xf]  ;;  %v383_v30 = vld [vmem:[%s715_s15 + $0x10] sm:$0xf]  ;;  %v430_v31 = vmax.bf16 %v422_v18, %v414_v22  ;;  %v438_v33 = vmax.bf16 %v390_v21, %v389_v20  ;;  %v374_v34 = vmax.bf16 %v365_v27, %v356_v24  ;;  %v423_v41 = vld [vmem:[%s721_s18 + $0x8] sm:$0xf] }
  0x16   : > { %v437_v32 = vmax.bf16 %v389_v20, %v388_v19  ;;  %v400_v36 = vld [vmem:[%s691_s27 + $0xc] sm:$0xf]  ;;  %v415_v40 = vmax.bf16 %v407_v37, %v399_v35  ;;  %v357_v47 = vld [vmem:[%s702_s9 + $0x14] sm:$0xf]  ;;  %v358_v48 = vld [vmem:[%s702_s9 + $0x18] sm:$0xf] }
  0x17   : > { %v391_v38 = vmax.bf16 %v382_v29, %v373_v28  ;;  %v408_v39 = vld [vmem:[%s697_s30 + $0xc] sm:$0xf]  ;;  %v446_v44 = vmax.bf16 %v438_v33, %v430_v31  ;;  %v392_v45 = vmax.bf16 %v383_v30, %v374_v34  ;;  %v366_v49 = vld [vmem:[%s707_s12 + $0x14] sm:$0xf]  ;;  %v367_v52 = vld [vmem:[%s707_s12 + $0x18] sm:$0xf] }
  0x18   : > { %v424_v42 = vld [vmem:[%s721_s18 + $0xc] sm:$0xf]  ;;  %v445_v43 = vmax.bf16 %v437_v32, %v429_v26  ;;  %v416_v46 = vmax.bf16 %v408_v39, %v400_v36  ;;  %v431_v50 = vmax.bf16 %v423_v41, %v415_v40  ;;  %v375_v53 = vmax.bf16 %v366_v49, %v357_v47  ;;  %v384_v54 = vld [vmem:[%s715_s15 + $0x14] sm:$0xf]  ;;  %v385_v55 = vld [vmem:[%s715_s15 + $0x18] sm:$0xf] }
  0x19   : > { %v439_v51 = vmax.bf16 %v391_v38, %v390_v21  ;;  %v440_v58 = vmax.bf16 %v392_v45, %v391_v38  ;;  %v376_v59 = vmax.bf16 %v367_v52, %v358_v48  ;;  %v401_v60 = vld [vmem:[%s691_s27 + $0x10] sm:$0xf]  ;;  %v402_v61 = vld [vmem:[%s691_s27 + $0x14] sm:$0xf]  ;;  %v359_v8 = vld [vmem:[%s702_s9 + $0x1c] sm:$0xf] }
  0x1a   : > { %v618_v56 = vcombine.low %v445_v43, %v446_v44  ;;  %v432_v57 = vmax.bf16 %v424_v42, %v416_v46  ;;  %v409_v62 = vld [vmem:[%s697_s30 + $0x10] sm:$0xf]  ;;  %v393_v0 = vmax.bf16 %v384_v54, %v375_v53  ;;  %v410_v1 = vld [vmem:[%s697_s30 + $0x14] sm:$0xf]  ;;  %v360_v9 = vld [vmem:[%s702_s9 + $0x20] sm:$0xf] }
  0x1b   : > { %v447_v63 = vmax.bf16 %v439_v51, %v431_v50  ;;  %v417_v2 = vmax.bf16 %v409_v62, %v401_v60  ;;  %v425_v3 = vld [vmem:[%s721_s18 + $0x10] sm:$0xf]  ;;  %v426_v4 = vld [vmem:[%s721_s18 + $0x14] sm:$0xf]  ;;  %v394_v6 = vmax.bf16 %v385_v55, %v376_v59  ;;  %v418_v7 = vmax.bf16 %v410_v1, %v402_v61  ;;  %v368_v10 = vld [vmem:[%s707_s12 + $0x1c] sm:$0xf] }
  0x1c   : > { %602 = vst [vmem:[%s754_s22] sm:$0xff] %v618_v56   ;;  %v448_v5 = vmax.bf16 %v440_v58, %v432_v57  ;;  %v441_v12 = vmax.bf16 %v393_v0, %v392_v45  ;;  %v369_v13 = vld [vmem:[%s707_s12 + $0x20] sm:$0xf]  ;;  %v377_v14 = vmax.bf16 %v368_v10, %v359_v8  ;;  %v386_v15 = vld [vmem:[%s715_s15 + $0x1c] sm:$0xf]  ;;  %v403_v21 = vld [vmem:[%s691_s27 + $0x18] sm:$0xf] }
  0x1d   : > { %v433_v11 = vmax.bf16 %v425_v3, %v417_v2  ;;  %v387_v16 = vld [vmem:[%s715_s15 + $0x20] sm:$0xf]  ;;  %v434_v18 = vmax.bf16 %v426_v4, %v418_v7  ;;  %v442_v19 = vmax.bf16 %v394_v6, %v393_v0  ;;  %v378_v20 = vmax.bf16 %v369_v13, %v360_v9  ;;  %v404_v22 = vld [vmem:[%s691_s27 + $0x1c] sm:$0xf]  ;;  %v411_v23 = vld [vmem:[%s697_s30 + $0x18] sm:$0xf] }
  0x1e   : > { %v619_v17 = vcombine.low %v447_v63, %v448_v5  ;;  %v395_v25 = vmax.bf16 %v386_v15, %v377_v14  ;;  %v412_v26 = vld [vmem:[%s697_s30 + $0x1c] sm:$0xf]  ;;  %v419_v27 = vmax.bf16 %v411_v23, %v403_v21  ;;  %v427_v28 = vld [vmem:[%s721_s18 + $0x18] sm:$0xf] }
  0x1f   : > { %v449_v24 = vmax.bf16 %v441_v12, %v433_v11  ;;  %v428_v29 = vld [vmem:[%s721_s18 + $0x1c] sm:$0xf]  ;;  %v450_v30 = vmax.bf16 %v442_v19, %v434_v18  ;;  %v396_v31 = vmax.bf16 %v387_v16, %v378_v20  ;;  %v420_v32 = vmax.bf16 %v412_v26, %v404_v22 }
  0x20   : > { %620 = vst [vmem:[%s754_s22 + $0x8] sm:$0xff] %v619_v17   ;;  %v435_v33 = vmax.bf16 %v427_v28, %v419_v27  ;;  %v443_v34 = vmax.bf16 %v395_v25, %v394_v6 }
  0x21   : > { %v621_v35 = vcombine.low %v449_v24, %v450_v30  ;;  %v436_v36 = vmax.bf16 %v428_v29, %v420_v32  ;;  %v444_v37 = vmax.bf16 %v396_v31, %v395_v25 }
  0x22   : > { %v451_v38 = vmax.bf16 %v443_v34, %v435_v33 }
  0x23   : > { %622 = vst [vmem:[%s754_s22 + $0x10] sm:$0xff] %v621_v35   ;;  %v452_v39 = vmax.bf16 %v444_v37, %v436_v36 }
  0x25   : > { %v623_v40 = vcombine.low %v451_v38, %v452_v39 }
  0x27   : > { %624 = vst [vmem:[%s754_s22 + $0x18] sm:$0xff] %v623_v40  }
  0x28 PF: > { %s16_s21 = sadd.s32 1, %s640_s21  }
  0x29   : > { %p13_p4 = scmp.ge.s32.totalorder %s16_s21, 4  }
  0x2b   :  { %15 = sbr.rel (!%p13_p4) target bundleno = 1 (0x1), region = 89 }

// kernel: _lambda_.17
= control target key start
LH: loop header
LB: loop body
LE: loop exit
PB: predicated region body
PF: predicated region fallthrough
CT: control target
= control target key end

     0   :  { %v590_v1 = vmov 0   ;;  %v49_v25 = vlaneseq  ;;  %s778_s1 = inlined_call_operand.vmem [shape: bf16[128,256], index: 1, kind: input, shape index: {}]   ;;  %s779_s0 = inlined_call_operand.vmem [shape: bf16[128,128], index: 0, kind: input, shape index: {}]   ;;  %s780_s2 = inlined_call_operand.vmem [shape: f32[1,256], index: 2, kind: input, shape index: {}]   ;;  %s781_s3 = inlined_call_operand.vmem [shape: bf16[128,256], index: 3, kind: output, shape index: {}]  }
   0x1   :  { %v558_v0 = vld [vmem:[%s778_s1 + $0x74] ss:$8 sps:$4 sm:$0xff]   ;;  %219 = vmatprep.mubr.bf16.mxu0 %v590_v1  ;;  %259 = vmatprep.mubr.bf16.mxu1 %v590_v1  ;;  %v560_v2 = vld [vmem:[%s778_s1 + $0x70] ss:$8 sps:$4 sm:$0xff]   ;;  %v561_v3 = vld [vmem:[%s778_s1 + $0x64] ss:$8 sps:$4 sm:$0xff]  }
   0x2   :  { %187 = vmatprep.subr.bf16.mxu0 %v558_v0  ;;  %541 = vmatprep.subr.bf16.mxu1 %v558_v0  ;;  %v563_v4 = vld [vmem:[%s778_s1 + $0x60] ss:$8 sps:$4 sm:$0xff]   ;;  %v564_v5 = vld [vmem:[%s778_s1 + $0x54] ss:$8 sps:$4 sm:$0xff]   ;;  %v566_v6 = vld [vmem:[%s778_s1 + $0x50] ss:$8 sps:$4 sm:$0xff]  }
   0x3   :  { %188 = vmatpush1.bf16.msra.mxu0 %v560_v2  ;;  %549 = vmatpush1.bf16.msra.mxu1 %v560_v2  ;;  %v567_v7 = vld [vmem:[%s778_s1 + $0x44] ss:$8 sps:$4 sm:$0xff]   ;;  %v569_v8 = vld [vmem:[%s778_s1 + $0x40] ss:$8 sps:$4 sm:$0xff]   ;;  %v570_v9 = vld [vmem:[%s778_s1 + $0x34] ss:$8 sps:$4 sm:$0xff]  }
   0x4   :  { %189 = vmatprep.subr.bf16.mxu0 %v561_v3  ;;  %542 = vmatprep.subr.bf16.mxu1 %v561_v3  ;;  %v572_v10 = vld [vmem:[%s778_s1 + $0x30] ss:$8 sps:$4 sm:$0xff]   ;;  %v573_v11 = vld [vmem:[%s778_s1 + $0x24] ss:$8 sps:$4 sm:$0xff]   ;;  %v575_v12 = vld [vmem:[%s778_s1 + $0x20] ss:$8 sps:$4 sm:$0xff]  }
   0x5   :  { %v576_v13 = vld [vmem:[%s778_s1 + $0x14] ss:$8 sps:$4 sm:$0xff]   ;;  %v578_v14 = vld [vmem:[%s778_s1 + $0x10] ss:$8 sps:$4 sm:$0xff]   ;;  %v579_v15 = vld [vmem:[%s778_s1 + $0x4] ss:$8 sps:$4 sm:$0xff]  }
   0x6   :  { %v581_v16 = vld [vmem:[%s778_s1] ss:$8 sps:$4 sm:$0xff]   ;;  %v586_v21 = vld [vmem:[%s779_s0 + $0x10] sm:$0xff]   ;;  %v588_v23 = vld [vmem:[%s779_s0 + $0x18] sm:$0xff]   ;;  %v50_v26 = vshrl.u32 %v49_v25, 7 }
   0x7   :  { %190 = vmatpush1.bf16.msra.mxu0 %v563_v4  ;;  %550 = vmatpush1.bf16.msra.mxu1 %v563_v4  ;;  %v582_v17 = vld [vmem:[%s779_s0] sm:$0xff]   ;;  %v584_v19 = vld [vmem:[%s779_s0 + $0x8] sm:$0xff]   ;;  %v587_v22 = vld [vmem:[%s779_s0 + $0x30] sm:$0xff]  }
   0x8   :  { %191 = vmatprep.subr.bf16.mxu0 %v564_v5  ;;  %543 = vmatprep.subr.bf16.mxu1 %v564_v5  ;;  %v583_v18 = vld [vmem:[%s779_s0 + $0x20] sm:$0xff]   ;;  %v585_v20 = vld [vmem:[%s779_s0 + $0x28] sm:$0xff]   ;;  %v589_v24 = vld [vmem:[%s779_s0 + $0x38] sm:$0xff]   ;;  %v51_v27 = vsub.s32 0, %v50_v26  ;;  %v55_v29 = vsub.s32 1, %v50_v26 }
   0x9   :  { %v47_v28 = vld [vmem:[%s780_s2] sm:$0x3] }
   0xa   :  { %v694_v30 = vrot.slane %v47_v28, %v51_v27  ;;  %v696_v31 = vrot.slane %v47_v28, %v55_v29 }
   0xb   :  { %192 = vmatpush1.bf16.msra.mxu0 %v566_v6  ;;  %551 = vmatpush1.bf16.msra.mxu1 %v566_v6 }
   0xc   :  { %193 = vmatprep.subr.bf16.mxu0 %v567_v7  ;;  %544 = vmatprep.subr.bf16.mxu1 %v567_v7 }
   0xf   :  { %194 = vmatpush1.bf16.msra.mxu0 %v569_v8  ;;  %552 = vmatpush1.bf16.msra.mxu1 %v569_v8 }
  0x10   :  { %195 = vmatprep.subr.bf16.mxu0 %v570_v9  ;;  %545 = vmatprep.subr.bf16.mxu1 %v570_v9 }
  0x13   :  { %196 = vmatpush1.bf16.msra.mxu0 %v572_v10  ;;  %553 = vmatpush1.bf16.msra.mxu1 %v572_v10 }
  0x14   :  { %197 = vmatprep.subr.bf16.mxu0 %v573_v11  ;;  %546 = vmatprep.subr.bf16.mxu1 %v573_v11 }
  0x17   :  { %198 = vmatpush1.bf16.msra.mxu0 %v575_v12  ;;  %554 = vmatpush1.bf16.msra.mxu1 %v575_v12 }
  0x18   :  { %199 = vmatprep.subr.bf16.mxu0 %v576_v13  ;;  %547 = vmatprep.subr.bf16.mxu1 %v576_v13 }
  0x1b   :  { %200 = vmatpush1.bf16.msra.mxu0 %v578_v14  ;;  %555 = vmatpush1.bf16.msra.mxu1 %v578_v14 }
  0x1c   :  { %201 = vmatprep.subr.bf16.mxu0 %v579_v15  ;;  %548 = vmatprep.subr.bf16.mxu1 %v579_v15 }
  0x1f   :  { %202 = vmatpush1.bf16.msra.mxu0 %v581_v16  ;;  %556 = vmatpush1.bf16.msra.mxu1 %v581_v16 }
  0x22   :  { %220 = vmatmul.mubr.bf16.vlgmr.msra.gmra.mxu0 %v582_v17  ;;  %260 = vmatmul.mubr.bf16.vlgmr.msra.gmra.mxu1 %v583_v18 }
  0x23   :  { %229 = vmatprep.mubr.bf16.mxu0 %v590_v1  ;;  %269 = vmatprep.mubr.bf16.mxu1 %v590_v1 }
  0x2a   :  { %230 = vmatmul.mubr.bf16.gmra.mxu0 %v584_v19  ;;  %270 = vmatmul.mubr.bf16.gmra.mxu1 %v585_v20 }
  0x2b   :  { %239 = vmatprep.mubr.bf16.mxu0 %v590_v1  ;;  %279 = vmatprep.mubr.bf16.mxu1 %v590_v1 }
  0x32   :  { %240 = vmatmul.mubr.bf16.gmra.mxu0 %v586_v21  ;;  %280 = vmatmul.mubr.bf16.gmra.mxu1 %v587_v22 }
  0x33   :  { %249 = vmatprep.mubr.bf16.mxu0 %v590_v1  ;;  %289 = vmatprep.mubr.bf16.mxu1 %v590_v1 }
  0x3a   :  { %250 = vmatmul.mubr.bf16.gmra.mxu0 %v588_v23  ;;  %290 = vmatmul.mubr.bf16.gmra.mxu1 %v589_v24 }
  0xe2   :  { %v221_v32 = vpop.f32.mrf.mxu0  ;;  %v261_v33 = vpop.f32.mrf.mxu1 }
  0xe3   :  { %v222_v34 = vadd.f32 %v221_v32, %v694_v30  ;;  %v262_v35 = vadd.f32 %v261_v33, %v694_v30 }
  0xe4   :  { %v223_v36 = vpop.f32.mrf.mxu0  ;;  %v263_v37 = vpop.f32.mrf.mxu1 }
  0xe5   :  { %v305_v38 = vmax.f32 %v222_v34, 0.0  ;;  %v321_v39 = vmax.f32 %v262_v35, 0.0  ;;  %v224_v40 = vadd.f32 %v223_v36, %v696_v31  ;;  %v264_v41 = vadd.f32 %v263_v37, %v696_v31 }
  0xe6   :  { %v225_v42 = vpop.f32.mrf.mxu0  ;;  %v265_v43 = vpop.f32.mrf.mxu1 }
  0xe7   :  { %v525_v44 = vpack.c.bf16 %v224_v40, %v305_v38  ;;  %v533_v45 = vpack.c.bf16 %v264_v41, %v321_v39  ;;  %v226_v46 = vadd.f32 %v225_v42, %v694_v30  ;;  %v266_v47 = vadd.f32 %v265_v43, %v694_v30 }
  0xe8   :  { %v227_v48 = vpop.f32.mrf.mxu0  ;;  %v267_v49 = vpop.f32.mrf.mxu1 }
  0xe9   :  { %465 = vst [vmem:[%s781_s3] sm:$0xff] %v525_v44  ;;  %473 = vst [vmem:[%s781_s3 + $0x40] sm:$0xff] %v533_v45  ;;  %v307_v50 = vmax.f32 %v226_v46, 0.0  ;;  %v323_v51 = vmax.f32 %v266_v47, 0.0  ;;  %v228_v52 = vadd.f32 %v227_v48, %v696_v31  ;;  %v268_v53 = vadd.f32 %v267_v49, %v696_v31 }
  0xea   :  { %v231_v54 = vpop.f32.mrf.mxu0  ;;  %v271_v55 = vpop.f32.mrf.mxu1 }
  0xeb   :  { %v526_v56 = vpack.c.bf16 %v228_v52, %v307_v50  ;;  %v534_v57 = vpack.c.bf16 %v268_v53, %v323_v51  ;;  %v232_v58 = vadd.f32 %v231_v54, %v694_v30  ;;  %v272_v59 = vadd.f32 %v271_v55, %v694_v30 }
  0xec   :  { %v233_v60 = vpop.f32.mrf.mxu0  ;;  %v273_v61 = vpop.f32.mrf.mxu1 }
  0xed   :  { %466 = vst [vmem:[%s781_s3 + $0x8] sm:$0xff] %v526_v56  ;;  %474 = vst [vmem:[%s781_s3 + $0x48] sm:$0xff] %v534_v57  ;;  %v309_v62 = vmax.f32 %v232_v58, 0.0  ;;  %v325_v63 = vmax.f32 %v272_v59, 0.0  ;;  %v234_v0 = vadd.f32 %v233_v60, %v696_v31  ;;  %v274_v1 = vadd.f32 %v273_v61, %v696_v31 }
  0xee   :  { %v235_v2 = vpop.f32.mrf.mxu0  ;;  %v275_v3 = vpop.f32.mrf.mxu1 }
  0xef   :  { %v527_v4 = vpack.c.bf16 %v234_v0, %v309_v62  ;;  %v535_v5 = vpack.c.bf16 %v274_v1, %v325_v63  ;;  %v236_v6 = vadd.f32 %v235_v2, %v694_v30  ;;  %v276_v7 = vadd.f32 %v275_v3, %v694_v30 }
  0xf0   :  { %v237_v8 = vpop.f32.mrf.mxu0  ;;  %v277_v9 = vpop.f32.mrf.mxu1 }
  0xf1   :  { %467 = vst [vmem:[%s781_s3 + $0x10] sm:$0xff] %v527_v4  ;;  %475 = vst [vmem:[%s781_s3 + $0x50] sm:$0xff] %v535_v5  ;;  %v311_v10 = vmax.f32 %v236_v6, 0.0  ;;  %v327_v11 = vmax.f32 %v276_v7, 0.0  ;;  %v238_v12 = vadd.f32 %v237_v8, %v696_v31  ;;  %v278_v13 = vadd.f32 %v277_v9, %v696_v31 }
  0xf2   :  { %v241_v14 = vpop.f32.mrf.mxu0  ;;  %v281_v15 = vpop.f32.mrf.mxu1 }
  0xf3   :  { %v528_v16 = vpack.c.bf16 %v238_v12, %v311_v10  ;;  %v536_v17 = vpack.c.bf16 %v278_v13, %v327_v11  ;;  %v242_v18 = vadd.f32 %v241_v14, %v694_v30  ;;  %v282_v19 = vadd.f32 %v281_v15, %v694_v30 }
  0xf4   :  { %v243_v20 = vpop.f32.mrf.mxu0  ;;  %v283_v21 = vpop.f32.mrf.mxu1 }
  0xf5   :  { %468 = vst [vmem:[%s781_s3 + $0x18] sm:$0xff] %v528_v16  ;;  %476 = vst [vmem:[%s781_s3 + $0x58] sm:$0xff] %v536_v17  ;;  %v313_v22 = vmax.f32 %v242_v18, 0.0  ;;  %v329_v23 = vmax.f32 %v282_v19, 0.0  ;;  %v244_v24 = vadd.f32 %v243_v20, %v696_v31  ;;  %v284_v25 = vadd.f32 %v283_v21, %v696_v31 }
  0xf6   :  { %v245_v26 = vpop.f32.mrf.mxu0  ;;  %v285_v27 = vpop.f32.mrf.mxu1 }
  0xf7   :  { %v529_v28 = vpack.c.bf16 %v244_v24, %v313_v22  ;;  %v537_v29 = vpack.c.bf16 %v284_v25, %v329_v23  ;;  %v246_v32 = vadd.f32 %v245_v26, %v694_v30  ;;  %v286_v33 = vadd.f32 %v285_v27, %v694_v30 }
  0xf8   :  { %v247_v34 = vpop.f32.mrf.mxu0  ;;  %v287_v35 = vpop.f32.mrf.mxu1 }
  0xf9   :  { %469 = vst [vmem:[%s781_s3 + $0x20] sm:$0xff] %v529_v28  ;;  %477 = vst [vmem:[%s781_s3 + $0x60] sm:$0xff] %v537_v29  ;;  %v315_v36 = vmax.f32 %v246_v32, 0.0  ;;  %v331_v37 = vmax.f32 %v286_v33, 0.0  ;;  %v248_v38 = vadd.f32 %v247_v34, %v696_v31  ;;  %v288_v39 = vadd.f32 %v287_v35, %v696_v31 }
  0xfa   :  { %v251_v40 = vpop.f32.mrf.mxu0  ;;  %v291_v41 = vpop.f32.mrf.mxu1 }
  0xfb   :  { %v530_v42 = vpack.c.bf16 %v248_v38, %v315_v36  ;;  %v538_v43 = vpack.c.bf16 %v288_v39, %v331_v37  ;;  %v252_v44 = vadd.f32 %v251_v40, %v694_v30  ;;  %v292_v45 = vadd.f32 %v291_v41, %v694_v30 }
  0xfc   :  { %v253_v46 = vpop.f32.mrf.mxu0  ;;  %v293_v47 = vpop.f32.mrf.mxu1 }
  0xfd   :  { %470 = vst [vmem:[%s781_s3 + $0x28] sm:$0xff] %v530_v42  ;;  %478 = vst [vmem:[%s781_s3 + $0x68] sm:$0xff] %v538_v43  ;;  %v317_v48 = vmax.f32 %v252_v44, 0.0  ;;  %v333_v49 = vmax.f32 %v292_v45, 0.0  ;;  %v254_v50 = vadd.f32 %v253_v46, %v696_v31  ;;  %v294_v51 = vadd.f32 %v293_v47, %v696_v31 }
  0xfe   :  { %v255_v52 = vpop.f32.mrf.mxu0  ;;  %v295_v53 = vpop.f32.mrf.mxu1 }
  0xff   :  { %v531_v54 = vpack.c.bf16 %v254_v50, %v317_v48  ;;  %v539_v55 = vpack.c.bf16 %v294_v51, %v333_v49  ;;  %v256_v56 = vadd.f32 %v255_v52, %v694_v30  ;;  %v296_v57 = vadd.f32 %v295_v53, %v694_v30 }
 0x100   :  { %v257_v58 = vpop.f32.mrf.mxu0  ;;  %v297_v59 = vpop.f32.mrf.mxu1 }
 0x101   :  { %471 = vst [vmem:[%s781_s3 + $0x30] sm:$0xff] %v531_v54  ;;  %479 = vst [vmem:[%s781_s3 + $0x70] sm:$0xff] %v539_v55  ;;  %v319_v60 = vmax.f32 %v256_v56, 0.0  ;;  %v335_v61 = vmax.f32 %v296_v57, 0.0  ;;  %v258_v62 = vadd.f32 %v257_v58, %v696_v31  ;;  %v298_v63 = vadd.f32 %v297_v59, %v696_v31 }
 0x103   :  { %v532_v0 = vpack.c.bf16 %v258_v62, %v319_v60  ;;  %v540_v1 = vpack.c.bf16 %v298_v63, %v335_v61 }
 0x105   :  { %472 = vst [vmem:[%s781_s3 + $0x38] sm:$0xff] %v532_v0  ;;  %480 = vst [vmem:[%s781_s3 + $0x78] sm:$0xff] %v540_v1 }

// kernel: _lambda_.15
= control target key start
LH: loop header
LB: loop body
LE: loop exit
PB: predicated region body
PF: predicated region fallthrough
CT: control target
= control target key end

     0   :  { %s1363_s12 = smov 0   ;;  %s1521_s0 = inlined_call_operand.vmem [shape: bf16[512,256], index: 0, kind: input, shape index: {}]   ;;  %s1522_s1 = inlined_call_operand.vmem [shape: bf16[256,128], index: 1, kind: input, shape index: {}]   ;;  %s1523_s2 = inlined_call_operand.vmem [shape: f32[1,128], index: 2, kind: input, shape index: {}]   ;;  %s1524_s3 = inlined_call_operand.vmem [shape: bf16[512,128], index: 3, kind: output, shape index: {}]  }
   0x1 LB: > { %s914_s13 = sadd.s32 4294967295, %s1341_s12   ;;  %p918_p0 = scmp.ge.s32.totalorder %s1341_s12, 1  ;;  %s1341_s12 = sphi %s1363_s12, %s13_s12  }
   0x2   : > { %p139_p1 = scmp.lt.s32.totalorder %s1341_s12, 3 }
   0x4   : > { %p140_p2 = pnand %p918_p0, %p139_p1 }
   0x5   : > { %s919_s16 = sshll.u32 (!%p140_p2), %s914_s13, 5 }
   0x6   : > { %143 = sbr.rel (%p140_p2) target bundleno = 308 (0x134), region = 32  ;;  %p165_p3 = scmp.lt.s32.totalorder (!%p140_p2), %s919_s16, 63 }
   0xb   : > { %v1271_v0 = vld [vmem:[%s1522_s1 + $0x78] sm:$0xff]   ;;  %v1273_v2 = vld [vmem:[%s1522_s1 + $0x70] sm:$0xff]   ;;  %v1275_v4 = vld [vmem:[%s1522_s1 + $0x68] sm:$0xff]   ;;  %s1526_s16 = smov (!%p165_p3, %s919_s16), 63 }
   0xc   : > { %v1272_v1 = vld [vmem:[%s1522_s1 + $0x38] sm:$0xff]   ;;  %1135 = vmatprep.subr.bf16.mxu0 %v1271_v0  ;;  %1247 = vmatprep.subr.bf16.mxu1 %v1271_v0  ;;  %v1274_v3 = vld [vmem:[%s1522_s1 + $0x30] sm:$0xff]   ;;  %v1276_v5 = vld [vmem:[%s1522_s1 + $0x28] sm:$0xff]   ;;  %s1007_s4 = sshll.u32 %s1526_s16, 3  ;;  %s923_s28 = sshll.u32 %s1526_s16, 2 }
   0xd   : > { %1136 = vmatpush3.bf16.msra.mxu0 %v1272_v1  ;;  %1255 = vmatpush3.bf16.msra.mxu1 %v1272_v1  ;;  %v1277_v6 = vld [vmem:[%s1522_s1 + $0x60] sm:$0xff]   ;;  %v1279_v8 = vld [vmem:[%s1522_s1 + $0x58] sm:$0xff]   ;;  %s1404_s9 = scalar_lea.vmem %s1521_s0, %s1007_s4  ;;  %v1281_v10 = vld [vmem:[%s1522_s1 + $0x50] sm:$0xff]   ;;  %s1472_s4 = scalar_lea.vmem %s1524_s3, %s923_s28 }
   0xe   : > { %1137 = vmatprep.subr.bf16.mxu0 %v1273_v2  ;;  %1248 = vmatprep.subr.bf16.mxu1 %v1273_v2  ;;  %v1278_v7 = vld [vmem:[%s1522_s1 + $0x20] sm:$0xff]   ;;  %v1280_v9 = vld [vmem:[%s1522_s1 + $0x18] sm:$0xff]   ;;  %v1282_v13 = vld [vmem:[%s1522_s1 + $0x10] sm:$0xff]  }
   0xf   : > { %v1289_v11 = vld [vmem:[%s1404_s9 + $0x4] ss:$8 sps:$4 sm:$0xff]   ;;  %v1287_v18 = vld [vmem:[%s1404_s9] ss:$8 sps:$4 sm:$0xff]   ;;  %v1293_v20 = vld [vmem:[%s1404_s9 + $0x14] ss:$8 sps:$4 sm:$0xff]  }
  0x10   : > { %v1292_v12 = vld [vmem:[%s1404_s9 + $0x84] ss:$8 sps:$4 sm:$0xff]   ;;  %537 = vmatprep.mubr.bf16.mxu0 %v1289_v11  ;;  %v1290_v19 = vld [vmem:[%s1404_s9 + $0x80] ss:$8 sps:$4 sm:$0xff]   ;;  %v1295_v21 = vld [vmem:[%s1404_s9 + $0x94] ss:$8 sps:$4 sm:$0xff]  }
  0x11   : > { %1138 = vmatpush3.bf16.msra.mxu0 %v1274_v3  ;;  %1256 = vmatpush3.bf16.msra.mxu1 %v1274_v3  ;;  %v1283_v14 = vld [vmem:[%s1522_s1 + $0x48] sm:$0xff]   ;;  %v1285_v16 = vld [vmem:[%s1522_s1 + $0x40] sm:$0xff]   ;;  %v1297_v22 = vld [vmem:[%s1404_s9 + $0x10] ss:$8 sps:$4 sm:$0xff]  }
  0x12   : > { %1139 = vmatprep.subr.bf16.mxu0 %v1275_v4  ;;  %1249 = vmatprep.subr.bf16.mxu1 %v1275_v4  ;;  %v1284_v15 = vld [vmem:[%s1522_s1 + $0x8] sm:$0xff]   ;;  %v1286_v17 = vld [vmem:[%s1522_s1] sm:$0xff]   ;;  %v1298_v23 = vld [vmem:[%s1404_s9 + $0x90] ss:$8 sps:$4 sm:$0xff]  }
  0x13   : > { %601 = vmatprep.mubr.bf16.mxu1 %v1292_v12  ;;  %v1299_v24 = vld [vmem:[%s1404_s9 + $0x24] ss:$8 sps:$4 sm:$0xff]   ;;  %v1303_v26 = vld [vmem:[%s1404_s9 + $0x20] ss:$8 sps:$4 sm:$0xff]   ;;  %v1305_v28 = vld [vmem:[%s1404_s9 + $0x34] ss:$8 sps:$4 sm:$0xff]  }
  0x14   : > { %v1301_v25 = vld [vmem:[%s1404_s9 + $0xa4] ss:$8 sps:$4 sm:$0xff]   ;;  %v1304_v27 = vld [vmem:[%s1404_s9 + $0xa0] ss:$8 sps:$4 sm:$0xff]   ;;  %v1307_v29 = vld [vmem:[%s1404_s9 + $0xb4] ss:$8 sps:$4 sm:$0xff]  }
  0x15   : > { %1140 = vmatpush3.bf16.msra.mxu0 %v1276_v5  ;;  %1257 = vmatpush3.bf16.msra.mxu1 %v1276_v5  ;;  %v1309_v30 = vld [vmem:[%s1404_s9 + $0x30] ss:$8 sps:$4 sm:$0xff]   ;;  %v1311_v32 = vld [vmem:[%s1404_s9 + $0x44] ss:$8 sps:$4 sm:$0xff]   ;;  %v1315_v34 = vld [vmem:[%s1404_s9 + $0x40] ss:$8 sps:$4 sm:$0xff]  }
  0x16   : > { %1141 = vmatprep.subr.bf16.mxu0 %v1277_v6  ;;  %1250 = vmatprep.subr.bf16.mxu1 %v1277_v6  ;;  %v1310_v31 = vld [vmem:[%s1404_s9 + $0xb0] ss:$8 sps:$4 sm:$0xff]   ;;  %v1313_v33 = vld [vmem:[%s1404_s9 + $0xc4] ss:$8 sps:$4 sm:$0xff]   ;;  %v1316_v35 = vld [vmem:[%s1404_s9 + $0xc0] ss:$8 sps:$4 sm:$0xff]  }
  0x17   : > { %v1317_v36 = vld [vmem:[%s1404_s9 + $0x54] ss:$8 sps:$4 sm:$0xff]   ;;  %v1321_v38 = vld [vmem:[%s1404_s9 + $0x50] ss:$8 sps:$4 sm:$0xff]   ;;  %v1323_v40 = vld [vmem:[%s1404_s9 + $0x64] ss:$8 sps:$4 sm:$0xff]  }
  0x18   : > { %v1319_v37 = vld [vmem:[%s1404_s9 + $0xd4] ss:$8 sps:$4 sm:$0xff]   ;;  %v1322_v39 = vld [vmem:[%s1404_s9 + $0xd0] ss:$8 sps:$4 sm:$0xff]   ;;  %v1325_v41 = vld [vmem:[%s1404_s9 + $0xe4] ss:$8 sps:$4 sm:$0xff]  }
  0x19   : > { %1142 = vmatpush3.bf16.msra.mxu0 %v1278_v7  ;;  %1258 = vmatpush3.bf16.msra.mxu1 %v1278_v7  ;;  %v1327_v42 = vld [vmem:[%s1404_s9 + $0x60] ss:$8 sps:$4 sm:$0xff]   ;;  %v1329_v44 = vld [vmem:[%s1404_s9 + $0x74] ss:$8 sps:$4 sm:$0xff]   ;;  %v1333_v46 = vld [vmem:[%s1404_s9 + $0x70] ss:$8 sps:$4 sm:$0xff]  }
  0x1a   : > { %1143 = vmatprep.subr.bf16.mxu0 %v1279_v8  ;;  %1251 = vmatprep.subr.bf16.mxu1 %v1279_v8  ;;  %v1328_v43 = vld [vmem:[%s1404_s9 + $0xe0] ss:$8 sps:$4 sm:$0xff]   ;;  %v1331_v45 = vld [vmem:[%s1404_s9 + $0xf4] ss:$8 sps:$4 sm:$0xff]   ;;  %v1334_v47 = vld [vmem:[%s1404_s9 + $0xf0] ss:$8 sps:$4 sm:$0xff]  }
  0x1b   : > { %v1462_v52 = vld [vmem:[%s1523_s2] ss:$0 sm:$0xff] }
  0x1d   : > { %1144 = vmatpush3.bf16.msra.mxu0 %v1280_v9  ;;  %1259 = vmatpush3.bf16.msra.mxu1 %v1280_v9 }
  0x1e   : > { %1145 = vmatprep.subr.bf16.mxu0 %v1281_v10  ;;  %1252 = vmatprep.subr.bf16.mxu1 %v1281_v10 }
  0x21   : > { %1146 = vmatpush3.bf16.msra.mxu0 %v1282_v13  ;;  %1260 = vmatpush3.bf16.msra.mxu1 %v1282_v13 }
  0x22   : > { %1147 = vmatprep.subr.bf16.mxu0 %v1283_v14  ;;  %1253 = vmatprep.subr.bf16.mxu1 %v1283_v14 }
  0x25   : > { %1148 = vmatpush3.bf16.msra.mxu0 %v1284_v15  ;;  %1261 = vmatpush3.bf16.msra.mxu1 %v1284_v15 }
  0x26   : > { %1149 = vmatprep.subr.bf16.mxu0 %v1285_v16  ;;  %1254 = vmatprep.subr.bf16.mxu1 %v1285_v16 }
  0x29   : > { %1150 = vmatpush3.bf16.msra.mxu0 %v1286_v17  ;;  %1262 = vmatpush3.bf16.msra.mxu1 %v1286_v17 }
  0x2c   : > { %538 = vmatmul.mubr.bf16.vlgmr.msra.gmra.mxu0 %v1287_v18  ;;  %602 = vmatmul.mubr.bf16.vlgmr.msra.gmra.mxu1 %v1290_v19 }
  0x2d   : > { %545 = vmatprep.mubr.bf16.mxu0 %v1293_v20  ;;  %609 = vmatprep.mubr.bf16.mxu1 %v1295_v21 }
  0x34   : > { %546 = vmatmul.mubr.bf16.gmra.mxu0 %v1297_v22  ;;  %610 = vmatmul.mubr.bf16.gmra.mxu1 %v1298_v23 }
  0x35   : > { %553 = vmatprep.mubr.bf16.mxu0 %v1299_v24  ;;  %617 = vmatprep.mubr.bf16.mxu1 %v1301_v25 }
  0x3c   : > { %554 = vmatmul.mubr.bf16.gmra.mxu0 %v1303_v26  ;;  %618 = vmatmul.mubr.bf16.gmra.mxu1 %v1304_v27 }
  0x3d   : > { %561 = vmatprep.mubr.bf16.mxu0 %v1305_v28  ;;  %625 = vmatprep.mubr.bf16.mxu1 %v1307_v29 }
  0x44   : > { %562 = vmatmul.mubr.bf16.gmra.mxu0 %v1309_v30  ;;  %626 = vmatmul.mubr.bf16.gmra.mxu1 %v1310_v31 }
  0x45   : > { %569 = vmatprep.mubr.bf16.mxu0 %v1311_v32  ;;  %633 = vmatprep.mubr.bf16.mxu1 %v1313_v33 }
  0x4c   : > { %570 = vmatmul.mubr.bf16.gmra.mxu0 %v1315_v34  ;;  %634 = vmatmul.mubr.bf16.gmra.mxu1 %v1316_v35 }
  0x4d   : > { %577 = vmatprep.mubr.bf16.mxu0 %v1317_v36  ;;  %641 = vmatprep.mubr.bf16.mxu1 %v1319_v37 }
  0x54   : > { %578 = vmatmul.mubr.bf16.gmra.mxu0 %v1321_v38  ;;  %642 = vmatmul.mubr.bf16.gmra.mxu1 %v1322_v39 }
  0x55   : > { %585 = vmatprep.mubr.bf16.mxu0 %v1323_v40  ;;  %649 = vmatprep.mubr.bf16.mxu1 %v1325_v41 }
  0x5c   : > { %586 = vmatmul.mubr.bf16.gmra.mxu0 %v1327_v42  ;;  %650 = vmatmul.mubr.bf16.gmra.mxu1 %v1328_v43 }
  0x5d   : > { %593 = vmatprep.mubr.bf16.mxu0 %v1329_v44  ;;  %657 = vmatprep.mubr.bf16.mxu1 %v1331_v45 }
  0x64   : > { %594 = vmatmul.mubr.bf16.gmra.mxu0 %v1333_v46  ;;  %658 = vmatmul.mubr.bf16.gmra.mxu1 %v1334_v47 }
  0xec   : > { %v1151_v48 = vpop.f32.mrf.mxu0  ;;  %v1199_v49 = vpop.f32.mrf.mxu1 }
  0xee   : > { %v1152_v50 = vpop.f32.mrf.mxu0  ;;  %v1200_v51 = vpop.f32.mrf.mxu1 }
  0xef   : > { %v1153_v53 = vadd.f32 %v1152_v50, %v1151_v48  ;;  %v1201_v54 = vadd.f32 %v1200_v51, %v1199_v49 }
  0xf0   : > { %v1154_v55 = vpop.f32.mrf.mxu0  ;;  %v1202_v56 = vpop.f32.mrf.mxu1 }
  0xf1   : > { %v540_v57 = vadd.f32 %v1153_v53, %v1462_v52  ;;  %v604_v58 = vadd.f32 %v1201_v54, %v1462_v52 }
  0xf2   : > { %v1155_v59 = vpop.f32.mrf.mxu0  ;;  %v1203_v60 = vpop.f32.mrf.mxu1 }
  0xf3   : > { %v1156_v61 = vadd.f32 %v1155_v59, %v1154_v55  ;;  %v1204_v62 = vadd.f32 %v1203_v60, %v1202_v56  ;;  %v666_v3 = vmax.f32 %v540_v57, 0.0  ;;  %v682_v4 = vmax.f32 %v604_v58, 0.0 }
  0xf4   : > { %v1157_v63 = vpop.f32.mrf.mxu0  ;;  %v1205_v0 = vpop.f32.mrf.mxu1 }
  0xf5   : > { %v543_v1 = vadd.f32 %v1156_v61, %v1462_v52  ;;  %v607_v2 = vadd.f32 %v1204_v62, %v1462_v52 }
  0xf6   : > { %v1158_v5 = vpop.f32.mrf.mxu0  ;;  %v1206_v6 = vpop.f32.mrf.mxu1 }
  0xf7   : > { %v667_v7 = vmax.f32 %v543_v1, 0.0  ;;  %v683_v8 = vmax.f32 %v607_v2, 0.0  ;;  %v1159_v9 = vadd.f32 %v1158_v5, %v1157_v63  ;;  %v1207_v10 = vadd.f32 %v1206_v6, %v1205_v0 }
  0xf8   : > { %v1160_v11 = vpop.f32.mrf.mxu0  ;;  %v1208_v12 = vpop.f32.mrf.mxu1 }
  0xf9   : > { %v1043_v13 = vpack.c.bf16 %v667_v7, %v666_v3  ;;  %v1083_v14 = vpack.c.bf16 %v683_v8, %v682_v4  ;;  %v548_v15 = vadd.f32 %v1159_v9, %v1462_v52  ;;  %v612_v16 = vadd.f32 %v1207_v10, %v1462_v52 }
  0xfa   : > { %v1161_v17 = vpop.f32.mrf.mxu0  ;;  %v1209_v18 = vpop.f32.mrf.mxu1 }
  0xfb   : > { %1044 = vst [vmem:[%s1472_s4] sm:$0xff] %v1043_v13   ;;  %1127 = vst [vmem:[%s1472_s4 + $0x40] sm:$0xff] %v1083_v14   ;;  %v1162_v19 = vadd.f32 %v1161_v17, %v1160_v11  ;;  %v1210_v20 = vadd.f32 %v1209_v18, %v1208_v12  ;;  %v668_v25 = vmax.f32 %v548_v15, 0.0  ;;  %v684_v26 = vmax.f32 %v612_v16, 0.0 }
  0xfc   : > { %v1163_v21 = vpop.f32.mrf.mxu0  ;;  %v1211_v22 = vpop.f32.mrf.mxu1 }
  0xfd   : > { %v551_v23 = vadd.f32 %v1162_v19, %v1462_v52  ;;  %v615_v24 = vadd.f32 %v1210_v20, %v1462_v52 }
  0xfe   : > { %v1164_v27 = vpop.f32.mrf.mxu0  ;;  %v1212_v28 = vpop.f32.mrf.mxu1 }
  0xff   : > { %v669_v29 = vmax.f32 %v551_v23, 0.0  ;;  %v685_v30 = vmax.f32 %v615_v24, 0.0  ;;  %v1165_v31 = vadd.f32 %v1164_v27, %v1163_v21  ;;  %v1213_v32 = vadd.f32 %v1212_v28, %v1211_v22 }
 0x100   : > { %v1166_v33 = vpop.f32.mrf.mxu0  ;;  %v1214_v34 = vpop.f32.mrf.mxu1 }
 0x101   : > { %v1048_v35 = vpack.c.bf16 %v669_v29, %v668_v25  ;;  %v1088_v36 = vpack.c.bf16 %v685_v30, %v684_v26  ;;  %v556_v37 = vadd.f32 %v1165_v31, %v1462_v52  ;;  %v620_v38 = vadd.f32 %v1213_v32, %v1462_v52 }
 0x102   : > { %v1167_v39 = vpop.f32.mrf.mxu0  ;;  %v1215_v40 = vpop.f32.mrf.mxu1 }
 0x103   : > { %1120 = vst [vmem:[%s1472_s4 + $0x8] sm:$0xff] %v1048_v35   ;;  %1128 = vst [vmem:[%s1472_s4 + $0x48] sm:$0xff] %v1088_v36   ;;  %v1168_v41 = vadd.f32 %v1167_v39, %v1166_v33  ;;  %v1216_v42 = vadd.f32 %v1215_v40, %v1214_v34  ;;  %v670_v47 = vmax.f32 %v556_v37, 0.0  ;;  %v686_v48 = vmax.f32 %v620_v38, 0.0 }
 0x104   : > { %v1169_v43 = vpop.f32.mrf.mxu0  ;;  %v1217_v44 = vpop.f32.mrf.mxu1 }
 0x105   : > { %v559_v45 = vadd.f32 %v1168_v41, %v1462_v52  ;;  %v623_v46 = vadd.f32 %v1216_v42, %v1462_v52 }
 0x106   : > { %v1170_v49 = vpop.f32.mrf.mxu0  ;;  %v1218_v50 = vpop.f32.mrf.mxu1 }
 0x107   : > { %v671_v51 = vmax.f32 %v559_v45, 0.0  ;;  %v687_v53 = vmax.f32 %v623_v46, 0.0  ;;  %v1171_v54 = vadd.f32 %v1170_v49, %v1169_v43  ;;  %v1219_v55 = vadd.f32 %v1218_v50, %v1217_v44 }
 0x108   : > { %v1172_v56 = vpop.f32.mrf.mxu0  ;;  %v1220_v57 = vpop.f32.mrf.mxu1 }
 0x109   : > { %v1053_v58 = vpack.c.bf16 %v671_v51, %v670_v47  ;;  %v1093_v59 = vpack.c.bf16 %v687_v53, %v686_v48  ;;  %v564_v60 = vadd.f32 %v1171_v54, %v1462_v52  ;;  %v628_v61 = vadd.f32 %v1219_v55, %v1462_v52 }
 0x10a   : > { %v1173_v62 = vpop.f32.mrf.mxu0  ;;  %v1221_v63 = vpop.f32.mrf.mxu1 }
 0x10b   : > { %1121 = vst [vmem:[%s1472_s4 + $0x10] sm:$0xff] %v1053_v58   ;;  %1129 = vst [vmem:[%s1472_s4 + $0x50] sm:$0xff] %v1093_v59   ;;  %v1174_v0 = vadd.f32 %v1173_v62, %v1172_v56  ;;  %v1222_v1 = vadd.f32 %v1221_v63, %v1220_v57  ;;  %v672_v6 = vmax.f32 %v564_v60, 0.0  ;;  %v688_v7 = vmax.f32 %v628_v61, 0.0 }
 0x10c   : > { %v1175_v2 = vpop.f32.mrf.mxu0  ;;  %v1223_v3 = vpop.f32.mrf.mxu1 }
 0x10d   : > { %v567_v4 = vadd.f32 %v1174_v0, %v1462_v52  ;;  %v631_v5 = vadd.f32 %v1222_v1, %v1462_v52 }
 0x10e   : > { %v1176_v8 = vpop.f32.mrf.mxu0  ;;  %v1224_v9 = vpop.f32.mrf.mxu1 }
 0x10f   : > { %v673_v10 = vmax.f32 %v567_v4, 0.0  ;;  %v689_v11 = vmax.f32 %v631_v5, 0.0  ;;  %v1177_v12 = vadd.f32 %v1176_v8, %v1175_v2  ;;  %v1225_v13 = vadd.f32 %v1224_v9, %v1223_v3 }
 0x110   : > { %v1178_v14 = vpop.f32.mrf.mxu0  ;;  %v1226_v15 = vpop.f32.mrf.mxu1 }
 0x111   : > { %v1058_v16 = vpack.c.bf16 %v673_v10, %v672_v6  ;;  %v1098_v17 = vpack.c.bf16 %v689_v11, %v688_v7  ;;  %v572_v18 = vadd.f32 %v1177_v12, %v1462_v52  ;;  %v636_v19 = vadd.f32 %v1225_v13, %v1462_v52 }
 0x112   : > { %v1179_v20 = vpop.f32.mrf.mxu0  ;;  %v1227_v21 = vpop.f32.mrf.mxu1 }
 0x113   : > { %1122 = vst [vmem:[%s1472_s4 + $0x18] sm:$0xff] %v1058_v16   ;;  %1130 = vst [vmem:[%s1472_s4 + $0x58] sm:$0xff] %v1098_v17   ;;  %v1180_v22 = vadd.f32 %v1179_v20, %v1178_v14  ;;  %v1228_v23 = vadd.f32 %v1227_v21, %v1226_v15  ;;  %v674_v28 = vmax.f32 %v572_v18, 0.0  ;;  %v690_v29 = vmax.f32 %v636_v19, 0.0 }
 0x114   : > { %v1181_v24 = vpop.f32.mrf.mxu0  ;;  %v1229_v25 = vpop.f32.mrf.mxu1 }
 0x115   : > { %v575_v26 = vadd.f32 %v1180_v22, %v1462_v52  ;;  %v639_v27 = vadd.f32 %v1228_v23, %v1462_v52 }
 0x116   : > { %v1182_v30 = vpop.f32.mrf.mxu0  ;;  %v1230_v31 = vpop.f32.mrf.mxu1 }
 0x117   : > { %v675_v32 = vmax.f32 %v575_v26, 0.0  ;;  %v691_v33 = vmax.f32 %v639_v27, 0.0  ;;  %v1183_v34 = vadd.f32 %v1182_v30, %v1181_v24  ;;  %v1231_v35 = vadd.f32 %v1230_v31, %v1229_v25 }
 0x118   : > { %v1184_v36 = vpop.f32.mrf.mxu0  ;;  %v1232_v37 = vpop.f32.mrf.mxu1 }
 0x119   : > { %v1063_v38 = vpack.c.bf16 %v675_v32, %v674_v28  ;;  %v1103_v39 = vpack.c.bf16 %v691_v33, %v690_v29  ;;  %v580_v40 = vadd.f32 %v1183_v34, %v1462_v52  ;;  %v644_v41 = vadd.f32 %v1231_v35, %v1462_v52 }
 0x11a   : > { %v1185_v42 = vpop.f32.mrf.mxu0  ;;  %v1233_v43 = vpop.f32.mrf.mxu1 }
 0x11b   : > { %1123 = vst [vmem:[%s1472_s4 + $0x20] sm:$0xff] %v1063_v38   ;;  %1131 = vst [vmem:[%s1472_s4 + $0x60] sm:$0xff] %v1103_v39   ;;  %v1186_v44 = vadd.f32 %v1185_v42, %v1184_v36  ;;  %v1234_v45 = vadd.f32 %v1233_v43, %v1232_v37  ;;  %v676_v50 = vmax.f32 %v580_v40, 0.0  ;;  %v692_v51 = vmax.f32 %v644_v41, 0.0 }
 0x11c   : > { %v1187_v46 = vpop.f32.mrf.mxu0  ;;  %v1235_v47 = vpop.f32.mrf.mxu1 }
 0x11d   : > { %v583_v48 = vadd.f32 %v1186_v44, %v1462_v52  ;;  %v647_v49 = vadd.f32 %v1234_v45, %v1462_v52 }
 0x11e   : > { %v1188_v53 = vpop.f32.mrf.mxu0  ;;  %v1236_v54 = vpop.f32.mrf.mxu1 }
 0x11f   : > { %v677_v55 = vmax.f32 %v583_v48, 0.0  ;;  %v693_v56 = vmax.f32 %v647_v49, 0.0  ;;  %v1189_v57 = vadd.f32 %v1188_v53, %v1187_v46  ;;  %v1237_v58 = vadd.f32 %v1236_v54, %v1235_v47 }
 0x120   : > { %v1190_v59 = vpop.f32.mrf.mxu0  ;;  %v1238_v60 = vpop.f32.mrf.mxu1 }
 0x121   : > { %v1068_v61 = vpack.c.bf16 %v677_v55, %v676_v50  ;;  %v1108_v62 = vpack.c.bf16 %v693_v56, %v692_v51  ;;  %v588_v63 = vadd.f32 %v1189_v57, %v1462_v52  ;;  %v652_v0 = vadd.f32 %v1237_v58, %v1462_v52 }
 0x122   : > { %v1191_v1 = vpop.f32.mrf.mxu0  ;;  %v1239_v2 = vpop.f32.mrf.mxu1 }
 0x123   : > { %1124 = vst [vmem:[%s1472_s4 + $0x28] sm:$0xff] %v1068_v61   ;;  %1132 = vst [vmem:[%s1472_s4 + $0x68] sm:$0xff] %v1108_v62   ;;  %v1192_v3 = vadd.f32 %v1191_v1, %v1190_v59  ;;  %v1240_v4 = vadd.f32 %v1239_v2, %v1238_v60  ;;  %v678_v9 = vmax.f32 %v588_v63, 0.0  ;;  %v694_v10 = vmax.f32 %v652_v0, 0.0 }
 0x124   : > { %v1193_v5 = vpop.f32.mrf.mxu0  ;;  %v1241_v6 = vpop.f32.mrf.mxu1 }
 0x125   : > { %v591_v7 = vadd.f32 %v1192_v3, %v1462_v52  ;;  %v655_v8 = vadd.f32 %v1240_v4, %v1462_v52 }
 0x126   : > { %v1194_v11 = vpop.f32.mrf.mxu0  ;;  %v1242_v12 = vpop.f32.mrf.mxu1 }
 0x127   : > { %v679_v13 = vmax.f32 %v591_v7, 0.0  ;;  %v695_v14 = vmax.f32 %v655_v8, 0.0  ;;  %v1195_v15 = vadd.f32 %v1194_v11, %v1193_v5  ;;  %v1243_v16 = vadd.f32 %v1242_v12, %v1241_v6 }
 0x128   : > { %v1196_v17 = vpop.f32.mrf.mxu0  ;;  %v1244_v18 = vpop.f32.mrf.mxu1 }
 0x129   : > { %v1073_v19 = vpack.c.bf16 %v679_v13, %v678_v9  ;;  %v1113_v20 = vpack.c.bf16 %v695_v14, %v694_v10  ;;  %v596_v23 = vadd.f32 %v1195_v15, %v1462_v52  ;;  %v660_v24 = vadd.f32 %v1243_v16, %v1462_v52 }
 0x12a   : > { %v1197_v21 = vpop.f32.mrf.mxu0  ;;  %v1245_v22 = vpop.f32.mrf.mxu1 }
 0x12b   : > { %1125 = vst [vmem:[%s1472_s4 + $0x30] sm:$0xff] %v1073_v19   ;;  %1133 = vst [vmem:[%s1472_s4 + $0x70] sm:$0xff] %v1113_v20   ;;  %v1198_v25 = vadd.f32 %v1197_v21, %v1196_v17  ;;  %v1246_v26 = vadd.f32 %v1245_v22, %v1244_v18  ;;  %v680_v29 = vmax.f32 %v596_v23, 0.0  ;;  %v696_v30 = vmax.f32 %v660_v24, 0.0 }
 0x12d   : > { %v599_v27 = vadd.f32 %v1198_v25, %v1462_v52  ;;  %v663_v28 = vadd.f32 %v1246_v26, %v1462_v52 }
 0x12f   : > { %v681_v31 = vmax.f32 %v599_v27, 0.0  ;;  %v697_v32 = vmax.f32 %v663_v28, 0.0 }
 0x131   : > { %v1078_v33 = vpack.c.bf16 %v681_v31, %v680_v29  ;;  %v1118_v34 = vpack.c.bf16 %v697_v32, %v696_v30 }
 0x133   : > { %1126 = vst [vmem:[%s1472_s4 + $0x38] sm:$0xff] %v1078_v33   ;;  %1134 = vst [vmem:[%s1472_s4 + $0x78] sm:$0xff] %v1118_v34  }
 0x134 PF: > { %s13_s12 = sadd.s32 1, %s1341_s12  }
 0x135   : > { %p10_p4 = scmp.ge.s32.totalorder %s13_s12, 4  }
 0x137   :  { %12 = sbr.rel (!%p10_p4) target bundleno = 1 (0x1), region = 62 }

// kernel: _lambda_.18
= control target key start
LH: loop header
LB: loop body
LE: loop exit
PB: predicated region body
PF: predicated region fallthrough
CT: control target
= control target key end

     0   :  { %s836_s1 = inlined_call_operand.vmem [shape: bf16[256,128], index: 1, kind: input, shape index: {}]   ;;  %s837_s0 = inlined_call_operand.vmem [shape: bf16[128,256], index: 0, kind: input, shape index: {}]   ;;  %s838_s2 = inlined_call_operand.vmem [shape: f32[1,128], index: 2, kind: input, shape index: {}]   ;;  %s839_s3 = inlined_call_operand.vmem [shape: bf16[128,128], index: 3, kind: output, shape index: {}]  }
   0x1   :  { %v635_v0 = vld [vmem:[%s836_s1 + $0x78] sm:$0xff]   ;;  %v637_v2 = vld [vmem:[%s836_s1 + $0x70] sm:$0xff]   ;;  %v639_v4 = vld [vmem:[%s836_s1 + $0x68] sm:$0xff]  }
   0x2   :  { %v636_v1 = vld [vmem:[%s836_s1 + $0x38] sm:$0xff]   ;;  %555 = vmatprep.subr.bf16.mxu0 %v635_v0  ;;  %619 = vmatprep.subr.bf16.mxu1 %v635_v0  ;;  %v638_v3 = vld [vmem:[%s836_s1 + $0x30] sm:$0xff]   ;;  %v640_v5 = vld [vmem:[%s836_s1 + $0x28] sm:$0xff]  }
   0x3   :  { %556 = vmatpush3.bf16.msra.mxu0 %v636_v1  ;;  %627 = vmatpush3.bf16.msra.mxu1 %v636_v1  ;;  %v641_v6 = vld [vmem:[%s836_s1 + $0x60] sm:$0xff]   ;;  %v643_v8 = vld [vmem:[%s836_s1 + $0x58] sm:$0xff]   ;;  %v645_v10 = vld [vmem:[%s836_s1 + $0x50] sm:$0xff]  }
   0x4   :  { %557 = vmatprep.subr.bf16.mxu0 %v637_v2  ;;  %620 = vmatprep.subr.bf16.mxu1 %v637_v2  ;;  %v642_v7 = vld [vmem:[%s836_s1 + $0x20] sm:$0xff]   ;;  %v644_v9 = vld [vmem:[%s836_s1 + $0x18] sm:$0xff]   ;;  %v646_v13 = vld [vmem:[%s836_s1 + $0x10] sm:$0xff]  }
   0x5   :  { %v653_v11 = vld [vmem:[%s837_s0 + $0x4] ss:$8 sps:$4 sm:$0xff]   ;;  %v651_v18 = vld [vmem:[%s837_s0] ss:$8 sps:$4 sm:$0xff]   ;;  %v657_v20 = vld [vmem:[%s837_s0 + $0x14] ss:$8 sps:$4 sm:$0xff]  }
   0x6   :  { %v656_v12 = vld [vmem:[%s837_s0 + $0x44] ss:$8 sps:$4 sm:$0xff]   ;;  %278 = vmatprep.mubr.bf16.mxu0 %v653_v11  ;;  %v654_v19 = vld [vmem:[%s837_s0 + $0x40] ss:$8 sps:$4 sm:$0xff]   ;;  %v659_v21 = vld [vmem:[%s837_s0 + $0x54] ss:$8 sps:$4 sm:$0xff]  }
   0x7   :  { %558 = vmatpush3.bf16.msra.mxu0 %v638_v3  ;;  %628 = vmatpush3.bf16.msra.mxu1 %v638_v3  ;;  %v647_v14 = vld [vmem:[%s836_s1 + $0x48] sm:$0xff]   ;;  %v649_v16 = vld [vmem:[%s836_s1 + $0x40] sm:$0xff]   ;;  %v661_v22 = vld [vmem:[%s837_s0 + $0x10] ss:$8 sps:$4 sm:$0xff]  }
   0x8   :  { %559 = vmatprep.subr.bf16.mxu0 %v639_v4  ;;  %621 = vmatprep.subr.bf16.mxu1 %v639_v4  ;;  %v648_v15 = vld [vmem:[%s836_s1 + $0x8] sm:$0xff]   ;;  %v650_v17 = vld [vmem:[%s836_s1] sm:$0xff]   ;;  %v662_v23 = vld [vmem:[%s837_s0 + $0x50] ss:$8 sps:$4 sm:$0xff]  }
   0x9   :  { %310 = vmatprep.mubr.bf16.mxu1 %v656_v12  ;;  %v663_v24 = vld [vmem:[%s837_s0 + $0x24] ss:$8 sps:$4 sm:$0xff]   ;;  %v667_v26 = vld [vmem:[%s837_s0 + $0x20] ss:$8 sps:$4 sm:$0xff]   ;;  %v669_v28 = vld [vmem:[%s837_s0 + $0x34] ss:$8 sps:$4 sm:$0xff]  }
   0xa   :  { %v665_v25 = vld [vmem:[%s837_s0 + $0x64] ss:$8 sps:$4 sm:$0xff]   ;;  %v668_v27 = vld [vmem:[%s837_s0 + $0x60] ss:$8 sps:$4 sm:$0xff]   ;;  %v671_v29 = vld [vmem:[%s837_s0 + $0x74] ss:$8 sps:$4 sm:$0xff]  }
   0xb   :  { %560 = vmatpush3.bf16.msra.mxu0 %v640_v5  ;;  %629 = vmatpush3.bf16.msra.mxu1 %v640_v5  ;;  %v673_v30 = vld [vmem:[%s837_s0 + $0x30] ss:$8 sps:$4 sm:$0xff]   ;;  %v794_v36 = vld [vmem:[%s838_s2] ss:$0 sm:$0xff] }
   0xc   :  { %561 = vmatprep.subr.bf16.mxu0 %v641_v6  ;;  %622 = vmatprep.subr.bf16.mxu1 %v641_v6  ;;  %v674_v31 = vld [vmem:[%s837_s0 + $0x70] ss:$8 sps:$4 sm:$0xff]  }
   0xf   :  { %562 = vmatpush3.bf16.msra.mxu0 %v642_v7  ;;  %630 = vmatpush3.bf16.msra.mxu1 %v642_v7 }
  0x10   :  { %563 = vmatprep.subr.bf16.mxu0 %v643_v8  ;;  %623 = vmatprep.subr.bf16.mxu1 %v643_v8 }
  0x13   :  { %564 = vmatpush3.bf16.msra.mxu0 %v644_v9  ;;  %631 = vmatpush3.bf16.msra.mxu1 %v644_v9 }
  0x14   :  { %565 = vmatprep.subr.bf16.mxu0 %v645_v10  ;;  %624 = vmatprep.subr.bf16.mxu1 %v645_v10 }
  0x17   :  { %566 = vmatpush3.bf16.msra.mxu0 %v646_v13  ;;  %632 = vmatpush3.bf16.msra.mxu1 %v646_v13 }
  0x18   :  { %567 = vmatprep.subr.bf16.mxu0 %v647_v14  ;;  %625 = vmatprep.subr.bf16.mxu1 %v647_v14 }
  0x1b   :  { %568 = vmatpush3.bf16.msra.mxu0 %v648_v15  ;;  %633 = vmatpush3.bf16.msra.mxu1 %v648_v15 }
  0x1c   :  { %569 = vmatprep.subr.bf16.mxu0 %v649_v16  ;;  %626 = vmatprep.subr.bf16.mxu1 %v649_v16 }
  0x1f   :  { %570 = vmatpush3.bf16.msra.mxu0 %v650_v17  ;;  %634 = vmatpush3.bf16.msra.mxu1 %v650_v17 }
  0x22   :  { %279 = vmatmul.mubr.bf16.vlgmr.msra.gmra.mxu0 %v651_v18  ;;  %311 = vmatmul.mubr.bf16.vlgmr.msra.gmra.mxu1 %v654_v19 }
  0x23   :  { %286 = vmatprep.mubr.bf16.mxu0 %v657_v20  ;;  %318 = vmatprep.mubr.bf16.mxu1 %v659_v21 }
  0x2a   :  { %287 = vmatmul.mubr.bf16.gmra.mxu0 %v661_v22  ;;  %319 = vmatmul.mubr.bf16.gmra.mxu1 %v662_v23 }
  0x2b   :  { %294 = vmatprep.mubr.bf16.mxu0 %v663_v24  ;;  %326 = vmatprep.mubr.bf16.mxu1 %v665_v25 }
  0x32   :  { %295 = vmatmul.mubr.bf16.gmra.mxu0 %v667_v26  ;;  %327 = vmatmul.mubr.bf16.gmra.mxu1 %v668_v27 }
  0x33   :  { %302 = vmatprep.mubr.bf16.mxu0 %v669_v28  ;;  %334 = vmatprep.mubr.bf16.mxu1 %v671_v29 }
  0x3a   :  { %303 = vmatmul.mubr.bf16.gmra.mxu0 %v673_v30  ;;  %335 = vmatmul.mubr.bf16.gmra.mxu1 %v674_v31 }
  0xe2   :  { %v571_v32 = vpop.f32.mrf.mxu0  ;;  %v595_v33 = vpop.f32.mrf.mxu1 }
  0xe4   :  { %v572_v34 = vpop.f32.mrf.mxu0  ;;  %v596_v35 = vpop.f32.mrf.mxu1 }
  0xe5   :  { %v573_v37 = vadd.f32 %v572_v34, %v571_v32  ;;  %v597_v38 = vadd.f32 %v596_v35, %v595_v33 }
  0xe6   :  { %v574_v39 = vpop.f32.mrf.mxu0  ;;  %v598_v40 = vpop.f32.mrf.mxu1 }
  0xe7   :  { %v281_v41 = vadd.f32 %v573_v37, %v794_v36  ;;  %v313_v42 = vadd.f32 %v597_v38, %v794_v36 }
  0xe8   :  { %v575_v43 = vpop.f32.mrf.mxu0  ;;  %v599_v44 = vpop.f32.mrf.mxu1 }
  0xe9   :  { %v576_v45 = vadd.f32 %v575_v43, %v574_v39  ;;  %v600_v46 = vadd.f32 %v599_v44, %v598_v40  ;;  %v343_v51 = vmax.f32 %v281_v41, 0.0  ;;  %v351_v52 = vmax.f32 %v313_v42, 0.0 }
  0xea   :  { %v577_v47 = vpop.f32.mrf.mxu0  ;;  %v601_v48 = vpop.f32.mrf.mxu1 }
  0xeb   :  { %v284_v49 = vadd.f32 %v576_v45, %v794_v36  ;;  %v316_v50 = vadd.f32 %v600_v46, %v794_v36 }
  0xec   :  { %v578_v53 = vpop.f32.mrf.mxu0  ;;  %v602_v54 = vpop.f32.mrf.mxu1 }
  0xed   :  { %v344_v55 = vmax.f32 %v284_v49, 0.0  ;;  %v352_v56 = vmax.f32 %v316_v50, 0.0  ;;  %v579_v57 = vadd.f32 %v578_v53, %v577_v47  ;;  %v603_v58 = vadd.f32 %v602_v54, %v601_v48 }
  0xee   :  { %v580_v59 = vpop.f32.mrf.mxu0  ;;  %v604_v60 = vpop.f32.mrf.mxu1 }
  0xef   :  { %v511_v61 = vpack.c.bf16 %v344_v55, %v343_v51  ;;  %v531_v62 = vpack.c.bf16 %v352_v56, %v351_v52  ;;  %v289_v63 = vadd.f32 %v579_v57, %v794_v36  ;;  %v321_v0 = vadd.f32 %v603_v58, %v794_v36 }
  0xf0   :  { %v581_v1 = vpop.f32.mrf.mxu0  ;;  %v605_v2 = vpop.f32.mrf.mxu1 }
  0xf1   :  { %512 = vst [vmem:[%s839_s3] sm:$0xff] %v511_v61   ;;  %551 = vst [vmem:[%s839_s3 + $0x20] sm:$0xff] %v531_v62   ;;  %v582_v3 = vadd.f32 %v581_v1, %v580_v59  ;;  %v606_v4 = vadd.f32 %v605_v2, %v604_v60  ;;  %v345_v9 = vmax.f32 %v289_v63, 0.0  ;;  %v353_v10 = vmax.f32 %v321_v0, 0.0 }
  0xf2   :  { %v583_v5 = vpop.f32.mrf.mxu0  ;;  %v607_v6 = vpop.f32.mrf.mxu1 }
  0xf3   :  { %v292_v7 = vadd.f32 %v582_v3, %v794_v36  ;;  %v324_v8 = vadd.f32 %v606_v4, %v794_v36 }
  0xf4   :  { %v584_v11 = vpop.f32.mrf.mxu0  ;;  %v608_v12 = vpop.f32.mrf.mxu1 }
  0xf5   :  { %v346_v13 = vmax.f32 %v292_v7, 0.0  ;;  %v354_v14 = vmax.f32 %v324_v8, 0.0  ;;  %v585_v15 = vadd.f32 %v584_v11, %v583_v5  ;;  %v609_v16 = vadd.f32 %v608_v12, %v607_v6 }
  0xf6   :  { %v586_v17 = vpop.f32.mrf.mxu0  ;;  %v610_v18 = vpop.f32.mrf.mxu1 }
  0xf7   :  { %v516_v19 = vpack.c.bf16 %v346_v13, %v345_v9  ;;  %v536_v20 = vpack.c.bf16 %v354_v14, %v353_v10  ;;  %v297_v21 = vadd.f32 %v585_v15, %v794_v36  ;;  %v329_v22 = vadd.f32 %v609_v16, %v794_v36 }
  0xf8   :  { %v587_v23 = vpop.f32.mrf.mxu0  ;;  %v611_v24 = vpop.f32.mrf.mxu1 }
  0xf9   :  { %548 = vst [vmem:[%s839_s3 + $0x8] sm:$0xff] %v516_v19   ;;  %552 = vst [vmem:[%s839_s3 + $0x28] sm:$0xff] %v536_v20   ;;  %v588_v25 = vadd.f32 %v587_v23, %v586_v17  ;;  %v612_v26 = vadd.f32 %v611_v24, %v610_v18  ;;  %v347_v31 = vmax.f32 %v297_v21, 0.0  ;;  %v355_v32 = vmax.f32 %v329_v22, 0.0 }
  0xfa   :  { %v589_v27 = vpop.f32.mrf.mxu0  ;;  %v613_v28 = vpop.f32.mrf.mxu1 }
  0xfb   :  { %v300_v29 = vadd.f32 %v588_v25, %v794_v36  ;;  %v332_v30 = vadd.f32 %v612_v26, %v794_v36 }
  0xfc   :  { %v590_v33 = vpop.f32.mrf.mxu0  ;;  %v614_v34 = vpop.f32.mrf.mxu1 }
  0xfd   :  { %v348_v35 = vmax.f32 %v300_v29, 0.0  ;;  %v356_v37 = vmax.f32 %v332_v30, 0.0  ;;  %v591_v38 = vadd.f32 %v590_v33, %v589_v27  ;;  %v615_v39 = vadd.f32 %v614_v34, %v613_v28 }
  0xfe   :  { %v592_v40 = vpop.f32.mrf.mxu0  ;;  %v616_v41 = vpop.f32.mrf.mxu1 }
  0xff   :  { %v521_v42 = vpack.c.bf16 %v348_v35, %v347_v31  ;;  %v541_v43 = vpack.c.bf16 %v356_v37, %v355_v32  ;;  %v305_v46 = vadd.f32 %v591_v38, %v794_v36  ;;  %v337_v47 = vadd.f32 %v615_v39, %v794_v36 }
 0x100   :  { %v593_v44 = vpop.f32.mrf.mxu0  ;;  %v617_v45 = vpop.f32.mrf.mxu1 }
 0x101   :  { %549 = vst [vmem:[%s839_s3 + $0x10] sm:$0xff] %v521_v42   ;;  %553 = vst [vmem:[%s839_s3 + $0x30] sm:$0xff] %v541_v43   ;;  %v594_v48 = vadd.f32 %v593_v44, %v592_v40  ;;  %v618_v49 = vadd.f32 %v617_v45, %v616_v41  ;;  %v349_v52 = vmax.f32 %v305_v46, 0.0  ;;  %v357_v53 = vmax.f32 %v337_v47, 0.0 }
 0x103   :  { %v308_v50 = vadd.f32 %v594_v48, %v794_v36  ;;  %v340_v51 = vadd.f32 %v618_v49, %v794_v36 }
 0x105   :  { %v350_v54 = vmax.f32 %v308_v50, 0.0  ;;  %v358_v55 = vmax.f32 %v340_v51, 0.0 }
 0x107   :  { %v526_v56 = vpack.c.bf16 %v350_v54, %v349_v52  ;;  %v546_v57 = vpack.c.bf16 %v358_v55, %v357_v53 }
 0x109   :  { %550 = vst [vmem:[%s839_s3 + $0x18] sm:$0xff] %v526_v56   ;;  %554 = vst [vmem:[%s839_s3 + $0x38] sm:$0xff] %v546_v57  }

// kernel: _lambda_.19
= control target key start
LH: loop header
LB: loop body
LE: loop exit
PB: predicated region body
PF: predicated region fallthrough
CT: control target
= control target key end

     0   :  { %s771_s1 = inlined_call_operand.vmem [shape: bf16[128,128], index: 1, kind: input, shape index: {}]   ;;  %s772_s0 = inlined_call_operand.vmem [shape: bf16[128,128], index: 0, kind: input, shape index: {}]   ;;  %s773_s2 = inlined_call_operand.vmem [shape: f32[1,128], index: 2, kind: input, shape index: {}]   ;;  %s774_s3 = inlined_call_operand.vmem [shape: bf16[128,128], index: 3, kind: input, shape index: {}]   ;;  %s775_s4 = inlined_call_operand.vmem [shape: bf16[128,128], index: 4, kind: output, shape index: {}]  }
   0x1   :  { %v597_v0 = vld [vmem:[%s771_s1 + $0x38] sm:$0xff]   ;;  %v598_v1 = vld [vmem:[%s771_s1 + $0x30] sm:$0xff]   ;;  %v599_v2 = vld [vmem:[%s771_s1 + $0x28] sm:$0xff]  }
   0x2   :  { %549 = vmatprep.subr.bf16.mxu0 %v597_v0  ;;  %581 = vmatprep.subr.bf16.mxu1 %v597_v0  ;;  %v600_v3 = vld [vmem:[%s771_s1 + $0x20] sm:$0xff]   ;;  %v601_v6 = vld [vmem:[%s771_s1 + $0x18] sm:$0xff]   ;;  %v602_v7 = vld [vmem:[%s771_s1 + $0x10] sm:$0xff]  }
   0x3   :  { %550 = vmatpush3.bf16.msra.mxu0 %v597_v0  ;;  %589 = vmatpush3.bf16.msra.mxu1 %v597_v0  ;;  %v605_v4 = vld [vmem:[%s772_s0] sm:$0xff]   ;;  %v603_v8 = vld [vmem:[%s771_s1 + $0x8] sm:$0xff]   ;;  %v609_v12 = vld [vmem:[%s772_s0 + $0x10] sm:$0xff]  }
   0x4   :  { %551 = vmatprep.subr.bf16.mxu0 %v598_v1  ;;  %582 = vmatprep.subr.bf16.mxu1 %v598_v1  ;;  %v606_v5 = vld [vmem:[%s772_s0 + $0x20] sm:$0xff]   ;;  %v607_v10 = vld [vmem:[%s772_s0 + $0x8] sm:$0xff]   ;;  %v610_v13 = vld [vmem:[%s772_s0 + $0x30] sm:$0xff]  }
   0x5   :  { %565 = vmatprep.mubr.bf16.mxu0 %v605_v4  ;;  %573 = vmatprep.mubr.bf16.mxu1 %v606_v5  ;;  %v604_v9 = vld [vmem:[%s771_s1] sm:$0xff]   ;;  %v608_v11 = vld [vmem:[%s772_s0 + $0x28] sm:$0xff]   ;;  %v611_v14 = vld [vmem:[%s772_s0 + $0x18] sm:$0xff]  }
   0x6   :  { %v612_v15 = vld [vmem:[%s772_s0 + $0x38] sm:$0xff]   ;;  %v689_v16 = vld [vmem:[%s773_s2] ss:$0 sm:$0xff]  ;;  %v519_v17 = vld [vmem:[%s774_s3 + $0x8] sm:$0xff]  }
   0x7   :  { %552 = vmatpush3.bf16.msra.mxu0 %v598_v1  ;;  %590 = vmatpush3.bf16.msra.mxu1 %v598_v1  ;;  %v523_v18 = vld [vmem:[%s774_s3 + $0x28] sm:$0xff]   ;;  %v448_v21 = vld [vmem:[%s774_s3] sm:$0xff]   ;;  %v453_v24 = vunpack.c.l.bf16 %v519_v17  ;;  %v708_v29 = vld [vmem:[%s774_s3 + $0x18] sm:$0xff]   ;;  %v454_v38 = vunpack.c.h.bf16 %v519_v17 }
   0x8   :  { %553 = vmatprep.subr.bf16.mxu0 %v599_v2  ;;  %583 = vmatprep.subr.bf16.mxu1 %v599_v2  ;;  %v522_v22 = vld [vmem:[%s774_s3 + $0x20] sm:$0xff]   ;;  %v469_v26 = vunpack.c.l.bf16 %v523_v18  ;;  %v713_v30 = vld [vmem:[%s774_s3 + $0x38] sm:$0xff]   ;;  %v449_v32 = vunpack.c.l.bf16 %v448_v21  ;;  %v720_v35 = vld [vmem:[%s774_s3 + $0x10] sm:$0xff]   ;;  %v470_v40 = vunpack.c.h.bf16 %v523_v18  ;;  %v450_v41 = vunpack.c.h.bf16 %v448_v21 }
   0x9   :  { %v465_v34 = vunpack.c.l.bf16 %v522_v22  ;;  %v725_v36 = vld [vmem:[%s774_s3 + $0x30] sm:$0xff]   ;;  %v466_v42 = vunpack.c.h.bf16 %v522_v22  ;;  %v461_v45 = vunpack.c.l.bf16 %v708_v29  ;;  %v477_v46 = vunpack.c.l.bf16 %v713_v30 }
   0xa   :  { %v457_v51 = vunpack.c.l.bf16 %v720_v35  ;;  %v473_v52 = vunpack.c.l.bf16 %v725_v36  ;;  %v462_v61 = vunpack.c.h.bf16 %v708_v29  ;;  %v478_v62 = vunpack.c.h.bf16 %v713_v30 }
   0xb   :  { %554 = vmatpush3.bf16.msra.mxu0 %v599_v2  ;;  %591 = vmatpush3.bf16.msra.mxu1 %v599_v2  ;;  %v458_v22 = vunpack.c.h.bf16 %v720_v35 }
   0xc   :  { %555 = vmatprep.subr.bf16.mxu0 %v600_v3  ;;  %584 = vmatprep.subr.bf16.mxu1 %v600_v3 }
   0xf   :  { %556 = vmatpush3.bf16.msra.mxu0 %v600_v3  ;;  %592 = vmatpush3.bf16.msra.mxu1 %v600_v3 }
  0x10   :  { %557 = vmatprep.subr.bf16.mxu0 %v601_v6  ;;  %585 = vmatprep.subr.bf16.mxu1 %v601_v6 }
  0x13   :  { %558 = vmatpush3.bf16.msra.mxu0 %v601_v6  ;;  %593 = vmatpush3.bf16.msra.mxu1 %v601_v6 }
  0x14   :  { %559 = vmatprep.subr.bf16.mxu0 %v602_v7  ;;  %586 = vmatprep.subr.bf16.mxu1 %v602_v7 }
  0x17   :  { %560 = vmatpush3.bf16.msra.mxu0 %v602_v7  ;;  %594 = vmatpush3.bf16.msra.mxu1 %v602_v7 }
  0x18   :  { %561 = vmatprep.subr.bf16.mxu0 %v603_v8  ;;  %587 = vmatprep.subr.bf16.mxu1 %v603_v8 }
  0x1b   :  { %562 = vmatpush3.bf16.msra.mxu0 %v603_v8  ;;  %595 = vmatpush3.bf16.msra.mxu1 %v603_v8 }
  0x1c   :  { %563 = vmatprep.subr.bf16.mxu0 %v604_v9  ;;  %588 = vmatprep.subr.bf16.mxu1 %v604_v9 }
  0x1f   :  { %564 = vmatpush3.bf16.msra.mxu0 %v604_v9  ;;  %596 = vmatpush3.bf16.msra.mxu1 %v604_v9 }
  0x22   :  { %566 = vmatmul.mubr.bf16.vlgmr.msra.gmra.mxu0 %v607_v10  ;;  %574 = vmatmul.mubr.bf16.vlgmr.msra.gmra.mxu1 %v608_v11 }
  0x23   :  { %569 = vmatprep.mubr.bf16.mxu0 %v609_v12  ;;  %577 = vmatprep.mubr.bf16.mxu1 %v610_v13 }
  0x2a   :  { %570 = vmatmul.mubr.bf16.gmra.mxu0 %v611_v14  ;;  %578 = vmatmul.mubr.bf16.gmra.mxu1 %v612_v15 }
  0xe2   :  { %v567_v19 = vpop.f32.mrf.mxu0  ;;  %v575_v20 = vpop.f32.mrf.mxu1 }
  0xe3   :  { %v196_v23 = vadd.f32 %v567_v19, %v689_v16  ;;  %v228_v25 = vadd.f32 %v575_v20, %v689_v16 }
  0xe4   :  { %v187_v27 = vpop.f32.mrf.mxu0  ;;  %v219_v28 = vpop.f32.mrf.mxu1 }
  0xe5   :  { %v188_v31 = vadd.f32 %v689_v16, %v187_v27  ;;  %v220_v33 = vadd.f32 %v689_v16, %v219_v28  ;;  %v284_v43 = vadd.f32 %v453_v24, %v196_v23  ;;  %v292_v44 = vadd.f32 %v469_v26, %v228_v25 }
  0xe6   :  { %v568_v37 = vpop.f32.mrf.mxu0  ;;  %v576_v39 = vpop.f32.mrf.mxu1  ;;  %v474_v23 = vunpack.c.h.bf16 %v725_v36 }
  0xe7   :  { %v199_v47 = vadd.f32 %v568_v37, %v689_v16  ;;  %v231_v48 = vadd.f32 %v576_v39, %v689_v16  ;;  %v282_v53 = vadd.f32 %v449_v32, %v188_v31  ;;  %v290_v54 = vadd.f32 %v465_v34, %v220_v33 }
  0xe8   :  { %v190_v49 = vpop.f32.mrf.mxu0  ;;  %v222_v50 = vpop.f32.mrf.mxu1  ;;  %v300_v63 = vmax.f32 %v284_v43, 0.0  ;;  %v308_v0 = vmax.f32 %v292_v44, 0.0 }
  0xe9   :  { %v191_v55 = vadd.f32 %v689_v16, %v190_v49  ;;  %v223_v56 = vadd.f32 %v689_v16, %v222_v50  ;;  %v285_v57 = vadd.f32 %v454_v38, %v199_v47  ;;  %v293_v58 = vadd.f32 %v470_v40, %v231_v48 }
  0xea   :  { %v571_v59 = vpop.f32.mrf.mxu0  ;;  %v579_v60 = vpop.f32.mrf.mxu1  ;;  %v298_v9 = vmax.f32 %v282_v53, 0.0  ;;  %v306_v10 = vmax.f32 %v290_v54, 0.0 }
  0xeb   :  { %v283_v1 = vadd.f32 %v450_v41, %v191_v55  ;;  %v291_v2 = vadd.f32 %v466_v42, %v223_v56  ;;  %v301_v3 = vmax.f32 %v285_v57, 0.0  ;;  %v309_v4 = vmax.f32 %v293_v58, 0.0 }
  0xec   :  { %v212_v5 = vadd.f32 %v571_v59, %v689_v16  ;;  %v244_v6 = vadd.f32 %v579_v60, %v689_v16  ;;  %v203_v7 = vpop.f32.mrf.mxu0  ;;  %v235_v8 = vpop.f32.mrf.mxu1 }
  0xed   :  { %v299_v11 = vmax.f32 %v283_v1, 0.0  ;;  %v307_v12 = vmax.f32 %v291_v2, 0.0  ;;  %v487_v13 = vpack.c.bf16 %v301_v3, %v300_v63  ;;  %v507_v14 = vpack.c.bf16 %v309_v4, %v308_v0 }
  0xee   :  { %v204_v15 = vadd.f32 %v689_v16, %v203_v7  ;;  %v236_v17 = vadd.f32 %v689_v16, %v235_v8  ;;  %v572_v18 = vpop.f32.mrf.mxu0  ;;  %v580_v19 = vpop.f32.mrf.mxu1  ;;  %v288_v24 = vadd.f32 %v461_v45, %v212_v5  ;;  %v296_v25 = vadd.f32 %v477_v46, %v244_v6 }
  0xef   :  { %v482_v20 = vpack.c.bf16 %v299_v11, %v298_v9  ;;  %v502_v21 = vpack.c.bf16 %v307_v12, %v306_v10  ;;  %526 = vst [vmem:[%s775_s4 + $0x8] sm:$0xff] %v487_v13   ;;  %530 = vst [vmem:[%s775_s4 + $0x28] sm:$0xff] %v507_v14   ;;  %v215_v26 = vadd.f32 %v572_v18, %v689_v16 }
  0xf0   :  { %v247_v27 = vadd.f32 %v580_v19, %v689_v16  ;;  %v206_v28 = vpop.f32.mrf.mxu0  ;;  %v238_v29 = vpop.f32.mrf.mxu1  ;;  %v286_v30 = vadd.f32 %v457_v51, %v204_v15  ;;  %v294_v31 = vadd.f32 %v473_v52, %v236_v17  ;;  %v304_v38 = vmax.f32 %v288_v24, 0.0 }
  0xf1   :  { %483 = vst [vmem:[%s775_s4] sm:$0xff] %v482_v20   ;;  %529 = vst [vmem:[%s775_s4 + $0x20] sm:$0xff] %v502_v21   ;;  %v207_v32 = vadd.f32 %v689_v16, %v206_v28  ;;  %v239_v33 = vadd.f32 %v689_v16, %v238_v29  ;;  %v289_v34 = vadd.f32 %v462_v61, %v215_v26  ;;  %v312_v39 = vmax.f32 %v296_v25, 0.0 }
  0xf2   :  { %v297_v35 = vadd.f32 %v478_v62, %v247_v27  ;;  %v302_v42 = vmax.f32 %v286_v30, 0.0  ;;  %v310_v43 = vmax.f32 %v294_v31, 0.0 }
  0xf3   :  { %v287_v36 = vadd.f32 %v458_v22, %v207_v32  ;;  %v295_v37 = vadd.f32 %v474_v23, %v239_v33  ;;  %v305_v40 = vmax.f32 %v289_v34, 0.0 }
  0xf4   :  { %v313_v41 = vmax.f32 %v297_v35, 0.0 }
  0xf5   :  { %v303_v44 = vmax.f32 %v287_v36, 0.0  ;;  %v311_v45 = vmax.f32 %v295_v37, 0.0  ;;  %v497_v46 = vpack.c.bf16 %v305_v40, %v304_v38 }
  0xf6   :  { %v517_v47 = vpack.c.bf16 %v313_v41, %v312_v39 }
  0xf7   :  { %v492_v48 = vpack.c.bf16 %v303_v44, %v302_v42  ;;  %v512_v49 = vpack.c.bf16 %v311_v45, %v310_v43  ;;  %528 = vst [vmem:[%s775_s4 + $0x18] sm:$0xff] %v497_v46  }
  0xf8   :  { %532 = vst [vmem:[%s775_s4 + $0x38] sm:$0xff] %v517_v47  }
  0xf9   :  { %527 = vst [vmem:[%s775_s4 + $0x10] sm:$0xff] %v492_v48   ;;  %531 = vst [vmem:[%s775_s4 + $0x30] sm:$0xff] %v512_v49  }

// kernel: _lambda_.21
= control target key start
LH: loop header
LB: loop body
LE: loop exit
PB: predicated region body
PF: predicated region fallthrough
CT: control target
= control target key end

     0   :  { %s618_s1 = inlined_call_operand.vmem [shape: bf16[128,128], index: 1, kind: input, shape index: {}]   ;;  %s619_s0 = inlined_call_operand.vmem [shape: bf16[128,128], index: 0, kind: input, shape index: {}]   ;;  %s620_s2 = inlined_call_operand.vmem [shape: f32[1,128], index: 2, kind: input, shape index: {}]   ;;  %s621_s3 = inlined_call_operand.vmem [shape: bf16[128,128], index: 3, kind: output, shape index: {}]  }
   0x1   :  { %v507_v0 = vld [vmem:[%s618_s1 + $0x38] sm:$0xff]   ;;  %v508_v1 = vld [vmem:[%s618_s1 + $0x30] sm:$0xff]   ;;  %v509_v2 = vld [vmem:[%s618_s1 + $0x28] sm:$0xff]  }
   0x2   :  { %459 = vmatprep.subr.bf16.mxu0 %v507_v0  ;;  %491 = vmatprep.subr.bf16.mxu1 %v507_v0  ;;  %v510_v3 = vld [vmem:[%s618_s1 + $0x20] sm:$0xff]   ;;  %v511_v6 = vld [vmem:[%s618_s1 + $0x18] sm:$0xff]   ;;  %v512_v7 = vld [vmem:[%s618_s1 + $0x10] sm:$0xff]  }
   0x3   :  { %460 = vmatpush3.bf16.msra.mxu0 %v507_v0  ;;  %499 = vmatpush3.bf16.msra.mxu1 %v507_v0  ;;  %v515_v4 = vld [vmem:[%s619_s0] sm:$0xff]   ;;  %v513_v8 = vld [vmem:[%s618_s1 + $0x8] sm:$0xff]   ;;  %v519_v12 = vld [vmem:[%s619_s0 + $0x10] sm:$0xff]  }
   0x4   :  { %461 = vmatprep.subr.bf16.mxu0 %v508_v1  ;;  %492 = vmatprep.subr.bf16.mxu1 %v508_v1  ;;  %v516_v5 = vld [vmem:[%s619_s0 + $0x20] sm:$0xff]   ;;  %v517_v10 = vld [vmem:[%s619_s0 + $0x8] sm:$0xff]   ;;  %v520_v13 = vld [vmem:[%s619_s0 + $0x30] sm:$0xff]  }
   0x5   :  { %475 = vmatprep.mubr.bf16.mxu0 %v515_v4  ;;  %483 = vmatprep.mubr.bf16.mxu1 %v516_v5  ;;  %v514_v9 = vld [vmem:[%s618_s1] sm:$0xff]   ;;  %v518_v11 = vld [vmem:[%s619_s0 + $0x28] sm:$0xff]   ;;  %v521_v14 = vld [vmem:[%s619_s0 + $0x18] sm:$0xff]  }
   0x6   :  { %v522_v15 = vld [vmem:[%s619_s0 + $0x38] sm:$0xff]   ;;  %v347_v16 = vld [vmem:[%s620_s2] ss:$0 sm:$0xff] }
   0x7   :  { %462 = vmatpush3.bf16.msra.mxu0 %v508_v1  ;;  %500 = vmatpush3.bf16.msra.mxu1 %v508_v1 }
   0x8   :  { %463 = vmatprep.subr.bf16.mxu0 %v509_v2  ;;  %493 = vmatprep.subr.bf16.mxu1 %v509_v2 }
   0xb   :  { %464 = vmatpush3.bf16.msra.mxu0 %v509_v2  ;;  %501 = vmatpush3.bf16.msra.mxu1 %v509_v2 }
   0xc   :  { %465 = vmatprep.subr.bf16.mxu0 %v510_v3  ;;  %494 = vmatprep.subr.bf16.mxu1 %v510_v3 }
   0xf   :  { %466 = vmatpush3.bf16.msra.mxu0 %v510_v3  ;;  %502 = vmatpush3.bf16.msra.mxu1 %v510_v3 }
  0x10   :  { %467 = vmatprep.subr.bf16.mxu0 %v511_v6  ;;  %495 = vmatprep.subr.bf16.mxu1 %v511_v6 }
  0x13   :  { %468 = vmatpush3.bf16.msra.mxu0 %v511_v6  ;;  %503 = vmatpush3.bf16.msra.mxu1 %v511_v6 }
  0x14   :  { %469 = vmatprep.subr.bf16.mxu0 %v512_v7  ;;  %496 = vmatprep.subr.bf16.mxu1 %v512_v7 }
  0x17   :  { %470 = vmatpush3.bf16.msra.mxu0 %v512_v7  ;;  %504 = vmatpush3.bf16.msra.mxu1 %v512_v7 }
  0x18   :  { %471 = vmatprep.subr.bf16.mxu0 %v513_v8  ;;  %497 = vmatprep.subr.bf16.mxu1 %v513_v8 }
  0x1b   :  { %472 = vmatpush3.bf16.msra.mxu0 %v513_v8  ;;  %505 = vmatpush3.bf16.msra.mxu1 %v513_v8 }
  0x1c   :  { %473 = vmatprep.subr.bf16.mxu0 %v514_v9  ;;  %498 = vmatprep.subr.bf16.mxu1 %v514_v9 }
  0x1f   :  { %474 = vmatpush3.bf16.msra.mxu0 %v514_v9  ;;  %506 = vmatpush3.bf16.msra.mxu1 %v514_v9 }
  0x22   :  { %476 = vmatmul.mubr.bf16.vlgmr.msra.gmra.mxu0 %v517_v10  ;;  %484 = vmatmul.mubr.bf16.vlgmr.msra.gmra.mxu1 %v518_v11 }
  0x23   :  { %479 = vmatprep.mubr.bf16.mxu0 %v519_v12  ;;  %487 = vmatprep.mubr.bf16.mxu1 %v520_v13 }
  0x2a   :  { %480 = vmatmul.mubr.bf16.gmra.mxu0 %v521_v14  ;;  %488 = vmatmul.mubr.bf16.gmra.mxu1 %v522_v15 }
  0xe2   :  { %v477_v17 = vpop.f32.mrf.mxu0  ;;  %v485_v18 = vpop.f32.mrf.mxu1 }
  0xe3   :  { %v193_v19 = vadd.f32 %v477_v17, %v347_v16  ;;  %v225_v20 = vadd.f32 %v485_v18, %v347_v16 }
  0xe4   :  { %v184_v21 = vpop.f32.mrf.mxu0  ;;  %v216_v22 = vpop.f32.mrf.mxu1 }
  0xe5   :  { %v185_v23 = vadd.f32 %v347_v16, %v184_v21  ;;  %v217_v24 = vadd.f32 %v347_v16, %v216_v22  ;;  %v249_v29 = vmax.f32 %v193_v19, 0.0  ;;  %v257_v30 = vmax.f32 %v225_v20, 0.0 }
  0xe6   :  { %v478_v25 = vpop.f32.mrf.mxu0  ;;  %v486_v26 = vpop.f32.mrf.mxu1 }
  0xe7   :  { %v196_v27 = vadd.f32 %v478_v25, %v347_v16  ;;  %v228_v28 = vadd.f32 %v486_v26, %v347_v16  ;;  %v247_v37 = vmax.f32 %v185_v23, 0.0  ;;  %v255_v38 = vmax.f32 %v217_v24, 0.0 }
  0xe8   :  { %v187_v31 = vpop.f32.mrf.mxu0  ;;  %v219_v32 = vpop.f32.mrf.mxu1 }
  0xe9   :  { %v250_v33 = vmax.f32 %v196_v27, 0.0  ;;  %v258_v34 = vmax.f32 %v228_v28, 0.0  ;;  %v188_v35 = vadd.f32 %v347_v16, %v187_v31  ;;  %v220_v36 = vadd.f32 %v347_v16, %v219_v32 }
  0xea   :  { %v481_v39 = vpop.f32.mrf.mxu0  ;;  %v489_v40 = vpop.f32.mrf.mxu1 }
  0xeb   :  { %v404_v41 = vpack.c.bf16 %v250_v33, %v249_v29  ;;  %v424_v42 = vpack.c.bf16 %v258_v34, %v257_v30  ;;  %v248_v43 = vmax.f32 %v188_v35, 0.0  ;;  %v256_v44 = vmax.f32 %v220_v36, 0.0 }
  0xec   :  { %v209_v45 = vadd.f32 %v481_v39, %v347_v16  ;;  %v241_v46 = vadd.f32 %v489_v40, %v347_v16  ;;  %v200_v47 = vpop.f32.mrf.mxu0  ;;  %v232_v48 = vpop.f32.mrf.mxu1 }
  0xed   :  { %436 = vst [vmem:[%s621_s3 + $0x8] sm:$0xff] %v404_v41   ;;  %440 = vst [vmem:[%s621_s3 + $0x28] sm:$0xff] %v424_v42   ;;  %v399_v49 = vpack.c.bf16 %v248_v43, %v247_v37  ;;  %v419_v50 = vpack.c.bf16 %v256_v44, %v255_v38  ;;  %v201_v51 = vadd.f32 %v347_v16, %v200_v47 }
  0xee   :  { %v233_v52 = vadd.f32 %v347_v16, %v232_v48  ;;  %v482_v53 = vpop.f32.mrf.mxu0  ;;  %v490_v54 = vpop.f32.mrf.mxu1  ;;  %v253_v57 = vmax.f32 %v209_v45, 0.0  ;;  %v261_v58 = vmax.f32 %v241_v46, 0.0 }
  0xef   :  { %400 = vst [vmem:[%s621_s3] sm:$0xff] %v399_v49   ;;  %439 = vst [vmem:[%s621_s3 + $0x20] sm:$0xff] %v419_v50   ;;  %v212_v55 = vadd.f32 %v482_v53, %v347_v16  ;;  %v244_v56 = vadd.f32 %v490_v54, %v347_v16  ;;  %v251_v1 = vmax.f32 %v201_v51, 0.0 }
  0xf0   :  { %v203_v59 = vpop.f32.mrf.mxu0  ;;  %v235_v60 = vpop.f32.mrf.mxu1  ;;  %v259_v2 = vmax.f32 %v233_v52, 0.0 }
  0xf1   :  { %v254_v61 = vmax.f32 %v212_v55, 0.0  ;;  %v262_v62 = vmax.f32 %v244_v56, 0.0  ;;  %v204_v63 = vadd.f32 %v347_v16, %v203_v59  ;;  %v236_v0 = vadd.f32 %v347_v16, %v235_v60 }
  0xf3   :  { %v414_v3 = vpack.c.bf16 %v254_v61, %v253_v57  ;;  %v434_v4 = vpack.c.bf16 %v262_v62, %v261_v58  ;;  %v252_v5 = vmax.f32 %v204_v63, 0.0  ;;  %v260_v6 = vmax.f32 %v236_v0, 0.0 }
  0xf5   :  { %438 = vst [vmem:[%s621_s3 + $0x18] sm:$0xff] %v414_v3   ;;  %442 = vst [vmem:[%s621_s3 + $0x38] sm:$0xff] %v434_v4   ;;  %v409_v7 = vpack.c.bf16 %v252_v5, %v251_v1  ;;  %v429_v8 = vpack.c.bf16 %v260_v6, %v259_v2 }
  0xf7   :  { %437 = vst [vmem:[%s621_s3 + $0x10] sm:$0xff] %v409_v7   ;;  %441 = vst [vmem:[%s621_s3 + $0x30] sm:$0xff] %v429_v8  }

// kernel: _lambda_.22
= control target key start
LH: loop header
LB: loop body
LE: loop exit
PB: predicated region body
PF: predicated region fallthrough
CT: control target
= control target key end

     0   :  { %s639_s1 = inlined_call_operand.vmem [shape: bf16[384,128], index: 1, kind: input, shape index: {}]   ;;  %s640_s0 = inlined_call_operand.vmem [shape: bf16[32,384], index: 0, kind: input, shape index: {}]   ;;  %s641_s2 = inlined_call_operand.vmem [shape: f32[1,128], index: 2, kind: input, shape index: {}]   ;;  %s642_s3 = inlined_call_operand.vmem [shape: bf16[32,128], index: 3, kind: output, shape index: {}]  }
   0x1   :  { %v488_v0 = vld [vmem:[%s639_s1 + $0x78] sm:$0xff]   ;;  %v490_v2 = vld [vmem:[%s639_s1 + $0x70] sm:$0xff]   ;;  %v493_v5 = vld [vmem:[%s639_s1 + $0x68] sm:$0xff]  }
   0x2   :  { %v489_v1 = vld [vmem:[%s639_s1 + $0x38] sm:$0xff]   ;;  %430 = vmatprep.subr.bf16.mxu0 %v488_v0  ;;  %v492_v4 = vld [vmem:[%s639_s1 + $0x30] sm:$0xff]   ;;  %v495_v7 = vld [vmem:[%s639_s1 + $0x28] sm:$0xff]  }
   0x3   :  { %431 = vmatpush3.bf16.msra.mxu0 %v489_v1  ;;  %v491_v3 = vld [vmem:[%s639_s1 + $0xb8] sm:$0xff]   ;;  %v494_v6 = vld [vmem:[%s639_s1 + $0xb0] sm:$0xff]   ;;  %v496_v8 = vld [vmem:[%s639_s1 + $0x60] sm:$0xff]  }
   0x4   :  { %432 = vmatprep.subr.bf16.mxu0 %v490_v2  ;;  %468 = vmatprep.subr.bf16.mxu1 %v491_v3  ;;  %v497_v9 = vld [vmem:[%s639_s1 + $0xa8] sm:$0xff]   ;;  %v498_v10 = vld [vmem:[%s639_s1 + $0x20] sm:$0xff]   ;;  %v499_v11 = vld [vmem:[%s639_s1 + $0x58] sm:$0xff]  }
   0x5   :  { %469 = vmatpush3.bf16.msra.mxu1 %v491_v3  ;;  %v500_v12 = vld [vmem:[%s639_s1 + $0xa0] sm:$0xff]   ;;  %v501_v13 = vld [vmem:[%s639_s1 + $0x18] sm:$0xff]   ;;  %v502_v15 = vld [vmem:[%s639_s1 + $0x50] sm:$0xff]  }
   0x6   :  { %470 = vmatprep.subr.bf16.mxu1 %v494_v6  ;;  %v503_v14 = vld [vmem:[%s639_s1 + $0x98] sm:$0xff]   ;;  %v504_v16 = vld [vmem:[%s639_s1 + $0x10] sm:$0xff]   ;;  %v505_v18 = vld [vmem:[%s639_s1 + $0x48] sm:$0xff]  }
   0x7   :  { %433 = vmatpush3.bf16.msra.mxu0 %v492_v4  ;;  %v506_v17 = vld [vmem:[%s639_s1 + $0x90] sm:$0xff]   ;;  %v507_v19 = vld [vmem:[%s639_s1 + $0x8] sm:$0xff]   ;;  %v508_v20 = vld [vmem:[%s639_s1 + $0x40] sm:$0xff]  }
   0x8   :  { %434 = vmatprep.subr.bf16.mxu0 %v493_v5  ;;  %v509_v21 = vld [vmem:[%s639_s1 + $0x88] sm:$0xff]   ;;  %v513_v22 = vld [vmem:[%s640_s0 + $0x4] ss:$12 sps:$4 sm:$0xff]   ;;  %v380_v32 = vld [vmem:[%s641_s2] ss:$0 sm:$0xff] }
   0x9   :  { %471 = vmatpush3.bf16.msra.mxu1 %v494_v6  ;;  %v510_v23 = vld [vmem:[%s639_s1] sm:$0xff]   ;;  %286 = vmatprep.mubr.bf16.mxu0 %v513_v22  ;;  %v515_v24 = vld [vmem:[%s640_s0 + $0x8] ss:$12 sps:$4 sm:$0xff]  }
   0xa   :  { %472 = vmatprep.subr.bf16.mxu1 %v497_v9  ;;  %v514_v25 = vld [vmem:[%s639_s1 + $0x80] sm:$0xff]   ;;  %484 = vmatprep.mubr.bf16.mxu1 %v515_v24  ;;  %v517_v27 = vld [vmem:[%s640_s0 + $0x1c] ss:$12 sps:$4 sm:$0xff]  }
   0xb   :  { %435 = vmatpush3.bf16.msra.mxu0 %v495_v7  ;;  %v511_v26 = vld [vmem:[%s640_s0] ss:$12 sps:$4 sm:$0xff]   ;;  %v519_v29 = vld [vmem:[%s640_s0 + $0x18] ss:$12 sps:$4 sm:$0xff]  }
   0xc   :  { %436 = vmatprep.subr.bf16.mxu0 %v496_v8  ;;  %v516_v28 = vld [vmem:[%s640_s0 + $0x20] ss:$12 sps:$4 sm:$0xff]  }
   0xd   :  { %473 = vmatpush3.bf16.msra.mxu1 %v497_v9 }
   0xe   :  { %474 = vmatprep.subr.bf16.mxu1 %v500_v12 }
   0xf   :  { %437 = vmatpush3.bf16.msra.mxu0 %v498_v10 }
  0x10   :  { %438 = vmatprep.subr.bf16.mxu0 %v499_v11 }
  0x11   :  { %475 = vmatpush3.bf16.msra.mxu1 %v500_v12 }
  0x12   :  { %476 = vmatprep.subr.bf16.mxu1 %v503_v14 }
  0x13   :  { %439 = vmatpush3.bf16.msra.mxu0 %v501_v13 }
  0x14   :  { %440 = vmatprep.subr.bf16.mxu0 %v502_v15 }
  0x15   :  { %477 = vmatpush3.bf16.msra.mxu1 %v503_v14 }
  0x16   :  { %478 = vmatprep.subr.bf16.mxu1 %v506_v17 }
  0x17   :  { %441 = vmatpush3.bf16.msra.mxu0 %v504_v16 }
  0x18   :  { %442 = vmatprep.subr.bf16.mxu0 %v505_v18 }
  0x19   :  { %479 = vmatpush3.bf16.msra.mxu1 %v506_v17 }
  0x1a   :  { %480 = vmatprep.subr.bf16.mxu1 %v509_v21 }
  0x1b   :  { %443 = vmatpush3.bf16.msra.mxu0 %v507_v19 }
  0x1c   :  { %444 = vmatprep.subr.bf16.mxu0 %v508_v20 }
  0x1d   :  { %481 = vmatpush3.bf16.msra.mxu1 %v509_v21 }
  0x1e   :  { %482 = vmatprep.subr.bf16.mxu1 %v514_v25 }
  0x1f   :  { %445 = vmatpush3.bf16.msra.mxu0 %v510_v23 }
  0x21   :  { %483 = vmatpush3.bf16.msra.mxu1 %v514_v25 }
  0x22   :  { %287 = vmatmul.mubr.bf16.vlgmr.msra.gmra.mxu0 %v511_v26 }
  0x23   :  { %294 = vmatprep.mubr.bf16.mxu0 %v517_v27 }
  0x24   :  { %485 = vmatmul.mubr.bf16.vlgmr.msra.gmra.mxu1 %v516_v28 }
  0x2a   :  { %295 = vmatmul.mubr.bf16.gmra.mxu0 %v519_v29 }
  0xe2   :  { %v446_v30 = vpop.f32.mrf.mxu0 }
  0xe4   :  { %v447_v31 = vpop.f32.mrf.mxu0  ;;  %v486_v34 = vpop.f32.mrf.mxu1 }
  0xe5   :  { %v448_v33 = vadd.f32 %v447_v31, %v446_v30 }
  0xe6   :  { %v449_v35 = vpop.f32.mrf.mxu0  ;;  %v337_v37 = vpop.f32.mrf.mxu1 }
  0xe7   :  { %v289_v36 = vadd.f32 %v448_v33, %v380_v32 }
  0xe8   :  { %v450_v38 = vpop.f32.mrf.mxu0  ;;  %v487_v40 = vpop.f32.mrf.mxu1 }
  0xe9   :  { %v451_v39 = vadd.f32 %v450_v38, %v449_v35  ;;  %v338_v42 = vadd.f32 %v337_v37, %v289_v36 }
  0xea   :  { %v452_v41 = vpop.f32.mrf.mxu0  ;;  %v340_v44 = vpop.f32.mrf.mxu1 }
  0xeb   :  { %v292_v43 = vadd.f32 %v451_v39, %v380_v32  ;;  %v352_v49 = vmax.f32 %v338_v42, 0.0 }
  0xec   :  { %v453_v45 = vpop.f32.mrf.mxu0 }
  0xed   :  { %v454_v46 = vadd.f32 %v453_v45, %v452_v41  ;;  %v341_v47 = vadd.f32 %v340_v44, %v292_v43 }
  0xee   :  { %v455_v48 = vpop.f32.mrf.mxu0 }
  0xef   :  { %v297_v50 = vadd.f32 %v454_v46, %v380_v32  ;;  %v353_v51 = vmax.f32 %v341_v47, 0.0 }
  0xf0   :  { %v456_v52 = vpop.f32.mrf.mxu0 }
  0xf1   :  { %v422_v53 = vpack.c.bf16 %v353_v51, %v352_v49  ;;  %v457_v54 = vadd.f32 %v456_v52, %v455_v48  ;;  %v346_v55 = vadd.f32 %v486_v34, %v297_v50 }
  0xf3   :  { %423 = vst [vmem:[%s642_s3] sm:$0xff] %v422_v53   ;;  %v300_v56 = vadd.f32 %v457_v54, %v380_v32  ;;  %v354_v58 = vmax.f32 %v346_v55, 0.0 }
  0xf5   :  { %v349_v57 = vadd.f32 %v487_v40, %v300_v56 }
  0xf7   :  { %v355_v59 = vmax.f32 %v349_v57, 0.0 }
  0xf9   :  { %v427_v60 = vpack.c.bf16 %v355_v59, %v354_v58 }
  0xfb   :  { %429 = vst [vmem:[%s642_s3 + $0x8] sm:$0xff] %v427_v60  }

// kernel: _lambda_.20
= control target key start
LH: loop header
LB: loop body
LE: loop exit
PB: predicated region body
PF: predicated region fallthrough
CT: control target
= control target key end

     0   :  { %s304_s1 = inlined_call_operand.vmem [shape: bf16[128,128], index: 1, kind: input, shape index: {}]   ;;  %s305_s0 = inlined_call_operand.vmem [shape: bf16[32,128], index: 0, kind: input, shape index: {}]   ;;  %s306_s2 = inlined_call_operand.vmem [shape: f32[1,128], index: 2, kind: input, shape index: {}]   ;;  %s307_s3 = inlined_call_operand.vmem [shape: bf16[32,128], index: 3, kind: output, shape index: {}]  }
   0x1   :  { %v235_v0 = vld [vmem:[%s304_s1 + $0x38] sm:$0xff]   ;;  %v236_v1 = vld [vmem:[%s304_s1 + $0x30] sm:$0xff]   ;;  %v237_v2 = vld [vmem:[%s304_s1 + $0x28] sm:$0xff]  }
   0x2   :  { %215 = vmatprep.subr.bf16.mxu0 %v235_v0  ;;  %v238_v3 = vld [vmem:[%s304_s1 + $0x20] sm:$0xff]   ;;  %v239_v5 = vld [vmem:[%s304_s1 + $0x18] sm:$0xff]   ;;  %v240_v6 = vld [vmem:[%s304_s1 + $0x10] sm:$0xff]  }
   0x3   :  { %216 = vmatpush3.bf16.msra.mxu0 %v235_v0  ;;  %v243_v4 = vld [vmem:[%s305_s0] sm:$0xff]   ;;  %v241_v7 = vld [vmem:[%s304_s1 + $0x8] sm:$0xff]  }
   0x4   :  { %217 = vmatprep.subr.bf16.mxu0 %v236_v1  ;;  %231 = vmatprep.mubr.bf16.mxu0 %v243_v4  ;;  %v242_v8 = vld [vmem:[%s304_s1] sm:$0xff]   ;;  %v244_v9 = vld [vmem:[%s305_s0 + $0x8] sm:$0xff]  }
   0x5   :  { %v175_v11 = vld [vmem:[%s306_s2] ss:$0 sm:$0xff] }
   0x7   :  { %218 = vmatpush3.bf16.msra.mxu0 %v236_v1 }
   0x8   :  { %219 = vmatprep.subr.bf16.mxu0 %v237_v2 }
   0xb   :  { %220 = vmatpush3.bf16.msra.mxu0 %v237_v2 }
   0xc   :  { %221 = vmatprep.subr.bf16.mxu0 %v238_v3 }
   0xf   :  { %222 = vmatpush3.bf16.msra.mxu0 %v238_v3 }
  0x10   :  { %223 = vmatprep.subr.bf16.mxu0 %v239_v5 }
  0x13   :  { %224 = vmatpush3.bf16.msra.mxu0 %v239_v5 }
  0x14   :  { %225 = vmatprep.subr.bf16.mxu0 %v240_v6 }
  0x17   :  { %226 = vmatpush3.bf16.msra.mxu0 %v240_v6 }
  0x18   :  { %227 = vmatprep.subr.bf16.mxu0 %v241_v7 }
  0x1b   :  { %228 = vmatpush3.bf16.msra.mxu0 %v241_v7 }
  0x1c   :  { %229 = vmatprep.subr.bf16.mxu0 %v242_v8 }
  0x1f   :  { %230 = vmatpush3.bf16.msra.mxu0 %v242_v8 }
  0x22   :  { %232 = vmatmul.mubr.bf16.vlgmr.msra.gmra.mxu0 %v244_v9 }
  0xe2   :  { %v233_v10 = vpop.f32.mrf.mxu0 }
  0xe3   :  { %v145_v14 = vadd.f32 %v233_v10, %v175_v11 }
  0xe4   :  { %v136_v12 = vpop.f32.mrf.mxu0 }
  0xe5   :  { %v137_v17 = vadd.f32 %v175_v11, %v136_v12 }
  0xe6   :  { %v234_v13 = vpop.f32.mrf.mxu0 }
  0xe7   :  { %v148_v15 = vadd.f32 %v234_v13, %v175_v11 }
  0xe8   :  { %v139_v16 = vpop.f32.mrf.mxu0 }
  0xe9   :  { %v202_v18 = vpack.c.bf16 %v148_v15, %v145_v14  ;;  %v140_v19 = vadd.f32 %v175_v11, %v139_v16 }
  0xeb   :  { %204 = vst [vmem:[%s307_s3 + $0x8] sm:$0xff] %v202_v18   ;;  %v197_v20 = vpack.c.bf16 %v140_v19, %v137_v17 }
  0xed   :  { %198 = vst [vmem:[%s307_s3] sm:$0xff] %v197_v20  }

// kernel: _lambda_.24
= control target key start
LH: loop header
LB: loop body
LE: loop exit
PB: predicated region body
PF: predicated region fallthrough
CT: control target
= control target key end

     0   :  { %v500_v1 = vmov 0   ;;  %v53_v27 = vlaneseq  ;;  %s626_s1 = inlined_call_operand.vmem [shape: bf16[128,384], index: 1, kind: input, shape index: {}]   ;;  %s627_s0 = inlined_call_operand.vmem [shape: bf16[32,128], index: 0, kind: input, shape index: {}]   ;;  %s628_s2 = inlined_call_operand.vmem [shape: f32[1,384], index: 2, kind: input, shape index: {}]   ;;  %s629_s3 = inlined_call_operand.vmem [shape: bf16[32,384], index: 3, kind: output, shape index: {}]  }
   0x1   :  { %v466_v0 = vld [vmem:[%s626_s1 + $0xac] ss:$12 sps:$4 sm:$0xff]   ;;  %240 = vmatprep.mubr.bf16.mxu0 %v500_v1  ;;  %v468_v2 = vld [vmem:[%s626_s1 + $0xa8] ss:$12 sps:$4 sm:$0xff]   ;;  %v469_v3 = vld [vmem:[%s626_s1 + $0xb0] ss:$12 sps:$4 sm:$0xff]  }
   0x2   :  { %208 = vmatprep.subr.bf16.mxu0 %v466_v0  ;;  %v470_v4 = vld [vmem:[%s626_s1 + $0x94] ss:$12 sps:$4 sm:$0xff]   ;;  %v472_v5 = vld [vmem:[%s626_s1 + $0x90] ss:$12 sps:$4 sm:$0xff]   ;;  %445 = vmatprep.subr.bf16.mxu1 %v469_v3  ;;  %v473_v6 = vld [vmem:[%s626_s1 + $0x98] ss:$12 sps:$4 sm:$0xff]  }
   0x3   :  { %209 = vmatpush1.bf16.msra.mxu0 %v468_v2  ;;  %446 = vmatpush3.bf16.msra.mxu1 %v469_v3  ;;  %v474_v7 = vld [vmem:[%s626_s1 + $0x7c] ss:$12 sps:$4 sm:$0xff]   ;;  %v477_v8 = vld [vmem:[%s626_s1 + $0x80] ss:$12 sps:$4 sm:$0xff]   ;;  %v476_v9 = vld [vmem:[%s626_s1 + $0x78] ss:$12 sps:$4 sm:$0xff]  }
   0x4   :  { %210 = vmatprep.subr.bf16.mxu0 %v470_v4  ;;  %447 = vmatprep.subr.bf16.mxu1 %v473_v6  ;;  %v478_v10 = vld [vmem:[%s626_s1 + $0x64] ss:$12 sps:$4 sm:$0xff]   ;;  %v481_v11 = vld [vmem:[%s626_s1 + $0x68] ss:$12 sps:$4 sm:$0xff]   ;;  %v480_v12 = vld [vmem:[%s626_s1 + $0x60] ss:$12 sps:$4 sm:$0xff]  }
   0x5   :  { %v482_v13 = vld [vmem:[%s626_s1 + $0x4c] ss:$12 sps:$4 sm:$0xff]   ;;  %v485_v14 = vld [vmem:[%s626_s1 + $0x50] ss:$12 sps:$4 sm:$0xff]   ;;  %v484_v15 = vld [vmem:[%s626_s1 + $0x48] ss:$12 sps:$4 sm:$0xff]  }
   0x6   :  { %v486_v16 = vld [vmem:[%s626_s1 + $0x34] ss:$12 sps:$4 sm:$0xff]   ;;  %v488_v17 = vld [vmem:[%s626_s1 + $0x30] ss:$12 sps:$4 sm:$0xff]   ;;  %v489_v18 = vld [vmem:[%s626_s1 + $0x38] ss:$12 sps:$4 sm:$0xff]  }
   0x7   :  { %211 = vmatpush1.bf16.msra.mxu0 %v472_v5  ;;  %448 = vmatpush3.bf16.msra.mxu1 %v473_v6  ;;  %v498_v19 = vld [vmem:[%s627_s0] sm:$0xff]   ;;  %v490_v20 = vld [vmem:[%s626_s1 + $0x1c] ss:$12 sps:$4 sm:$0xff]   ;;  %v54_v28 = vshrl.u32 %v53_v27, 7 }
   0x8   :  { %212 = vmatprep.subr.bf16.mxu0 %v474_v7  ;;  %449 = vmatprep.subr.bf16.mxu1 %v477_v8  ;;  %v493_v21 = vld [vmem:[%s626_s1 + $0x20] ss:$12 sps:$4 sm:$0xff]   ;;  %v492_v22 = vld [vmem:[%s626_s1 + $0x18] ss:$12 sps:$4 sm:$0xff]   ;;  %v497_v24 = vld [vmem:[%s626_s1 + $0x8] ss:$12 sps:$4 sm:$0xff]  }
   0x9   :  { %461 = vmatprep.mubr.bf16.mxu1 %v498_v19  ;;  %v494_v23 = vld [vmem:[%s626_s1 + $0x4] ss:$12 sps:$4 sm:$0xff]   ;;  %v496_v25 = vld [vmem:[%s626_s1] ss:$12 sps:$4 sm:$0xff]   ;;  %v55_v29 = vsub.s32 0, %v54_v28  ;;  %v59_v31 = vsub.s32 1, %v54_v28 }
   0xa   :  { %v499_v26 = vld [vmem:[%s627_s0 + $0x8] sm:$0xff]   ;;  %v51_v30 = vld [vmem:[%s628_s2] sm:$0x7]  ;;  %v63_v32 = vsub.s32 2, %v54_v28 }
   0xb   :  { %213 = vmatpush1.bf16.msra.mxu0 %v476_v9  ;;  %450 = vmatpush3.bf16.msra.mxu1 %v477_v8  ;;  %v56_v33 = vrot.slane %v51_v30, %v55_v29  ;;  %v60_v34 = vrot.slane %v51_v30, %v59_v31 }
   0xc   :  { %214 = vmatprep.subr.bf16.mxu0 %v478_v10  ;;  %451 = vmatprep.subr.bf16.mxu1 %v481_v11  ;;  %v64_v35 = vrot.slane %v51_v30, %v63_v32 }
   0xf   :  { %215 = vmatpush1.bf16.msra.mxu0 %v480_v12  ;;  %452 = vmatpush3.bf16.msra.mxu1 %v481_v11 }
  0x10   :  { %216 = vmatprep.subr.bf16.mxu0 %v482_v13  ;;  %453 = vmatprep.subr.bf16.mxu1 %v485_v14 }
  0x13   :  { %217 = vmatpush1.bf16.msra.mxu0 %v484_v15  ;;  %454 = vmatpush3.bf16.msra.mxu1 %v485_v14 }
  0x14   :  { %218 = vmatprep.subr.bf16.mxu0 %v486_v16  ;;  %455 = vmatprep.subr.bf16.mxu1 %v489_v18 }
  0x17   :  { %219 = vmatpush1.bf16.msra.mxu0 %v488_v17  ;;  %456 = vmatpush3.bf16.msra.mxu1 %v489_v18 }
  0x18   :  { %220 = vmatprep.subr.bf16.mxu0 %v490_v20  ;;  %457 = vmatprep.subr.bf16.mxu1 %v493_v21 }
  0x1b   :  { %221 = vmatpush1.bf16.msra.mxu0 %v492_v22  ;;  %458 = vmatpush3.bf16.msra.mxu1 %v493_v21 }
  0x1c   :  { %222 = vmatprep.subr.bf16.mxu0 %v494_v23  ;;  %459 = vmatprep.subr.bf16.mxu1 %v497_v24 }
  0x1f   :  { %223 = vmatpush1.bf16.msra.mxu0 %v496_v25  ;;  %460 = vmatpush3.bf16.msra.mxu1 %v497_v24 }
  0x22   :  { %241 = vmatmul.mubr.bf16.vlgmr.msra.gmra.mxu0 %v498_v19  ;;  %462 = vmatmul.mubr.bf16.vlgmr.msra.gmra.mxu1 %v499_v26 }
  0x23   :  { %250 = vmatprep.mubr.bf16.mxu0 %v500_v1 }
  0x2a   :  { %251 = vmatmul.mubr.bf16.gmra.mxu0 %v499_v26 }
  0xe2   :  { %v242_v36 = vpop.f32.mrf.mxu0  ;;  %v463_v39 = vpop.f32.mrf.mxu1 }
  0xe3   :  { %v243_v37 = vadd.f32 %v242_v36, %v56_v33  ;;  %v304_v42 = vadd.f32 %v463_v39, %v64_v35 }
  0xe4   :  { %v244_v38 = vpop.f32.mrf.mxu0  ;;  %v295_v44 = vpop.f32.mrf.mxu1 }
  0xe5   :  { %v317_v40 = vmax.f32 %v243_v37, 0.0  ;;  %v245_v41 = vadd.f32 %v244_v38, %v60_v34  ;;  %v432_v46 = vpack.c.bf16 %v304_v42, %v304_v42  ;;  %v296_v48 = vadd.f32 %v295_v44, %v64_v35 }
  0xe6   :  { %v246_v43 = vpop.f32.mrf.mxu0  ;;  %v464_v50 = vpop.f32.mrf.mxu1 }
  0xe7   :  { %v427_v45 = vpack.c.bf16 %v245_v41, %v317_v40  ;;  %v247_v47 = vadd.f32 %v246_v43, %v56_v33  ;;  %386 = vst [vmem:[%s629_s3 + $0x20] sm:$0xf] %v432_v46  ;;  %v428_v52 = vpack.c.bf16 %v296_v48, %v296_v48  ;;  %v307_v54 = vadd.f32 %v464_v50, %v64_v35 }
  0xe8   :  { %v248_v49 = vpop.f32.mrf.mxu0  ;;  %v298_v56 = vpop.f32.mrf.mxu1 }
  0xe9   :  { %381 = vst [vmem:[%s629_s3] sm:$0xff] %v427_v45  ;;  %v320_v51 = vmax.f32 %v247_v47, 0.0  ;;  %v249_v53 = vadd.f32 %v248_v49, %v60_v34  ;;  %382 = vst [vmem:[%s629_s3 + $0x8] sm:$0xf] %v428_v52  ;;  %v434_v58 = vpack.c.bf16 %v307_v54, %v307_v54  ;;  %v299_v60 = vadd.f32 %v298_v56, %v64_v35 }
  0xea   :  { %v252_v55 = vpop.f32.mrf.mxu0 }
  0xeb   :  { %v429_v57 = vpack.c.bf16 %v249_v53, %v320_v51  ;;  %v253_v59 = vadd.f32 %v252_v55, %v56_v33  ;;  %388 = vst [vmem:[%s629_s3 + $0x2c] sm:$0xf] %v434_v58  ;;  %v430_v63 = vpack.c.bf16 %v299_v60, %v299_v60 }
  0xec   :  { %v254_v61 = vpop.f32.mrf.mxu0 }
  0xed   :  { %383 = vst [vmem:[%s629_s3 + $0xc] sm:$0xff] %v429_v57  ;;  %v323_v62 = vmax.f32 %v253_v59, 0.0  ;;  %v255_v0 = vadd.f32 %v254_v61, %v60_v34  ;;  %384 = vst [vmem:[%s629_s3 + $0x14] sm:$0xf] %v430_v63 }
  0xee   :  { %v256_v1 = vpop.f32.mrf.mxu0 }
  0xef   :  { %v431_v2 = vpack.c.bf16 %v255_v0, %v323_v62  ;;  %v257_v3 = vadd.f32 %v256_v1, %v56_v33 }
  0xf0   :  { %v258_v4 = vpop.f32.mrf.mxu0 }
  0xf1   :  { %385 = vst [vmem:[%s629_s3 + $0x18] sm:$0xff] %v431_v2  ;;  %v326_v5 = vmax.f32 %v257_v3, 0.0  ;;  %v259_v6 = vadd.f32 %v258_v4, %v60_v34 }
  0xf3   :  { %v433_v7 = vpack.c.bf16 %v259_v6, %v326_v5 }
  0xf5   :  { %387 = vst [vmem:[%s629_s3 + $0x24] sm:$0xff] %v433_v7 }

// kernel: _lambda_.23
= control target key start
LH: loop header
LB: loop body
LE: loop exit
PB: predicated region body
PF: predicated region fallthrough
CT: control target
= control target key end

     0   :  { %s343_s1 = inlined_call_operand.vmem [shape: bf16[128,128], index: 1, kind: input, shape index: {}]   ;;  %s344_s0 = inlined_call_operand.vmem [shape: bf16[32,128], index: 0, kind: input, shape index: {}]   ;;  %s345_s2 = inlined_call_operand.vmem [shape: f32[1,128], index: 2, kind: input, shape index: {}]   ;;  %s346_s3 = inlined_call_operand.vmem [shape: bf16[32,128], index: 3, kind: input, shape index: {}]   ;;  %s347_s4 = inlined_call_operand.vmem [shape: bf16[32,128], index: 4, kind: output, shape index: {}]  }
   0x1   :  { %v263_v0 = vld [vmem:[%s343_s1 + $0x38] sm:$0xff]   ;;  %v264_v1 = vld [vmem:[%s343_s1 + $0x30] sm:$0xff]   ;;  %v265_v2 = vld [vmem:[%s343_s1 + $0x28] sm:$0xff]  }
   0x2   :  { %243 = vmatprep.subr.bf16.mxu0 %v263_v0  ;;  %v266_v3 = vld [vmem:[%s343_s1 + $0x20] sm:$0xff]   ;;  %v267_v5 = vld [vmem:[%s343_s1 + $0x18] sm:$0xff]   ;;  %v268_v6 = vld [vmem:[%s343_s1 + $0x10] sm:$0xff]  }
   0x3   :  { %244 = vmatpush3.bf16.msra.mxu0 %v263_v0  ;;  %v271_v4 = vld [vmem:[%s344_s0] sm:$0xff]   ;;  %v269_v7 = vld [vmem:[%s343_s1 + $0x8] sm:$0xff]  }
   0x4   :  { %245 = vmatprep.subr.bf16.mxu0 %v264_v1  ;;  %259 = vmatprep.mubr.bf16.mxu0 %v271_v4  ;;  %v270_v8 = vld [vmem:[%s343_s1] sm:$0xff]   ;;  %v272_v9 = vld [vmem:[%s344_s0 + $0x8] sm:$0xff]  }
   0x5   :  { %v194_v10 = vld [vmem:[%s345_s2] ss:$0 sm:$0xff]  ;;  %v231_v11 = vld [vmem:[%s346_s3 + $0x8] sm:$0xff]  }
   0x6   :  { %v214_v13 = vld [vmem:[%s346_s3] sm:$0xff]   ;;  %v219_v15 = vunpack.c.l.bf16 %v231_v11  ;;  %v220_v19 = vunpack.c.h.bf16 %v231_v11 }
   0x7   :  { %246 = vmatpush3.bf16.msra.mxu0 %v264_v1  ;;  %v215_v18 = vunpack.c.l.bf16 %v214_v13  ;;  %v216_v23 = vunpack.c.h.bf16 %v214_v13 }
   0x8   :  { %247 = vmatprep.subr.bf16.mxu0 %v265_v2 }
   0xb   :  { %248 = vmatpush3.bf16.msra.mxu0 %v265_v2 }
   0xc   :  { %249 = vmatprep.subr.bf16.mxu0 %v266_v3 }
   0xf   :  { %250 = vmatpush3.bf16.msra.mxu0 %v266_v3 }
  0x10   :  { %251 = vmatprep.subr.bf16.mxu0 %v267_v5 }
  0x13   :  { %252 = vmatpush3.bf16.msra.mxu0 %v267_v5 }
  0x14   :  { %253 = vmatprep.subr.bf16.mxu0 %v268_v6 }
  0x17   :  { %254 = vmatpush3.bf16.msra.mxu0 %v268_v6 }
  0x18   :  { %255 = vmatprep.subr.bf16.mxu0 %v269_v7 }
  0x1b   :  { %256 = vmatpush3.bf16.msra.mxu0 %v269_v7 }
  0x1c   :  { %257 = vmatprep.subr.bf16.mxu0 %v270_v8 }
  0x1f   :  { %258 = vmatpush3.bf16.msra.mxu0 %v270_v8 }
  0x22   :  { %260 = vmatmul.mubr.bf16.vlgmr.msra.gmra.mxu0 %v272_v9 }
  0xe2   :  { %v261_v12 = vpop.f32.mrf.mxu0 }
  0xe3   :  { %v148_v14 = vadd.f32 %v261_v12, %v194_v10 }
  0xe4   :  { %v139_v16 = vpop.f32.mrf.mxu0 }
  0xe5   :  { %v140_v17 = vadd.f32 %v194_v10, %v139_v16  ;;  %v164_v21 = vadd.f32 %v219_v15, %v148_v14 }
  0xe6   :  { %v262_v20 = vpop.f32.mrf.mxu0 }
  0xe7   :  { %v151_v22 = vadd.f32 %v262_v20, %v194_v10  ;;  %v162_v25 = vadd.f32 %v215_v18, %v140_v17  ;;  %v168_v28 = vmax.f32 %v164_v21, 0.0 }
  0xe8   :  { %v142_v24 = vpop.f32.mrf.mxu0 }
  0xe9   :  { %v165_v26 = vadd.f32 %v220_v19, %v151_v22  ;;  %v143_v27 = vadd.f32 %v194_v10, %v142_v24  ;;  %v166_v31 = vmax.f32 %v162_v25, 0.0 }
  0xeb   :  { %v169_v29 = vmax.f32 %v165_v26, 0.0  ;;  %v163_v30 = vadd.f32 %v216_v23, %v143_v27 }
  0xed   :  { %v229_v32 = vpack.c.bf16 %v169_v29, %v168_v28  ;;  %v167_v33 = vmax.f32 %v163_v30, 0.0 }
  0xef   :  { %232 = vst [vmem:[%s347_s4 + $0x8] sm:$0xff] %v229_v32   ;;  %v224_v34 = vpack.c.bf16 %v167_v33, %v166_v31 }
  0xf1   :  { %225 = vst [vmem:[%s347_s4] sm:$0xff] %v224_v34  }

// kernel: _lambda_.25
= control target key start
LH: loop header
LB: loop body
LE: loop exit
PB: predicated region body
PF: predicated region fallthrough
CT: control target
= control target key end

     0   :  { %s970_s1 = inlined_call_operand.vmem [shape: bf16[640,128], index: 1, kind: input, shape index: {}]   ;;  %s971_s0 = inlined_call_operand.vmem [shape: bf16[32,640], index: 0, kind: input, shape index: {}]   ;;  %s972_s2 = inlined_call_operand.vmem [shape: f32[1,128], index: 2, kind: input, shape index: {}]   ;;  %s973_s3 = inlined_call_operand.vmem [shape: bf16[32,128], index: 3, kind: output, shape index: {}]  }
   0x1   :  { %v737_v0 = vld [vmem:[%s970_s1 + $0x78] sm:$0xff]   ;;  %v741_v4 = vld [vmem:[%s970_s1 + $0x70] sm:$0xff]   ;;  %v745_v8 = vld [vmem:[%s970_s1 + $0x68] sm:$0xff]  }
   0x2   :  { %v738_v1 = vld [vmem:[%s970_s1 + $0x38] sm:$0xff]   ;;  %651 = vmatprep.subr.bf16.mxu0 %v737_v0  ;;  %v742_v5 = vld [vmem:[%s970_s1 + $0x30] sm:$0xff]   ;;  %v746_v9 = vld [vmem:[%s970_s1 + $0x28] sm:$0xff]  }
   0x3   :  { %v739_v2 = vld [vmem:[%s970_s1 + $0xf8] sm:$0xff]   ;;  %652 = vmatpush3.bf16.msra.mxu0 %v738_v1  ;;  %v743_v6 = vld [vmem:[%s970_s1 + $0xf0] sm:$0xff]   ;;  %v747_v10 = vld [vmem:[%s970_s1 + $0xe8] sm:$0xff]  }
   0x4   :  { %v740_v3 = vld [vmem:[%s970_s1 + $0xb8] sm:$0xff]   ;;  %679 = vmatprep.subr.bf16.mxu1 %v739_v2  ;;  %653 = vmatprep.subr.bf16.mxu0 %v741_v4  ;;  %v744_v7 = vld [vmem:[%s970_s1 + $0xb0] sm:$0xff]   ;;  %v748_v11 = vld [vmem:[%s970_s1 + $0xa8] sm:$0xff]  }
   0x5   :  { %680 = vmatpush3.bf16.msra.mxu1 %v740_v3  ;;  %v749_v12 = vld [vmem:[%s970_s1 + $0x60] sm:$0xff]   ;;  %v753_v16 = vld [vmem:[%s970_s1 + $0x58] sm:$0xff]   ;;  %v757_v20 = vld [vmem:[%s970_s1 + $0x50] sm:$0xff]  }
   0x6   :  { %681 = vmatprep.subr.bf16.mxu1 %v743_v6  ;;  %v750_v13 = vld [vmem:[%s970_s1 + $0x20] sm:$0xff]   ;;  %v754_v17 = vld [vmem:[%s970_s1 + $0x18] sm:$0xff]   ;;  %v758_v21 = vld [vmem:[%s970_s1 + $0x10] sm:$0xff]  }
   0x7   :  { %654 = vmatpush3.bf16.msra.mxu0 %v742_v5  ;;  %v751_v14 = vld [vmem:[%s970_s1 + $0xe0] sm:$0xff]   ;;  %v755_v18 = vld [vmem:[%s970_s1 + $0xd8] sm:$0xff]   ;;  %v759_v22 = vld [vmem:[%s970_s1 + $0xd0] sm:$0xff]  }
   0x8   :  { %655 = vmatprep.subr.bf16.mxu0 %v745_v8  ;;  %v752_v15 = vld [vmem:[%s970_s1 + $0xa0] sm:$0xff]   ;;  %v756_v19 = vld [vmem:[%s970_s1 + $0x98] sm:$0xff]   ;;  %v760_v23 = vld [vmem:[%s970_s1 + $0x90] sm:$0xff]  }
   0x9   :  { %682 = vmatpush3.bf16.msra.mxu1 %v744_v7  ;;  %v761_v24 = vld [vmem:[%s970_s1 + $0x48] sm:$0xff]   ;;  %v765_v28 = vld [vmem:[%s970_s1 + $0x40] sm:$0xff]   ;;  %v772_v34 = vld [vmem:[%s970_s1 + $0x138] sm:$0xff]  }
   0xa   :  { %683 = vmatprep.subr.bf16.mxu1 %v747_v10  ;;  %v762_v25 = vld [vmem:[%s970_s1 + $0x8] sm:$0xff]   ;;  %v766_v29 = vld [vmem:[%s970_s1] sm:$0xff]   ;;  %v776_v37 = vld [vmem:[%s970_s1 + $0x130] sm:$0xff]  }
   0xb   :  { %656 = vmatpush3.bf16.msra.mxu0 %v746_v9  ;;  %v763_v26 = vld [vmem:[%s970_s1 + $0xc8] sm:$0xff]   ;;  %v767_v30 = vld [vmem:[%s970_s1 + $0xc0] sm:$0xff]   ;;  %v779_v44 = vld [vmem:[%s970_s1 + $0x118] sm:$0xff]  }
   0xc   :  { %657 = vmatprep.subr.bf16.mxu0 %v749_v12  ;;  %v764_v27 = vld [vmem:[%s970_s1 + $0x88] sm:$0xff]   ;;  %v768_v31 = vld [vmem:[%s971_s0] ss:$20 sps:$4 sm:$0xff]   ;;  %v770_v32 = vld [vmem:[%s971_s0 + $0x4] ss:$20 sps:$4 sm:$0xff]  }
   0xd   :  { %684 = vmatpush3.bf16.msra.mxu1 %v748_v11  ;;  %v771_v33 = vld [vmem:[%s970_s1 + $0x80] sm:$0xff]   ;;  %438 = vmatprep.mubr.bf16.mxu0 %v770_v32  ;;  %v773_v35 = vld [vmem:[%s971_s0 + $0x8] ss:$20 sps:$4 sm:$0xff]   ;;  %v786_v46 = vld [vmem:[%s970_s1 + $0x110] sm:$0xff]  }
   0xe   :  { %685 = vmatprep.subr.bf16.mxu1 %v751_v14  ;;  %v775_v36 = vld [vmem:[%s971_s0 + $0xc] ss:$20 sps:$4 sm:$0xff]   ;;  %v782_v41 = vld [vmem:[%s971_s0 + $0x28] ss:$20 sps:$4 sm:$0xff]   ;;  %v785_v43 = vld [vmem:[%s971_s0 + $0x30] ss:$20 sps:$4 sm:$0xff]  }
   0xf   :  { %658 = vmatpush3.bf16.msra.mxu0 %v750_v13  ;;  %487 = vmatprep.mubr.bf16.mxu1 %v775_v36  ;;  %v777_v38 = vld [vmem:[%s970_s1 + $0x128] sm:$0xff]   ;;  %v778_v39 = vld [vmem:[%s970_s1 + $0x120] sm:$0xff]  }
  0x10   :  { %659 = vmatprep.subr.bf16.mxu0 %v753_v16  ;;  %v780_v40 = vld [vmem:[%s971_s0 + $0x2c] ss:$20 sps:$4 sm:$0xff]   ;;  %v783_v42 = vld [vmem:[%s971_s0 + $0x34] ss:$20 sps:$4 sm:$0xff]   ;;  %v789_v45 = vld [vmem:[%s971_s0 + $0x10] ss:$20 sps:$4 sm:$0xff]  }
  0x11   :  { %686 = vmatpush3.bf16.msra.mxu1 %v752_v15  ;;  %v787_v47 = vld [vmem:[%s970_s1 + $0x108] sm:$0xff]   ;;  %v788_v48 = vld [vmem:[%s970_s1 + $0x100] sm:$0xff]  }
  0x12   :  { %687 = vmatprep.subr.bf16.mxu1 %v755_v18  ;;  %v790_v49 = vld [vmem:[%s971_s0 + $0x38] ss:$20 sps:$4 sm:$0xff]   ;;  %v581_v4 = vld [vmem:[%s972_s2] ss:$0 sm:$0xff] }
  0x13   :  { %660 = vmatpush3.bf16.msra.mxu0 %v754_v17 }
  0x14   :  { %661 = vmatprep.subr.bf16.mxu0 %v757_v20 }
  0x15   :  { %688 = vmatpush3.bf16.msra.mxu1 %v756_v19 }
  0x16   :  { %689 = vmatprep.subr.bf16.mxu1 %v759_v22 }
  0x17   :  { %662 = vmatpush3.bf16.msra.mxu0 %v758_v21 }
  0x18   :  { %663 = vmatprep.subr.bf16.mxu0 %v761_v24 }
  0x19   :  { %690 = vmatpush3.bf16.msra.mxu1 %v760_v23 }
  0x1a   :  { %691 = vmatprep.subr.bf16.mxu1 %v763_v26 }
  0x1b   :  { %664 = vmatpush3.bf16.msra.mxu0 %v762_v25 }
  0x1c   :  { %665 = vmatprep.subr.bf16.mxu0 %v765_v28 }
  0x1d   :  { %692 = vmatpush3.bf16.msra.mxu1 %v764_v27 }
  0x1e   :  { %693 = vmatprep.subr.bf16.mxu1 %v767_v30 }
  0x1f   :  { %666 = vmatpush3.bf16.msra.mxu0 %v766_v29 }
  0x20   :  { %717 = vmatprep.subr.bf16.mxu0 %v772_v34 }
  0x21   :  { %694 = vmatpush3.bf16.msra.mxu1 %v771_v33 }
  0x22   :  { %439 = vmatmul.mubr.bf16.vlgmr.msra.gmra.mxu0 %v768_v31 }
  0x23   :  { %718 = vmatpush3.bf16.msra.mxu0 %v772_v34  ;;  %446 = vmatprep.mubr.bf16.mxu0 %v780_v40 }
  0x24   :  { %488 = vmatmul.mubr.bf16.vlgmr.msra.gmra.mxu1 %v773_v35  ;;  %719 = vmatprep.subr.bf16.mxu0 %v776_v37 }
  0x25   :  { %495 = vmatprep.mubr.bf16.mxu1 %v783_v42 }
  0x27   :  { %720 = vmatpush3.bf16.msra.mxu0 %v776_v37 }
  0x28   :  { %721 = vmatprep.subr.bf16.mxu0 %v777_v38 }
  0x2a   :  { %447 = vmatmul.mubr.bf16.gmra.mxu0 %v782_v41 }
  0x2b   :  { %722 = vmatpush3.bf16.msra.mxu0 %v777_v38  ;;  %733 = vmatprep.mubr.bf16.mxu0 %v789_v45 }
  0x2c   :  { %723 = vmatprep.subr.bf16.mxu0 %v778_v39  ;;  %496 = vmatmul.mubr.bf16.gmra.mxu1 %v785_v43 }
  0x2f   :  { %724 = vmatpush3.bf16.msra.mxu0 %v778_v39 }
  0x30   :  { %725 = vmatprep.subr.bf16.mxu0 %v779_v44 }
  0x33   :  { %726 = vmatpush3.bf16.msra.mxu0 %v779_v44 }
  0x34   :  { %727 = vmatprep.subr.bf16.mxu0 %v786_v46 }
  0x37   :  { %728 = vmatpush3.bf16.msra.mxu0 %v786_v46 }
  0x38   :  { %729 = vmatprep.subr.bf16.mxu0 %v787_v47 }
  0x3b   :  { %730 = vmatpush3.bf16.msra.mxu0 %v787_v47 }
  0x3c   :  { %731 = vmatprep.subr.bf16.mxu0 %v788_v48 }
  0x3f   :  { %732 = vmatpush3.bf16.msra.mxu0 %v788_v48 }
  0x42   :  { %734 = vmatmul.mubr.bf16.vlgmr.msra.gmra.mxu0 %v790_v49 }
  0xe2   :  { %v667_v50 = vpop.f32.mrf.mxu0 }
  0xe4   :  { %v668_v51 = vpop.f32.mrf.mxu0  ;;  %v695_v52 = vpop.f32.mrf.mxu1 }
  0xe5   :  { %v669_v2 = vadd.f32 %v668_v51, %v667_v50 }
  0xe6   :  { %v670_v53 = vpop.f32.mrf.mxu0  ;;  %v696_v54 = vpop.f32.mrf.mxu1 }
  0xe7   :  { %v441_v9 = vadd.f32 %v669_v2, %v581_v4  ;;  %v697_v10 = vadd.f32 %v696_v54, %v695_v52 }
  0xe8   :  { %v671_v55 = vpop.f32.mrf.mxu0  ;;  %v698_v56 = vpop.f32.mrf.mxu1 }
  0xe9   :  { %v672_v6 = vadd.f32 %v671_v55, %v670_v53  ;;  %v490_v19 = vadd.f32 %v697_v10, %v441_v9 }
  0xea   :  { %v673_v57 = vpop.f32.mrf.mxu0  ;;  %v699_v58 = vpop.f32.mrf.mxu1 }
  0xeb   :  { %v444_v14 = vadd.f32 %v672_v6, %v581_v4  ;;  %v700_v15 = vadd.f32 %v699_v58, %v698_v56 }
  0xec   :  { %v674_v59 = vpop.f32.mrf.mxu0  ;;  %v701_v60 = vpop.f32.mrf.mxu1 }
  0xed   :  { %v675_v1 = vadd.f32 %v674_v59, %v673_v57  ;;  %v493_v24 = vadd.f32 %v700_v15, %v444_v14 }
  0xee   :  { %v676_v61 = vpop.f32.mrf.mxu0  ;;  %v702_v62 = vpop.f32.mrf.mxu1 }
  0xef   :  { %v449_v7 = vadd.f32 %v675_v1, %v581_v4  ;;  %v703_v8 = vadd.f32 %v702_v62, %v701_v60 }
  0xf0   :  { %v677_v63 = vpop.f32.mrf.mxu0  ;;  %v704_v0 = vpop.f32.mrf.mxu1 }
  0xf1   :  { %v678_v3 = vadd.f32 %v677_v63, %v676_v61  ;;  %v498_v16 = vadd.f32 %v703_v8, %v449_v7 }
  0xf2   :  { %v705_v5 = vpop.f32.mrf.mxu1 }
  0xf3   :  { %v452_v11 = vadd.f32 %v678_v3, %v581_v4  ;;  %v706_v12 = vadd.f32 %v705_v5, %v704_v0 }
  0xf5   :  { %v501_v20 = vadd.f32 %v706_v12, %v452_v11 }
 0x102   :  { %v735_v13 = vpop.f32.mrf.mxu0 }
 0x103   :  { %v547_v18 = vadd.f32 %v735_v13, %v498_v16 }
 0x104   :  { %v538_v17 = vpop.f32.mrf.mxu0 }
 0x105   :  { %v539_v22 = vadd.f32 %v538_v17, %v490_v19  ;;  %v555_v26 = vmax.f32 %v547_v18, 0.0 }
 0x106   :  { %v736_v21 = vpop.f32.mrf.mxu0 }
 0x107   :  { %v550_v23 = vadd.f32 %v736_v21, %v501_v20  ;;  %v553_v29 = vmax.f32 %v539_v22, 0.0 }
 0x108   :  { %v541_v25 = vpop.f32.mrf.mxu0 }
 0x109   :  { %v556_v27 = vmax.f32 %v550_v23, 0.0  ;;  %v542_v28 = vadd.f32 %v541_v25, %v493_v24 }
 0x10b   :  { %v648_v30 = vpack.c.bf16 %v556_v27, %v555_v26  ;;  %v554_v31 = vmax.f32 %v542_v28, 0.0 }
 0x10d   :  { %650 = vst [vmem:[%s973_s3 + $0x8] sm:$0xff] %v648_v30   ;;  %v643_v32 = vpack.c.bf16 %v554_v31, %v553_v29 }
 0x10f   :  { %644 = vst [vmem:[%s973_s3] sm:$0xff] %v643_v32  }

// kernel: _lambda_.26
= control target key start
LH: loop header
LB: loop body
LE: loop exit
PB: predicated region body
PF: predicated region fallthrough
CT: control target
= control target key end

     0   :  { %v324_v1 = vmov 0   ;;  %v40_v19 = vlaneseq  ;;  %s431_s1 = inlined_call_operand.vmem [shape: bf16[128,256], index: 1, kind: input, shape index: {}]   ;;  %s432_s0 = inlined_call_operand.vmem [shape: bf16[32,128], index: 0, kind: input, shape index: {}]   ;;  %s433_s2 = inlined_call_operand.vmem [shape: f32[1,256], index: 2, kind: input, shape index: {}]   ;;  %s434_s3 = inlined_call_operand.vmem [shape: bf16[32,256], index: 3, kind: input, shape index: {}]   ;;  %s435_s4 = inlined_call_operand.vmem [shape: bf16[32,256], index: 4, kind: output, shape index: {}]  }
   0x1   :  { %v298_v0 = vld [vmem:[%s431_s1 + $0x74] ss:$8 sps:$4 sm:$0xff]   ;;  %174 = vmatprep.mubr.bf16.mxu0 %v324_v1  ;;  %184 = vmatprep.mubr.bf16.mxu1 %v324_v1  ;;  %v300_v2 = vld [vmem:[%s431_s1 + $0x70] ss:$8 sps:$4 sm:$0xff]   ;;  %v301_v3 = vld [vmem:[%s431_s1 + $0x64] ss:$8 sps:$4 sm:$0xff]  }
   0x2   :  { %142 = vmatprep.subr.bf16.mxu0 %v298_v0  ;;  %281 = vmatprep.subr.bf16.mxu1 %v298_v0  ;;  %v303_v4 = vld [vmem:[%s431_s1 + $0x60] ss:$8 sps:$4 sm:$0xff]   ;;  %v304_v5 = vld [vmem:[%s431_s1 + $0x54] ss:$8 sps:$4 sm:$0xff]   ;;  %v306_v6 = vld [vmem:[%s431_s1 + $0x50] ss:$8 sps:$4 sm:$0xff]  }
   0x3   :  { %143 = vmatpush1.bf16.msra.mxu0 %v300_v2  ;;  %289 = vmatpush1.bf16.msra.mxu1 %v300_v2  ;;  %v307_v7 = vld [vmem:[%s431_s1 + $0x44] ss:$8 sps:$4 sm:$0xff]   ;;  %v309_v8 = vld [vmem:[%s431_s1 + $0x40] ss:$8 sps:$4 sm:$0xff]   ;;  %v310_v9 = vld [vmem:[%s431_s1 + $0x34] ss:$8 sps:$4 sm:$0xff]  }
   0x4   :  { %144 = vmatprep.subr.bf16.mxu0 %v301_v3  ;;  %282 = vmatprep.subr.bf16.mxu1 %v301_v3  ;;  %v312_v10 = vld [vmem:[%s431_s1 + $0x30] ss:$8 sps:$4 sm:$0xff]   ;;  %v313_v11 = vld [vmem:[%s431_s1 + $0x24] ss:$8 sps:$4 sm:$0xff]   ;;  %v315_v12 = vld [vmem:[%s431_s1 + $0x20] ss:$8 sps:$4 sm:$0xff]  }
   0x5   :  { %v316_v13 = vld [vmem:[%s431_s1 + $0x14] ss:$8 sps:$4 sm:$0xff]   ;;  %v318_v14 = vld [vmem:[%s431_s1 + $0x10] ss:$8 sps:$4 sm:$0xff]   ;;  %v319_v15 = vld [vmem:[%s431_s1 + $0x4] ss:$8 sps:$4 sm:$0xff]  }
   0x6   :  { %v321_v16 = vld [vmem:[%s431_s1] ss:$8 sps:$4 sm:$0xff]   ;;  %v41_v20 = vshrl.u32 %v40_v19, 7  ;;  %v197_v25 = vld [vmem:[%s434_s3 + $0x10] sm:$0xff]  ;;  %v198_v37 = vld [vmem:[%s434_s3 + $0x18] sm:$0xff] }
   0x7   :  { %145 = vmatpush1.bf16.msra.mxu0 %v303_v4  ;;  %290 = vmatpush1.bf16.msra.mxu1 %v303_v4  ;;  %v322_v17 = vld [vmem:[%s432_s0] sm:$0xff]   ;;  %v323_v18 = vld [vmem:[%s432_s0 + $0x8] sm:$0xff]   ;;  %v203_v28 = vunpack.c.l.bf16 %v197_v25  ;;  %v204_v35 = vunpack.c.h.bf16 %v197_v25  ;;  %v205_v47 = vunpack.c.l.bf16 %v198_v37  ;;  %v206_v51 = vunpack.c.h.bf16 %v198_v37 }
   0x8   :  { %146 = vmatprep.subr.bf16.mxu0 %v304_v5  ;;  %283 = vmatprep.subr.bf16.mxu1 %v304_v5  ;;  %v42_v21 = vsub.s32 0, %v41_v20  ;;  %v38_v22 = vld [vmem:[%s433_s2] sm:$0x3]  ;;  %v46_v23 = vsub.s32 1, %v41_v20  ;;  %v196_v36 = vld [vmem:[%s434_s3 + $0x8] sm:$0xff] }
   0x9   :  { %v195_v24 = vld [vmem:[%s434_s3] sm:$0xff]  ;;  %v201_v45 = vunpack.c.l.bf16 %v196_v36  ;;  %v202_v50 = vunpack.c.h.bf16 %v196_v36 }
   0xa   :  { %v43_v26 = vrot.slane %v38_v22, %v42_v21  ;;  %v199_v27 = vunpack.c.l.bf16 %v195_v24  ;;  %v47_v29 = vrot.slane %v38_v22, %v46_v23  ;;  %v200_v34 = vunpack.c.h.bf16 %v195_v24 }
   0xb   :  { %147 = vmatpush1.bf16.msra.mxu0 %v306_v6  ;;  %291 = vmatpush1.bf16.msra.mxu1 %v306_v6 }
   0xc   :  { %148 = vmatprep.subr.bf16.mxu0 %v307_v7  ;;  %284 = vmatprep.subr.bf16.mxu1 %v307_v7 }
   0xf   :  { %149 = vmatpush1.bf16.msra.mxu0 %v309_v8  ;;  %292 = vmatpush1.bf16.msra.mxu1 %v309_v8 }
  0x10   :  { %150 = vmatprep.subr.bf16.mxu0 %v310_v9  ;;  %285 = vmatprep.subr.bf16.mxu1 %v310_v9 }
  0x13   :  { %151 = vmatpush1.bf16.msra.mxu0 %v312_v10  ;;  %293 = vmatpush1.bf16.msra.mxu1 %v312_v10 }
  0x14   :  { %152 = vmatprep.subr.bf16.mxu0 %v313_v11  ;;  %286 = vmatprep.subr.bf16.mxu1 %v313_v11 }
  0x17   :  { %153 = vmatpush1.bf16.msra.mxu0 %v315_v12  ;;  %294 = vmatpush1.bf16.msra.mxu1 %v315_v12 }
  0x18   :  { %154 = vmatprep.subr.bf16.mxu0 %v316_v13  ;;  %287 = vmatprep.subr.bf16.mxu1 %v316_v13 }
  0x1b   :  { %155 = vmatpush1.bf16.msra.mxu0 %v318_v14  ;;  %295 = vmatpush1.bf16.msra.mxu1 %v318_v14 }
  0x1c   :  { %156 = vmatprep.subr.bf16.mxu0 %v319_v15  ;;  %288 = vmatprep.subr.bf16.mxu1 %v319_v15 }
  0x1f   :  { %157 = vmatpush1.bf16.msra.mxu0 %v321_v16  ;;  %296 = vmatpush1.bf16.msra.mxu1 %v321_v16 }
  0x22   :  { %175 = vmatmul.mubr.bf16.vlgmr.msra.gmra.mxu0 %v322_v17  ;;  %185 = vmatmul.mubr.bf16.vlgmr.msra.gmra.mxu1 %v323_v18 }
  0xe2   :  { %v176_v30 = vpop.f32.mrf.mxu0  ;;  %v186_v31 = vpop.f32.mrf.mxu1 }
  0xe3   :  { %v177_v32 = vadd.f32 %v176_v30, %v43_v26  ;;  %v187_v33 = vadd.f32 %v186_v31, %v43_v26 }
  0xe4   :  { %v178_v38 = vpop.f32.mrf.mxu0  ;;  %v188_v39 = vpop.f32.mrf.mxu1 }
  0xe5   :  { %v207_v40 = vadd.f32 %v199_v27, %v177_v32  ;;  %v211_v41 = vadd.f32 %v203_v28, %v187_v33  ;;  %v179_v42 = vadd.f32 %v178_v38, %v47_v29  ;;  %v189_v43 = vadd.f32 %v188_v39, %v47_v29 }
  0xe6   :  { %v180_v44 = vpop.f32.mrf.mxu0  ;;  %v190_v46 = vpop.f32.mrf.mxu1 }
  0xe7   :  { %v208_v48 = vadd.f32 %v200_v34, %v179_v42  ;;  %v212_v49 = vadd.f32 %v204_v35, %v189_v43  ;;  %v215_v52 = vmax.f32 %v207_v40, 0.0  ;;  %v219_v53 = vmax.f32 %v211_v41, 0.0 }
  0xe8   :  { %v181_v54 = vadd.f32 %v180_v44, %v43_v26  ;;  %v191_v55 = vadd.f32 %v190_v46, %v43_v26  ;;  %v182_v56 = vpop.f32.mrf.mxu0  ;;  %v192_v57 = vpop.f32.mrf.mxu1 }
  0xe9   :  { %v216_v58 = vmax.f32 %v208_v48, 0.0  ;;  %v220_v59 = vmax.f32 %v212_v49, 0.0  ;;  %v183_v60 = vadd.f32 %v182_v56, %v47_v29  ;;  %v193_v61 = vadd.f32 %v192_v57, %v47_v29 }
  0xea   :  { %v209_v62 = vadd.f32 %v201_v45, %v181_v54  ;;  %v213_v63 = vadd.f32 %v205_v47, %v191_v55 }
  0xeb   :  { %v277_v0 = vpack.c.bf16 %v216_v58, %v215_v52  ;;  %v279_v1 = vpack.c.bf16 %v220_v59, %v219_v53  ;;  %v210_v2 = vadd.f32 %v202_v50, %v183_v60  ;;  %v214_v3 = vadd.f32 %v206_v51, %v193_v61 }
  0xec   :  { %v217_v4 = vmax.f32 %v209_v62, 0.0  ;;  %v221_v5 = vmax.f32 %v213_v63, 0.0 }
  0xed   :  { %247 = vst [vmem:[%s435_s4] sm:$0xff] %v277_v0  ;;  %249 = vst [vmem:[%s435_s4 + $0x10] sm:$0xff] %v279_v1  ;;  %v218_v6 = vmax.f32 %v210_v2, 0.0  ;;  %v222_v7 = vmax.f32 %v214_v3, 0.0 }
  0xef   :  { %v278_v8 = vpack.c.bf16 %v218_v6, %v217_v4  ;;  %v280_v9 = vpack.c.bf16 %v222_v7, %v221_v5 }
  0xf1   :  { %248 = vst [vmem:[%s435_s4 + $0x8] sm:$0xff] %v278_v8  ;;  %250 = vst [vmem:[%s435_s4 + $0x18] sm:$0xff] %v280_v9 }

// kernel: _lambda_.27
= control target key start
LH: loop header
LB: loop body
LE: loop exit
PB: predicated region body
PF: predicated region fallthrough
CT: control target
= control target key end

     0   :  { %s1464_s1 = inlined_call_operand.vmem [shape: bf16[256,640], index: 1, kind: input, shape index: {}]   ;;  %s1465_s0 = inlined_call_operand.vmem [shape: bf16[32,256], index: 0, kind: input, shape index: {}]   ;;  %s1466_s2 = inlined_call_operand.vmem [shape: f32[1,640], index: 2, kind: input, shape index: {}]   ;;  %s1467_s3 = inlined_call_operand.vmem [shape: bf16[32,640], index: 3, kind: output, shape index: {}]  }
   0x1   :  { %v1016_v0 = vld [vmem:[%s1464_s1 + $0x11c] ss:$20 sps:$4 sm:$0xff]   ;;  %v1018_v1 = vld [vmem:[%s1464_s1 + $0x124] ss:$20 sps:$4 sm:$0xff]   ;;  %v1021_v3 = vld [vmem:[%s1464_s1 + $0x120] ss:$20 sps:$4 sm:$0xff]  }
   0x2   :  { %578 = vmatprep.subr.bf16.mxu0 %v1016_v0  ;;  %v1020_v2 = vld [vmem:[%s1464_s1 + $0x118] ss:$20 sps:$4 sm:$0xff]   ;;  %631 = vmatprep.subr.bf16.mxu1 %v1018_v1  ;;  %v1022_v4 = vld [vmem:[%s1464_s1 + $0xf4] ss:$20 sps:$4 sm:$0xff]   ;;  %v1024_v5 = vld [vmem:[%s1464_s1 + $0xfc] ss:$20 sps:$4 sm:$0xff]  }
   0x3   :  { %579 = vmatpush1.bf16.msra.mxu0 %v1020_v2  ;;  %632 = vmatpush1.bf16.msra.mxu1 %v1021_v3  ;;  %v1026_v6 = vld [vmem:[%s1464_s1 + $0xf0] ss:$20 sps:$4 sm:$0xff]   ;;  %v1027_v7 = vld [vmem:[%s1464_s1 + $0xf8] ss:$20 sps:$4 sm:$0xff]   ;;  %v1030_v9 = vld [vmem:[%s1464_s1 + $0xd4] ss:$20 sps:$4 sm:$0xff]  }
   0x4   :  { %580 = vmatprep.subr.bf16.mxu0 %v1022_v4  ;;  %633 = vmatprep.subr.bf16.mxu1 %v1024_v5  ;;  %v1028_v8 = vld [vmem:[%s1464_s1 + $0xcc] ss:$20 sps:$4 sm:$0xff]   ;;  %v1032_v10 = vld [vmem:[%s1464_s1 + $0xc8] ss:$20 sps:$4 sm:$0xff]   ;;  %v1033_v11 = vld [vmem:[%s1464_s1 + $0xd0] ss:$20 sps:$4 sm:$0xff]  }
   0x5   :  { %v1034_v12 = vld [vmem:[%s1464_s1 + $0xa4] ss:$20 sps:$4 sm:$0xff]   ;;  %v1036_v13 = vld [vmem:[%s1464_s1 + $0xac] ss:$20 sps:$4 sm:$0xff]   ;;  %v1039_v15 = vld [vmem:[%s1464_s1 + $0xa8] ss:$20 sps:$4 sm:$0xff]  }
   0x6   :  { %v1038_v14 = vld [vmem:[%s1464_s1 + $0xa0] ss:$20 sps:$4 sm:$0xff]   ;;  %v1040_v16 = vld [vmem:[%s1464_s1 + $0x7c] ss:$20 sps:$4 sm:$0xff]   ;;  %v1042_v17 = vld [vmem:[%s1464_s1 + $0x84] ss:$20 sps:$4 sm:$0xff]  }
   0x7   :  { %581 = vmatpush1.bf16.msra.mxu0 %v1026_v6  ;;  %634 = vmatpush1.bf16.msra.mxu1 %v1027_v7  ;;  %v1044_v18 = vld [vmem:[%s1464_s1 + $0x78] ss:$20 sps:$4 sm:$0xff]   ;;  %v1045_v19 = vld [vmem:[%s1464_s1 + $0x80] ss:$20 sps:$4 sm:$0xff]   ;;  %v1048_v21 = vld [vmem:[%s1464_s1 + $0x5c] ss:$20 sps:$4 sm:$0xff]  }
   0x8   :  { %582 = vmatprep.subr.bf16.mxu0 %v1028_v8  ;;  %635 = vmatprep.subr.bf16.mxu1 %v1030_v9  ;;  %v1046_v20 = vld [vmem:[%s1464_s1 + $0x54] ss:$20 sps:$4 sm:$0xff]   ;;  %v1050_v22 = vld [vmem:[%s1464_s1 + $0x50] ss:$20 sps:$4 sm:$0xff]   ;;  %v1051_v23 = vld [vmem:[%s1464_s1 + $0x58] ss:$20 sps:$4 sm:$0xff]  }
   0x9   :  { %v1052_v24 = vld [vmem:[%s1464_s1 + $0x2c] ss:$20 sps:$4 sm:$0xff]   ;;  %v1054_v25 = vld [vmem:[%s1464_s1 + $0x34] ss:$20 sps:$4 sm:$0xff]   ;;  %v1057_v27 = vld [vmem:[%s1464_s1 + $0x30] ss:$20 sps:$4 sm:$0xff]  }
   0xa   :  { %v1056_v26 = vld [vmem:[%s1464_s1 + $0x28] ss:$20 sps:$4 sm:$0xff]   ;;  %v1058_v28 = vld [vmem:[%s1464_s1 + $0x4] ss:$20 sps:$4 sm:$0xff]   ;;  %v1060_v29 = vld [vmem:[%s1464_s1 + $0xc] ss:$20 sps:$4 sm:$0xff]  }
   0xb   :  { %583 = vmatpush1.bf16.msra.mxu0 %v1032_v10  ;;  %636 = vmatpush1.bf16.msra.mxu1 %v1033_v11  ;;  %v1062_v30 = vld [vmem:[%s1464_s1] ss:$20 sps:$4 sm:$0xff]   ;;  %v1063_v31 = vld [vmem:[%s1464_s1 + $0x8] ss:$20 sps:$4 sm:$0xff]   ;;  %v1066_v33 = vld [vmem:[%s1464_s1 + $0x264] ss:$20 sps:$4 sm:$0xff]  }
   0xc   :  { %584 = vmatprep.subr.bf16.mxu0 %v1034_v12  ;;  %637 = vmatprep.subr.bf16.mxu1 %v1036_v13  ;;  %v1064_v32 = vld [vmem:[%s1464_s1 + $0x25c] ss:$20 sps:$4 sm:$0xff]   ;;  %v1068_v34 = vld [vmem:[%s1464_s1 + $0x258] ss:$20 sps:$4 sm:$0xff]   ;;  %v1069_v35 = vld [vmem:[%s1464_s1 + $0x260] ss:$20 sps:$4 sm:$0xff]  }
   0xd   :  { %v1070_v36 = vld [vmem:[%s1464_s1 + $0x234] ss:$20 sps:$4 sm:$0xff]   ;;  %v1072_v37 = vld [vmem:[%s1464_s1 + $0x23c] ss:$20 sps:$4 sm:$0xff]   ;;  %v1075_v39 = vld [vmem:[%s1464_s1 + $0x238] ss:$20 sps:$4 sm:$0xff]  }
   0xe   :  { %v1074_v38 = vld [vmem:[%s1464_s1 + $0x230] ss:$20 sps:$4 sm:$0xff]   ;;  %v1076_v40 = vld [vmem:[%s1464_s1 + $0x20c] ss:$20 sps:$4 sm:$0xff]   ;;  %v1078_v41 = vld [vmem:[%s1464_s1 + $0x214] ss:$20 sps:$4 sm:$0xff]  }
   0xf   :  { %585 = vmatpush1.bf16.msra.mxu0 %v1038_v14  ;;  %638 = vmatpush1.bf16.msra.mxu1 %v1039_v15  ;;  %v1080_v42 = vld [vmem:[%s1464_s1 + $0x208] ss:$20 sps:$4 sm:$0xff]   ;;  %v1081_v43 = vld [vmem:[%s1464_s1 + $0x210] ss:$20 sps:$4 sm:$0xff]   ;;  %v1084_v45 = vld [vmem:[%s1464_s1 + $0x1ec] ss:$20 sps:$4 sm:$0xff]  }
  0x10   :  { %586 = vmatprep.subr.bf16.mxu0 %v1040_v16  ;;  %639 = vmatprep.subr.bf16.mxu1 %v1042_v17  ;;  %v1082_v44 = vld [vmem:[%s1464_s1 + $0x1e4] ss:$20 sps:$4 sm:$0xff]   ;;  %v1086_v46 = vld [vmem:[%s1464_s1 + $0x1e0] ss:$20 sps:$4 sm:$0xff]   ;;  %v1087_v47 = vld [vmem:[%s1464_s1 + $0x1e8] ss:$20 sps:$4 sm:$0xff]  }
  0x11   :  { %v1301_v48 = vld [vmem:[%s1465_s0 + $0x4] ss:$8 sps:$4 sm:$0xff]   ;;  %v1088_v49 = vld [vmem:[%s1464_s1 + $0x1bc] ss:$20 sps:$4 sm:$0xff]   ;;  %v1093_v52 = vld [vmem:[%s1464_s1 + $0x1c0] ss:$20 sps:$4 sm:$0xff]  }
  0x12   :  { %v1090_v50 = vld [vmem:[%s1464_s1 + $0x1c4] ss:$20 sps:$4 sm:$0xff]   ;;  %610 = vmatprep.mubr.bf16.mxu0 %v1301_v48  ;;  %663 = vmatprep.mubr.bf16.mxu1 %v1301_v48  ;;  %v1094_v53 = vld [vmem:[%s1464_s1 + $0x194] ss:$20 sps:$4 sm:$0xff]   ;;  %v1096_v54 = vld [vmem:[%s1464_s1 + $0x19c] ss:$20 sps:$4 sm:$0xff]  }
  0x13   :  { %587 = vmatpush1.bf16.msra.mxu0 %v1044_v18  ;;  %640 = vmatpush1.bf16.msra.mxu1 %v1045_v19  ;;  %v1092_v51 = vld [vmem:[%s1464_s1 + $0x1b8] ss:$20 sps:$4 sm:$0xff]   ;;  %v1098_v55 = vld [vmem:[%s1464_s1 + $0x190] ss:$20 sps:$4 sm:$0xff]   ;;  %v1102_v58 = vld [vmem:[%s1464_s1 + $0x174] ss:$20 sps:$4 sm:$0xff]  }
  0x14   :  { %588 = vmatprep.subr.bf16.mxu0 %v1046_v20  ;;  %641 = vmatprep.subr.bf16.mxu1 %v1048_v21  ;;  %v1099_v56 = vld [vmem:[%s1464_s1 + $0x198] ss:$20 sps:$4 sm:$0xff]   ;;  %v1104_v59 = vld [vmem:[%s1464_s1 + $0x168] ss:$20 sps:$4 sm:$0xff]   ;;  %v1105_v60 = vld [vmem:[%s1464_s1 + $0x170] ss:$20 sps:$4 sm:$0xff]   ;;  %v117_v20 = vlaneseq }
  0x15   :  { %v1100_v57 = vld [vmem:[%s1464_s1 + $0x16c] ss:$20 sps:$4 sm:$0xff]   ;;  %v1106_v61 = vld [vmem:[%s1464_s1 + $0x144] ss:$20 sps:$4 sm:$0xff]   ;;  %v1111_v0 = vld [vmem:[%s1464_s1 + $0x148] ss:$20 sps:$4 sm:$0xff]  }
  0x16   :  { %v1108_v62 = vld [vmem:[%s1464_s1 + $0x14c] ss:$20 sps:$4 sm:$0xff]   ;;  %v1115_v1 = vld [vmem:[%s1464_s1 + $0x268] ss:$20 sps:$4 sm:$0xff]   ;;  %v1127_v8 = vld [vmem:[%s1465_s0 + $0x10] ss:$8 sps:$4 sm:$0xff]  }
  0x17   :  { %589 = vmatpush1.bf16.msra.mxu0 %v1050_v22  ;;  %642 = vmatpush1.bf16.msra.mxu1 %v1051_v23  ;;  %v1110_v63 = vld [vmem:[%s1464_s1 + $0x140] ss:$20 sps:$4 sm:$0xff]   ;;  %v1116_v3 = vld [vmem:[%s1464_s1 + $0x128] ss:$20 sps:$4 sm:$0xff]   ;;  %v1119_v7 = vld [vmem:[%s1464_s1 + $0x218] ss:$20 sps:$4 sm:$0xff]  }
  0x18   :  { %590 = vmatprep.subr.bf16.mxu0 %v1052_v24  ;;  %643 = vmatprep.subr.bf16.mxu1 %v1054_v25  ;;  %v1114_v2 = vld [vmem:[%s1465_s0] ss:$8 sps:$4 sm:$0xff]   ;;  %v1124_v5 = vld [vmem:[%s1465_s0 + $0x14] ss:$8 sps:$4 sm:$0xff]   ;;  %v1120_v9 = vld [vmem:[%s1464_s1 + $0xd8] ss:$20 sps:$4 sm:$0xff]  }
  0x19   :  { %v1117_v4 = vld [vmem:[%s1464_s1 + $0x240] ss:$20 sps:$4 sm:$0xff]   ;;  %v1121_v10 = vld [vmem:[%s1464_s1 + $0x1f0] ss:$20 sps:$4 sm:$0xff]   ;;  %v1123_v12 = vld [vmem:[%s1464_s1 + $0x1c8] ss:$20 sps:$4 sm:$0xff]  }
  0x1a   :  { %v1118_v6 = vld [vmem:[%s1464_s1 + $0x100] ss:$20 sps:$4 sm:$0xff]   ;;  %v1122_v11 = vld [vmem:[%s1464_s1 + $0xb0] ss:$20 sps:$4 sm:$0xff]   ;;  %v1126_v13 = vld [vmem:[%s1464_s1 + $0x88] ss:$20 sps:$4 sm:$0xff]  }
  0x1b   :  { %591 = vmatpush1.bf16.msra.mxu0 %v1056_v26  ;;  %644 = vmatpush1.bf16.msra.mxu1 %v1057_v27  ;;  %v1128_v14 = vld [vmem:[%s1464_s1 + $0x1a0] ss:$20 sps:$4 sm:$0xff]   ;;  %v1130_v16 = vld [vmem:[%s1464_s1 + $0x178] ss:$20 sps:$4 sm:$0xff]   ;;  %v1132_v18 = vld [vmem:[%s1464_s1 + $0x150] ss:$20 sps:$4 sm:$0xff]  }
  0x1c   :  { %592 = vmatprep.subr.bf16.mxu0 %v1058_v28  ;;  %645 = vmatprep.subr.bf16.mxu1 %v1060_v29  ;;  %v1129_v15 = vld [vmem:[%s1464_s1 + $0x60] ss:$20 sps:$4 sm:$0xff]   ;;  %v1131_v17 = vld [vmem:[%s1464_s1 + $0x38] ss:$20 sps:$4 sm:$0xff]   ;;  %v1133_v19 = vld [vmem:[%s1464_s1 + $0x10] ss:$20 sps:$4 sm:$0xff]  }
  0x1d   :  { %v1411_v21 = vshrl.u32 %v117_v20, 7  ;;  %v1418_v24 = vld [vmem:[%s1466_s2] sm:$0x1f] }
  0x1f   :  { %593 = vmatpush1.bf16.msra.mxu0 %v1062_v30  ;;  %646 = vmatpush1.bf16.msra.mxu1 %v1063_v31  ;;  %v119_v22 = vsub.s32 0, %v1411_v21  ;;  %v127_v23 = vsub.s32 2, %v1411_v21  ;;  %v123_v25 = vsub.s32 1, %v1411_v21  ;;  %v131_v26 = vsub.s32 3, %v1411_v21 }
  0x20   :  { %594 = vmatprep.subr.bf16.mxu0 %v1064_v32  ;;  %647 = vmatprep.subr.bf16.mxu1 %v1066_v33 }
  0x21   :  { %v120_v27 = vrot.slane %v1418_v24, %v119_v22  ;;  %v128_v28 = vrot.slane %v1418_v24, %v127_v23  ;;  %v124_v29 = vrot.slane %v1418_v24, %v123_v25  ;;  %v132_v30 = vrot.slane %v1418_v24, %v131_v26 }
  0x23   :  { %595 = vmatpush2.bf16.msra.mxu0 %v1068_v34  ;;  %648 = vmatpush2.bf16.msra.mxu1 %v1069_v35 }
  0x24   :  { %596 = vmatprep.subr.bf16.mxu0 %v1070_v36  ;;  %649 = vmatprep.subr.bf16.mxu1 %v1072_v37 }
  0x27   :  { %597 = vmatpush2.bf16.msra.mxu0 %v1074_v38  ;;  %650 = vmatpush2.bf16.msra.mxu1 %v1075_v39 }
  0x28   :  { %598 = vmatprep.subr.bf16.mxu0 %v1076_v40  ;;  %651 = vmatprep.subr.bf16.mxu1 %v1078_v41 }
  0x2b   :  { %599 = vmatpush2.bf16.msra.mxu0 %v1080_v42  ;;  %652 = vmatpush2.bf16.msra.mxu1 %v1081_v43 }
  0x2c   :  { %600 = vmatprep.subr.bf16.mxu0 %v1082_v44  ;;  %653 = vmatprep.subr.bf16.mxu1 %v1084_v45 }
  0x2f   :  { %601 = vmatpush2.bf16.msra.mxu0 %v1086_v46  ;;  %654 = vmatpush2.bf16.msra.mxu1 %v1087_v47 }
  0x30   :  { %602 = vmatprep.subr.bf16.mxu0 %v1088_v49  ;;  %655 = vmatprep.subr.bf16.mxu1 %v1090_v50 }
  0x33   :  { %603 = vmatpush2.bf16.msra.mxu0 %v1092_v51  ;;  %656 = vmatpush2.bf16.msra.mxu1 %v1093_v52 }
  0x34   :  { %604 = vmatprep.subr.bf16.mxu0 %v1094_v53  ;;  %657 = vmatprep.subr.bf16.mxu1 %v1096_v54 }
  0x37   :  { %605 = vmatpush2.bf16.msra.mxu0 %v1098_v55  ;;  %658 = vmatpush2.bf16.msra.mxu1 %v1099_v56 }
  0x38   :  { %606 = vmatprep.subr.bf16.mxu0 %v1100_v57  ;;  %659 = vmatprep.subr.bf16.mxu1 %v1102_v58 }
  0x3b   :  { %607 = vmatpush2.bf16.msra.mxu0 %v1104_v59  ;;  %660 = vmatpush2.bf16.msra.mxu1 %v1105_v60 }
  0x3c   :  { %608 = vmatprep.subr.bf16.mxu0 %v1106_v61  ;;  %661 = vmatprep.subr.bf16.mxu1 %v1108_v62 }
  0x3f   :  { %609 = vmatpush2.bf16.msra.mxu0 %v1110_v63  ;;  %662 = vmatpush2.bf16.msra.mxu1 %v1111_v0 }
  0x40   :  { %972 = vmatprep.subr.bf16.mxu0 %v1115_v1  ;;  %1000 = vmatprep.subr.bf16.mxu1 %v1115_v1 }
  0x42   :  { %611 = vmatmul.mubr.bf16.vlgmr.msra.gmra.mxu0 %v1114_v2  ;;  %664 = vmatmul.mubr.bf16.vlgmr.msra.gmra.mxu1 %v1114_v2 }
  0x43   :  { %973 = vmatpush3.bf16.msra.mxu0 %v1116_v3  ;;  %1008 = vmatpush3.bf16.msra.mxu1 %v1116_v3 }
  0x44   :  { %974 = vmatprep.subr.bf16.mxu0 %v1117_v4  ;;  %1001 = vmatprep.subr.bf16.mxu1 %v1117_v4 }
  0x45   :  { %620 = vmatprep.mubr.bf16.mxu0 %v1124_v5  ;;  %673 = vmatprep.mubr.bf16.mxu1 %v1124_v5 }
  0x47   :  { %975 = vmatpush3.bf16.msra.mxu0 %v1118_v6  ;;  %1009 = vmatpush3.bf16.msra.mxu1 %v1118_v6 }
  0x48   :  { %976 = vmatprep.subr.bf16.mxu0 %v1119_v7  ;;  %1002 = vmatprep.subr.bf16.mxu1 %v1119_v7 }
  0x4a   :  { %621 = vmatmul.mubr.bf16.gmra.mxu0 %v1127_v8  ;;  %674 = vmatmul.mubr.bf16.gmra.mxu1 %v1127_v8 }
  0x4b   :  { %977 = vmatpush3.bf16.msra.mxu0 %v1120_v9  ;;  %1010 = vmatpush3.bf16.msra.mxu1 %v1120_v9 }
  0x4c   :  { %978 = vmatprep.subr.bf16.mxu0 %v1121_v10  ;;  %1003 = vmatprep.subr.bf16.mxu1 %v1121_v10 }
  0x4d   :  { %716 = vmatprep.mubr.bf16.mxu0 %v1301_v48  ;;  %724 = vmatprep.mubr.bf16.mxu1 %v1124_v5 }
  0x4f   :  { %979 = vmatpush3.bf16.msra.mxu0 %v1122_v11  ;;  %1011 = vmatpush3.bf16.msra.mxu1 %v1122_v11  ;;  %v135_v11 = vsub.s32 4, %v1411_v21 }
  0x50   :  { %980 = vmatprep.subr.bf16.mxu0 %v1123_v12  ;;  %1004 = vmatprep.subr.bf16.mxu1 %v1123_v12 }
  0x53   :  { %981 = vmatpush3.bf16.msra.mxu0 %v1126_v13  ;;  %1012 = vmatpush3.bf16.msra.mxu1 %v1126_v13 }
  0x54   :  { %982 = vmatprep.subr.bf16.mxu0 %v1128_v14  ;;  %1005 = vmatprep.subr.bf16.mxu1 %v1128_v14  ;;  %v136_v14 = vrot.slane %v1418_v24, %v135_v11 }
  0x57   :  { %983 = vmatpush3.bf16.msra.mxu0 %v1129_v15  ;;  %1013 = vmatpush3.bf16.msra.mxu1 %v1129_v15 }
  0x58   :  { %984 = vmatprep.subr.bf16.mxu0 %v1130_v16  ;;  %1006 = vmatprep.subr.bf16.mxu1 %v1130_v16 }
  0x5b   :  { %985 = vmatpush3.bf16.msra.mxu0 %v1131_v17  ;;  %1014 = vmatpush3.bf16.msra.mxu1 %v1131_v17 }
  0x5c   :  { %986 = vmatprep.subr.bf16.mxu0 %v1132_v18  ;;  %1007 = vmatprep.subr.bf16.mxu1 %v1132_v18 }
  0x5f   :  { %987 = vmatpush3.bf16.msra.mxu0 %v1133_v19  ;;  %1015 = vmatpush3.bf16.msra.mxu1 %v1133_v19 }
  0x62   :  { %717 = vmatmul.mubr.bf16.vlgmr.msra.gmra.mxu0 %v1114_v2  ;;  %725 = vmatmul.mubr.bf16.vlgmr.msra.gmra.mxu1 %v1127_v8 }
 0x102   :  { %v612_v31 = vpop.f32.mrf.mxu0  ;;  %v665_v32 = vpop.f32.mrf.mxu1 }
 0x103   :  { %v613_v33 = vadd.f32 %v612_v31, %v120_v27  ;;  %v666_v34 = vadd.f32 %v665_v32, %v128_v28 }
 0x104   :  { %v614_v35 = vpop.f32.mrf.mxu0  ;;  %v667_v36 = vpop.f32.mrf.mxu1 }
 0x105   :  { %v744_v37 = vmax.f32 %v613_v33, 0.0  ;;  %v615_v38 = vadd.f32 %v614_v35, %v124_v29  ;;  %v668_v39 = vadd.f32 %v667_v36, %v132_v30 }
 0x106   :  { %v616_v40 = vpop.f32.mrf.mxu0  ;;  %v669_v41 = vpop.f32.mrf.mxu1 }
 0x107   :  { %v960_v42 = vpack.c.bf16 %v615_v38, %v744_v37  ;;  %v961_v43 = vpack.c.bf16 %v668_v39, %v666_v34  ;;  %v617_v44 = vadd.f32 %v616_v40, %v120_v27  ;;  %v670_v48 = vadd.f32 %v669_v41, %v128_v28 }
 0x108   :  { %v618_v45 = vpop.f32.mrf.mxu0  ;;  %v671_v46 = vpop.f32.mrf.mxu1 }
 0x109   :  { %848 = vst [vmem:[%s1467_s3] sm:$0xff] %v960_v42  ;;  %849 = vst [vmem:[%s1467_s3 + $0x8] sm:$0xff] %v961_v43  ;;  %v749_v47 = vmax.f32 %v617_v44, 0.0  ;;  %v619_v49 = vadd.f32 %v618_v45, %v124_v29  ;;  %v672_v50 = vadd.f32 %v671_v46, %v132_v30 }
 0x10a   :  { %v622_v51 = vpop.f32.mrf.mxu0  ;;  %v675_v52 = vpop.f32.mrf.mxu1 }
 0x10b   :  { %v963_v53 = vpack.c.bf16 %v619_v49, %v749_v47  ;;  %v964_v54 = vpack.c.bf16 %v672_v50, %v670_v48  ;;  %v623_v55 = vadd.f32 %v622_v51, %v120_v27  ;;  %v676_v56 = vadd.f32 %v675_v52, %v128_v28 }
 0x10c   :  { %v624_v57 = vpop.f32.mrf.mxu0  ;;  %v677_v58 = vpop.f32.mrf.mxu1 }
 0x10d   :  { %851 = vst [vmem:[%s1467_s3 + $0x14] sm:$0xff] %v963_v53  ;;  %852 = vst [vmem:[%s1467_s3 + $0x1c] sm:$0xff] %v964_v54  ;;  %v754_v59 = vmax.f32 %v623_v55, 0.0  ;;  %v625_v60 = vadd.f32 %v624_v57, %v124_v29  ;;  %v678_v61 = vadd.f32 %v677_v58, %v132_v30 }
 0x10e   :  { %v626_v62 = vpop.f32.mrf.mxu0  ;;  %v679_v63 = vpop.f32.mrf.mxu1 }
 0x10f   :  { %v966_v0 = vpack.c.bf16 %v625_v60, %v754_v59  ;;  %v967_v1 = vpack.c.bf16 %v678_v61, %v676_v56  ;;  %v627_v2 = vadd.f32 %v626_v62, %v120_v27  ;;  %v680_v3 = vadd.f32 %v679_v63, %v128_v28 }
 0x110   :  { %v628_v4 = vpop.f32.mrf.mxu0  ;;  %v681_v5 = vpop.f32.mrf.mxu1 }
 0x111   :  { %854 = vst [vmem:[%s1467_s3 + $0x28] sm:$0xff] %v966_v0  ;;  %855 = vst [vmem:[%s1467_s3 + $0x30] sm:$0xff] %v967_v1  ;;  %v759_v6 = vmax.f32 %v627_v2, 0.0  ;;  %v629_v7 = vadd.f32 %v628_v4, %v124_v29  ;;  %v682_v8 = vadd.f32 %v681_v5, %v132_v30 }
 0x113   :  { %v969_v9 = vpack.c.bf16 %v629_v7, %v759_v6  ;;  %v970_v10 = vpack.c.bf16 %v682_v8, %v680_v3 }
 0x115   :  { %857 = vst [vmem:[%s1467_s3 + $0x3c] sm:$0xff] %v969_v9  ;;  %858 = vst [vmem:[%s1467_s3 + $0x44] sm:$0xff] %v970_v10 }
 0x122   :  { %v988_v12 = vpop.f32.mrf.mxu0  ;;  %v994_v13 = vpop.f32.mrf.mxu1 }
 0x124   :  { %v989_v15 = vpop.f32.mrf.mxu0  ;;  %v995_v16 = vpop.f32.mrf.mxu1 }
 0x125   :  { %v990_v17 = vadd.f32 %v989_v15, %v988_v12  ;;  %v996_v18 = vadd.f32 %v995_v16, %v994_v13 }
 0x126   :  { %v991_v19 = vpop.f32.mrf.mxu0  ;;  %v997_v20 = vpop.f32.mrf.mxu1 }
 0x127   :  { %v719_v22 = vadd.f32 %v990_v17, %v136_v14  ;;  %v727_v23 = vadd.f32 %v996_v18, %v136_v14 }
 0x128   :  { %v992_v25 = vpop.f32.mrf.mxu0  ;;  %v998_v26 = vpop.f32.mrf.mxu1 }
 0x129   :  { %v962_v27 = vpack.c.bf16 %v719_v22, %v719_v22  ;;  %v968_v28 = vpack.c.bf16 %v727_v23, %v727_v23  ;;  %v993_v29 = vadd.f32 %v992_v25, %v991_v19  ;;  %v999_v30 = vadd.f32 %v998_v26, %v997_v20 }
 0x12b   :  { %850 = vst [vmem:[%s1467_s3 + $0x10] sm:$0xf] %v962_v27  ;;  %856 = vst [vmem:[%s1467_s3 + $0x38] sm:$0xf] %v968_v28  ;;  %v722_v21 = vadd.f32 %v993_v29, %v136_v14  ;;  %v730_v24 = vadd.f32 %v999_v30, %v136_v14 }
 0x12d   :  { %v965_v31 = vpack.c.bf16 %v722_v21, %v722_v21  ;;  %v971_v32 = vpack.c.bf16 %v730_v24, %v730_v24 }
 0x12f   :  { %853 = vst [vmem:[%s1467_s3 + $0x24] sm:$0xf] %v965_v31  ;;  %859 = vst [vmem:[%s1467_s3 + $0x4c] sm:$0xf] %v971_v32 }

// kernel: _lambda_.29
= control target key start
LH: loop header
LB: loop body
LE: loop exit
PB: predicated region body
PF: predicated region fallthrough
CT: control target
= control target key end

     0   :  { %v571_v1 = vmov 0   ;;  %v56_v35 = vlaneseq  ;;  %s786_s1 = inlined_call_operand.vmem [shape: bf16[128,512], index: 1, kind: input, shape index: {}]   ;;  %s787_s0 = inlined_call_operand.vmem [shape: bf16[32,128], index: 0, kind: input, shape index: {}]   ;;  %s788_s2 = inlined_call_operand.vmem [shape: f32[1,512], index: 2, kind: input, shape index: {}]   ;;  %s789_s3 = inlined_call_operand.vmem [shape: bf16[32,512], index: 3, kind: input, shape index: {}]   ;;  %s790_s4 = inlined_call_operand.vmem [shape: bf16[32,512], index: 4, kind: output, shape index: {}]  }
   0x1   :  { %v521_v0 = vld [vmem:[%s786_s1 + $0xe4] ss:$16 sps:$4 sm:$0xff]   ;;  %280 = vmatprep.mubr.bf16.mxu0 %v571_v1  ;;  %333 = vmatprep.mubr.bf16.mxu1 %v571_v1  ;;  %v523_v2 = vld [vmem:[%s786_s1 + $0xec] ss:$16 sps:$4 sm:$0xff]   ;;  %v525_v3 = vld [vmem:[%s786_s1 + $0xe0] ss:$16 sps:$4 sm:$0xff]  }
   0x2   :  { %248 = vmatprep.subr.bf16.mxu0 %v521_v0  ;;  %v526_v4 = vld [vmem:[%s786_s1 + $0xe8] ss:$16 sps:$4 sm:$0xff]   ;;  %301 = vmatprep.subr.bf16.mxu1 %v523_v2  ;;  %v527_v5 = vld [vmem:[%s786_s1 + $0xc4] ss:$16 sps:$4 sm:$0xff]   ;;  %v529_v6 = vld [vmem:[%s786_s1 + $0xcc] ss:$16 sps:$4 sm:$0xff]  }
   0x3   :  { %249 = vmatpush1.bf16.msra.mxu0 %v525_v3  ;;  %302 = vmatpush1.bf16.msra.mxu1 %v526_v4  ;;  %v531_v7 = vld [vmem:[%s786_s1 + $0xc0] ss:$16 sps:$4 sm:$0xff]   ;;  %v532_v8 = vld [vmem:[%s786_s1 + $0xc8] ss:$16 sps:$4 sm:$0xff]   ;;  %v533_v9 = vld [vmem:[%s786_s1 + $0xa4] ss:$16 sps:$4 sm:$0xff]  }
   0x4   :  { %250 = vmatprep.subr.bf16.mxu0 %v527_v5  ;;  %303 = vmatprep.subr.bf16.mxu1 %v529_v6  ;;  %v535_v10 = vld [vmem:[%s786_s1 + $0xac] ss:$16 sps:$4 sm:$0xff]   ;;  %v537_v11 = vld [vmem:[%s786_s1 + $0xa0] ss:$16 sps:$4 sm:$0xff]   ;;  %v538_v12 = vld [vmem:[%s786_s1 + $0xa8] ss:$16 sps:$4 sm:$0xff]  }
   0x5   :  { %v539_v13 = vld [vmem:[%s786_s1 + $0x84] ss:$16 sps:$4 sm:$0xff]   ;;  %v541_v14 = vld [vmem:[%s786_s1 + $0x8c] ss:$16 sps:$4 sm:$0xff]   ;;  %v543_v15 = vld [vmem:[%s786_s1 + $0x80] ss:$16 sps:$4 sm:$0xff]  }
   0x6   :  { %v544_v16 = vld [vmem:[%s786_s1 + $0x88] ss:$16 sps:$4 sm:$0xff]   ;;  %v545_v17 = vld [vmem:[%s786_s1 + $0x64] ss:$16 sps:$4 sm:$0xff]   ;;  %v547_v18 = vld [vmem:[%s786_s1 + $0x6c] ss:$16 sps:$4 sm:$0xff]  }
   0x7   :  { %251 = vmatpush1.bf16.msra.mxu0 %v531_v7  ;;  %304 = vmatpush1.bf16.msra.mxu1 %v532_v8  ;;  %v549_v19 = vld [vmem:[%s786_s1 + $0x60] ss:$16 sps:$4 sm:$0xff]   ;;  %v550_v20 = vld [vmem:[%s786_s1 + $0x68] ss:$16 sps:$4 sm:$0xff]   ;;  %v551_v21 = vld [vmem:[%s786_s1 + $0x44] ss:$16 sps:$4 sm:$0xff]  }
   0x8   :  { %252 = vmatprep.subr.bf16.mxu0 %v533_v9  ;;  %305 = vmatprep.subr.bf16.mxu1 %v535_v10  ;;  %v553_v22 = vld [vmem:[%s786_s1 + $0x4c] ss:$16 sps:$4 sm:$0xff]   ;;  %v555_v23 = vld [vmem:[%s786_s1 + $0x40] ss:$16 sps:$4 sm:$0xff]   ;;  %v556_v24 = vld [vmem:[%s786_s1 + $0x48] ss:$16 sps:$4 sm:$0xff]  }
   0x9   :  { %v557_v25 = vld [vmem:[%s786_s1 + $0x24] ss:$16 sps:$4 sm:$0xff]   ;;  %v559_v26 = vld [vmem:[%s786_s1 + $0x2c] ss:$16 sps:$4 sm:$0xff]   ;;  %v561_v27 = vld [vmem:[%s786_s1 + $0x20] ss:$16 sps:$4 sm:$0xff]  }
   0xa   :  { %v562_v28 = vld [vmem:[%s786_s1 + $0x28] ss:$16 sps:$4 sm:$0xff]   ;;  %v563_v29 = vld [vmem:[%s786_s1 + $0x4] ss:$16 sps:$4 sm:$0xff]   ;;  %v565_v30 = vld [vmem:[%s786_s1 + $0xc] ss:$16 sps:$4 sm:$0xff]  }
   0xb   :  { %253 = vmatpush1.bf16.msra.mxu0 %v537_v11  ;;  %306 = vmatpush1.bf16.msra.mxu1 %v538_v12  ;;  %v567_v31 = vld [vmem:[%s786_s1] ss:$16 sps:$4 sm:$0xff]   ;;  %v568_v32 = vld [vmem:[%s786_s1 + $0x8] ss:$16 sps:$4 sm:$0xff]   ;;  %v57_v36 = vshrl.u32 %v56_v35, 7 }
   0xc   :  { %254 = vmatprep.subr.bf16.mxu0 %v539_v13  ;;  %307 = vmatprep.subr.bf16.mxu1 %v541_v14  ;;  %v569_v33 = vld [vmem:[%s787_s0] sm:$0xff]   ;;  %v570_v34 = vld [vmem:[%s787_s0 + $0x8] sm:$0xff]   ;;  %v356_v50 = vld [vmem:[%s789_s3 + $0x10] sm:$0xff] }
   0xd   :  { %v58_v37 = vsub.s32 0, %v57_v36  ;;  %v66_v38 = vsub.s32 2, %v57_v36  ;;  %v54_v39 = vld [vmem:[%s788_s2] sm:$0xf]  ;;  %v62_v40 = vsub.s32 1, %v57_v36  ;;  %v70_v41 = vsub.s32 3, %v57_v36 }
   0xe   :  { %v354_v42 = vld [vmem:[%s789_s3] sm:$0xff]  ;;  %v355_v43 = vld [vmem:[%s789_s3 + $0x8] sm:$0xff]  ;;  %v357_v51 = vld [vmem:[%s789_s3 + $0x18] sm:$0xff]  ;;  %v366_v62 = vunpack.c.l.bf16 %v356_v50  ;;  %v367_v6 = vunpack.c.h.bf16 %v356_v50 }
   0xf   :  { %255 = vmatpush1.bf16.msra.mxu0 %v543_v15  ;;  %308 = vmatpush1.bf16.msra.mxu1 %v544_v16  ;;  %v712_v44 = vrot.slane %v54_v39, %v58_v37  ;;  %v714_v45 = vrot.slane %v54_v39, %v66_v38  ;;  %v362_v46 = vunpack.c.l.bf16 %v354_v42  ;;  %v364_v47 = vunpack.c.l.bf16 %v355_v43  ;;  %v731_v58 = vld [vmem:[%s789_s3 + $0x20] sm:$0xff]  ;;  %v736_v59 = vld [vmem:[%s789_s3 + $0x28] sm:$0xff]  ;;  %v360_v14 = vld [vmem:[%s789_s3 + $0x30] sm:$0xff] }
  0x10   :  { %256 = vmatprep.subr.bf16.mxu0 %v545_v17  ;;  %309 = vmatprep.subr.bf16.mxu1 %v547_v18  ;;  %v716_v48 = vrot.slane %v54_v39, %v62_v40  ;;  %v718_v49 = vrot.slane %v54_v39, %v70_v41  ;;  %v363_v56 = vunpack.c.h.bf16 %v354_v42  ;;  %v365_v57 = vunpack.c.h.bf16 %v355_v43  ;;  %v361_v15 = vld [vmem:[%s789_s3 + $0x38] sm:$0xff] }
  0x11   :  { %v368_v63 = vunpack.c.l.bf16 %v357_v51  ;;  %v369_v7 = vunpack.c.h.bf16 %v357_v51  ;;  %v370_v8 = vunpack.c.l.bf16 %v731_v58  ;;  %v372_v9 = vunpack.c.l.bf16 %v736_v59 }
  0x12   :  { %v371_v12 = vunpack.c.h.bf16 %v731_v58  ;;  %v373_v13 = vunpack.c.h.bf16 %v736_v59 }
  0x13   :  { %257 = vmatpush1.bf16.msra.mxu0 %v549_v19  ;;  %310 = vmatpush1.bf16.msra.mxu1 %v550_v20 }
  0x14   :  { %258 = vmatprep.subr.bf16.mxu0 %v551_v21  ;;  %311 = vmatprep.subr.bf16.mxu1 %v553_v22 }
  0x17   :  { %259 = vmatpush1.bf16.msra.mxu0 %v555_v23  ;;  %312 = vmatpush1.bf16.msra.mxu1 %v556_v24 }
  0x18   :  { %260 = vmatprep.subr.bf16.mxu0 %v557_v25  ;;  %313 = vmatprep.subr.bf16.mxu1 %v559_v26 }
  0x1b   :  { %261 = vmatpush1.bf16.msra.mxu0 %v561_v27  ;;  %314 = vmatpush1.bf16.msra.mxu1 %v562_v28 }
  0x1c   :  { %262 = vmatprep.subr.bf16.mxu0 %v563_v29  ;;  %315 = vmatprep.subr.bf16.mxu1 %v565_v30  ;;  %v374_v30 = vunpack.c.l.bf16 %v360_v14 }
  0x1f   :  { %263 = vmatpush1.bf16.msra.mxu0 %v567_v31  ;;  %316 = vmatpush1.bf16.msra.mxu1 %v568_v32  ;;  %v376_v31 = vunpack.c.l.bf16 %v361_v15 }
  0x22   :  { %281 = vmatmul.mubr.bf16.vlgmr.msra.gmra.mxu0 %v569_v33  ;;  %334 = vmatmul.mubr.bf16.vlgmr.msra.gmra.mxu1 %v569_v33 }
  0x23   :  { %290 = vmatprep.mubr.bf16.mxu0 %v571_v1  ;;  %343 = vmatprep.mubr.bf16.mxu1 %v571_v1 }
  0x2a   :  { %291 = vmatmul.mubr.bf16.gmra.mxu0 %v570_v34  ;;  %344 = vmatmul.mubr.bf16.gmra.mxu1 %v570_v34 }
  0xe2   :  { %v282_v52 = vpop.f32.mrf.mxu0  ;;  %v335_v53 = vpop.f32.mrf.mxu1 }
  0xe3   :  { %v283_v54 = vadd.f32 %v282_v52, %v712_v44  ;;  %v336_v55 = vadd.f32 %v335_v53, %v714_v45 }
  0xe4   :  { %v284_v60 = vpop.f32.mrf.mxu0  ;;  %v337_v61 = vpop.f32.mrf.mxu1 }
  0xe5   :  { %v378_v0 = vadd.f32 %v362_v46, %v283_v54  ;;  %v380_v1 = vadd.f32 %v364_v47, %v336_v55  ;;  %v285_v2 = vadd.f32 %v284_v60, %v716_v48  ;;  %v338_v3 = vadd.f32 %v337_v61, %v718_v49 }
  0xe6   :  { %v286_v4 = vpop.f32.mrf.mxu0  ;;  %v339_v5 = vpop.f32.mrf.mxu1  ;;  %v375_v54 = vunpack.c.h.bf16 %v360_v14  ;;  %v377_v55 = vunpack.c.h.bf16 %v361_v15 }
  0xe7   :  { %v379_v10 = vadd.f32 %v363_v56, %v285_v2  ;;  %v381_v11 = vadd.f32 %v365_v57, %v338_v3  ;;  %v394_v16 = vmax.f32 %v378_v0, 0.0  ;;  %v396_v17 = vmax.f32 %v380_v1, 0.0 }
  0xe8   :  { %v287_v18 = vadd.f32 %v286_v4, %v712_v44  ;;  %v340_v19 = vadd.f32 %v339_v5, %v714_v45  ;;  %v288_v20 = vpop.f32.mrf.mxu0  ;;  %v341_v21 = vpop.f32.mrf.mxu1 }
  0xe9   :  { %v395_v22 = vmax.f32 %v379_v10, 0.0  ;;  %v397_v23 = vmax.f32 %v381_v11, 0.0  ;;  %v289_v24 = vadd.f32 %v288_v20, %v716_v48  ;;  %v342_v25 = vadd.f32 %v341_v21, %v718_v49 }
  0xea   :  { %v382_v26 = vadd.f32 %v366_v62, %v287_v18  ;;  %v384_v27 = vadd.f32 %v368_v63, %v340_v19  ;;  %v292_v28 = vpop.f32.mrf.mxu0  ;;  %v345_v29 = vpop.f32.mrf.mxu1 }
  0xeb   :  { %v512_v32 = vpack.c.bf16 %v395_v22, %v394_v16  ;;  %v513_v33 = vpack.c.bf16 %v397_v23, %v396_v17  ;;  %v383_v34 = vadd.f32 %v367_v6, %v289_v24  ;;  %v385_v35 = vadd.f32 %v369_v7, %v342_v25 }
  0xec   :  { %v398_v36 = vmax.f32 %v382_v26, 0.0  ;;  %v400_v37 = vmax.f32 %v384_v27, 0.0  ;;  %v293_v38 = vadd.f32 %v292_v28, %v712_v44  ;;  %v346_v39 = vadd.f32 %v345_v29, %v714_v45  ;;  %v294_v40 = vpop.f32.mrf.mxu0  ;;  %v347_v41 = vpop.f32.mrf.mxu1 }
  0xed   :  { %458 = vst [vmem:[%s790_s4] sm:$0xff] %v512_v32  ;;  %459 = vst [vmem:[%s790_s4 + $0x8] sm:$0xff] %v513_v33  ;;  %v399_v42 = vmax.f32 %v383_v34, 0.0  ;;  %v401_v43 = vmax.f32 %v385_v35, 0.0  ;;  %v295_v46 = vadd.f32 %v294_v40, %v716_v48  ;;  %v348_v47 = vadd.f32 %v347_v41, %v718_v49 }
  0xee   :  { %v386_v50 = vadd.f32 %v370_v8, %v293_v38  ;;  %v388_v51 = vadd.f32 %v372_v9, %v346_v39  ;;  %v296_v52 = vpop.f32.mrf.mxu0  ;;  %v349_v53 = vpop.f32.mrf.mxu1 }
  0xef   :  { %v514_v56 = vpack.c.bf16 %v399_v42, %v398_v36  ;;  %v515_v57 = vpack.c.bf16 %v401_v43, %v400_v37  ;;  %v387_v58 = vadd.f32 %v371_v12, %v295_v46  ;;  %v389_v59 = vadd.f32 %v373_v13, %v348_v47 }
  0xf0   :  { %v402_v60 = vmax.f32 %v386_v50, 0.0  ;;  %v404_v61 = vmax.f32 %v388_v51, 0.0  ;;  %v297_v62 = vadd.f32 %v296_v52, %v712_v44  ;;  %v350_v63 = vadd.f32 %v349_v53, %v714_v45  ;;  %v298_v0 = vpop.f32.mrf.mxu0  ;;  %v351_v1 = vpop.f32.mrf.mxu1 }
  0xf1   :  { %460 = vst [vmem:[%s790_s4 + $0x10] sm:$0xff] %v514_v56  ;;  %461 = vst [vmem:[%s790_s4 + $0x18] sm:$0xff] %v515_v57  ;;  %v403_v2 = vmax.f32 %v387_v58, 0.0  ;;  %v405_v3 = vmax.f32 %v389_v59, 0.0  ;;  %v299_v4 = vadd.f32 %v298_v0, %v716_v48  ;;  %v352_v5 = vadd.f32 %v351_v1, %v718_v49 }
  0xf2   :  { %v390_v6 = vadd.f32 %v374_v30, %v297_v62  ;;  %v392_v44 = vadd.f32 %v376_v31, %v350_v63 }
  0xf3   :  { %v516_v7 = vpack.c.bf16 %v403_v2, %v402_v60  ;;  %v517_v45 = vpack.c.bf16 %v405_v3, %v404_v61  ;;  %v391_v8 = vadd.f32 %v375_v54, %v299_v4  ;;  %v393_v9 = vadd.f32 %v377_v55, %v352_v5 }
  0xf4   :  { %v406_v10 = vmax.f32 %v390_v6, 0.0  ;;  %v408_v11 = vmax.f32 %v392_v44, 0.0 }
  0xf5   :  { %462 = vst [vmem:[%s790_s4 + $0x20] sm:$0xff] %v516_v7  ;;  %463 = vst [vmem:[%s790_s4 + $0x28] sm:$0xff] %v517_v45  ;;  %v407_v12 = vmax.f32 %v391_v8, 0.0  ;;  %v409_v48 = vmax.f32 %v393_v9, 0.0 }
  0xf7   :  { %v518_v13 = vpack.c.bf16 %v407_v12, %v406_v10  ;;  %v519_v49 = vpack.c.bf16 %v409_v48, %v408_v11 }
  0xf9   :  { %464 = vst [vmem:[%s790_s4 + $0x30] sm:$0xff] %v518_v13  ;;  %465 = vst [vmem:[%s790_s4 + $0x38] sm:$0xff] %v519_v49 }

// kernel: _lambda_.28
= control target key start
LH: loop header
LB: loop body
LE: loop exit
PB: predicated region body
PF: predicated region fallthrough
CT: control target
= control target key end

     0   :  { %s1632_s1 = inlined_call_operand.vmem [shape: bf16[1152,128], index: 1, kind: input, shape index: {}]   ;;  %s1633_s0 = inlined_call_operand.vmem [shape: bf16[32,1152], index: 0, kind: input, shape index: {}]   ;;  %s1634_s2 = inlined_call_operand.vmem [shape: f32[1,128], index: 2, kind: input, shape index: {}]   ;;  %s1635_s3 = inlined_call_operand.vmem [shape: bf16[32,128], index: 3, kind: output, shape index: {}]  }
   0x1   :  { %v1235_v0 = vld [vmem:[%s1632_s1 + $0x78] sm:$0xff]   ;;  %v1239_v4 = vld [vmem:[%s1632_s1 + $0x70] sm:$0xff]   ;;  %v1243_v8 = vld [vmem:[%s1632_s1 + $0x68] sm:$0xff]  }
   0x2   :  { %v1236_v1 = vld [vmem:[%s1632_s1 + $0x38] sm:$0xff]   ;;  %1093 = vmatprep.subr.bf16.mxu0 %v1235_v0  ;;  %v1240_v5 = vld [vmem:[%s1632_s1 + $0x30] sm:$0xff]   ;;  %v1244_v9 = vld [vmem:[%s1632_s1 + $0x28] sm:$0xff]  }
   0x3   :  { %v1237_v2 = vld [vmem:[%s1632_s1 + $0xf8] sm:$0xff]   ;;  %1094 = vmatpush3.bf16.msra.mxu0 %v1236_v1  ;;  %v1241_v6 = vld [vmem:[%s1632_s1 + $0xf0] sm:$0xff]   ;;  %v1245_v10 = vld [vmem:[%s1632_s1 + $0xe8] sm:$0xff]  }
   0x4   :  { %v1238_v3 = vld [vmem:[%s1632_s1 + $0xb8] sm:$0xff]   ;;  %1121 = vmatprep.subr.bf16.mxu1 %v1237_v2  ;;  %1095 = vmatprep.subr.bf16.mxu0 %v1239_v4  ;;  %v1242_v7 = vld [vmem:[%s1632_s1 + $0xb0] sm:$0xff]   ;;  %v1246_v11 = vld [vmem:[%s1632_s1 + $0xa8] sm:$0xff]  }
   0x5   :  { %1122 = vmatpush3.bf16.msra.mxu1 %v1238_v3  ;;  %v1247_v12 = vld [vmem:[%s1632_s1 + $0x60] sm:$0xff]   ;;  %v1251_v16 = vld [vmem:[%s1632_s1 + $0x58] sm:$0xff]   ;;  %v1255_v20 = vld [vmem:[%s1632_s1 + $0x50] sm:$0xff]  }
   0x6   :  { %1123 = vmatprep.subr.bf16.mxu1 %v1241_v6  ;;  %v1248_v13 = vld [vmem:[%s1632_s1 + $0x20] sm:$0xff]   ;;  %v1252_v17 = vld [vmem:[%s1632_s1 + $0x18] sm:$0xff]   ;;  %v1256_v21 = vld [vmem:[%s1632_s1 + $0x10] sm:$0xff]  }
   0x7   :  { %1096 = vmatpush3.bf16.msra.mxu0 %v1240_v5  ;;  %v1249_v14 = vld [vmem:[%s1632_s1 + $0xe0] sm:$0xff]   ;;  %v1253_v18 = vld [vmem:[%s1632_s1 + $0xd8] sm:$0xff]   ;;  %v1257_v22 = vld [vmem:[%s1632_s1 + $0xd0] sm:$0xff]  }
   0x8   :  { %1097 = vmatprep.subr.bf16.mxu0 %v1243_v8  ;;  %v1250_v15 = vld [vmem:[%s1632_s1 + $0xa0] sm:$0xff]   ;;  %v1254_v19 = vld [vmem:[%s1632_s1 + $0x98] sm:$0xff]   ;;  %v1258_v23 = vld [vmem:[%s1632_s1 + $0x90] sm:$0xff]  }
   0x9   :  { %1124 = vmatpush3.bf16.msra.mxu1 %v1242_v7  ;;  %v1259_v24 = vld [vmem:[%s1632_s1 + $0x48] sm:$0xff]   ;;  %v1263_v28 = vld [vmem:[%s1632_s1 + $0x40] sm:$0xff]   ;;  %v1270_v34 = vld [vmem:[%s1632_s1 + $0x178] sm:$0xff]  }
   0xa   :  { %1125 = vmatprep.subr.bf16.mxu1 %v1245_v10  ;;  %v1260_v25 = vld [vmem:[%s1632_s1 + $0x8] sm:$0xff]   ;;  %v1264_v29 = vld [vmem:[%s1632_s1] sm:$0xff]   ;;  %v1274_v37 = vld [vmem:[%s1632_s1 + $0x138] sm:$0xff]  }
   0xb   :  { %1098 = vmatpush3.bf16.msra.mxu0 %v1244_v9  ;;  %v1261_v26 = vld [vmem:[%s1632_s1 + $0xc8] sm:$0xff]   ;;  %v1265_v30 = vld [vmem:[%s1632_s1 + $0xc0] sm:$0xff]   ;;  %v1275_v38 = vld [vmem:[%s1632_s1 + $0x1f8] sm:$0xff]  }
   0xc   :  { %1099 = vmatprep.subr.bf16.mxu0 %v1247_v12  ;;  %v1262_v27 = vld [vmem:[%s1632_s1 + $0x88] sm:$0xff]   ;;  %v1266_v31 = vld [vmem:[%s1633_s0] ss:$36 sps:$4 sm:$0xff]   ;;  %v1276_v39 = vld [vmem:[%s1632_s1 + $0x1b8] sm:$0xff]  }
   0xd   :  { %1126 = vmatpush3.bf16.msra.mxu1 %v1246_v11  ;;  %v1268_v32 = vld [vmem:[%s1633_s0 + $0x4] ss:$36 sps:$4 sm:$0xff]   ;;  %v1273_v36 = vld [vmem:[%s1633_s0 + $0xc] ss:$36 sps:$4 sm:$0xff]   ;;  %v1289_v52 = vld [vmem:[%s1632_s1 + $0x158] sm:$0xff]  }
   0xe   :  { %1127 = vmatprep.subr.bf16.mxu1 %v1249_v14  ;;  %v1269_v33 = vld [vmem:[%s1632_s1 + $0x80] sm:$0xff]   ;;  %742 = vmatprep.mubr.bf16.mxu0 %v1268_v32  ;;  %v1271_v35 = vld [vmem:[%s1633_s0 + $0x8] ss:$36 sps:$4 sm:$0xff]   ;;  %v1277_v40 = vld [vmem:[%s1632_s1 + $0x170] sm:$0xff]  }
   0xf   :  { %1100 = vmatpush3.bf16.msra.mxu0 %v1248_v13  ;;  %791 = vmatprep.mubr.bf16.mxu1 %v1273_v36  ;;  %v1278_v41 = vld [vmem:[%s1632_s1 + $0x130] sm:$0xff]   ;;  %v1281_v44 = vld [vmem:[%s1632_s1 + $0x168] sm:$0xff]   ;;  %v1285_v48 = vld [vmem:[%s1632_s1 + $0x160] sm:$0xff]  }
  0x10   :  { %1101 = vmatprep.subr.bf16.mxu0 %v1251_v16  ;;  %v1279_v42 = vld [vmem:[%s1632_s1 + $0x1f0] sm:$0xff]   ;;  %v1282_v45 = vld [vmem:[%s1632_s1 + $0x128] sm:$0xff]   ;;  %v1286_v49 = vld [vmem:[%s1632_s1 + $0x120] sm:$0xff]  }
  0x11   :  { %1128 = vmatpush3.bf16.msra.mxu1 %v1250_v15  ;;  %v1280_v43 = vld [vmem:[%s1632_s1 + $0x1b0] sm:$0xff]   ;;  %v1283_v46 = vld [vmem:[%s1632_s1 + $0x1e8] sm:$0xff]   ;;  %v1287_v50 = vld [vmem:[%s1632_s1 + $0x1e0] sm:$0xff]  }
  0x12   :  { %1129 = vmatprep.subr.bf16.mxu1 %v1253_v18  ;;  %v1284_v47 = vld [vmem:[%s1632_s1 + $0x1a8] sm:$0xff]   ;;  %v1288_v51 = vld [vmem:[%s1632_s1 + $0x1a0] sm:$0xff]   ;;  %v1290_v53 = vld [vmem:[%s1632_s1 + $0x118] sm:$0xff]  }
  0x13   :  { %1102 = vmatpush3.bf16.msra.mxu0 %v1252_v17  ;;  %v1291_v54 = vld [vmem:[%s1633_s0 + $0x4c] ss:$36 sps:$4 sm:$0xff]   ;;  %v1293_v55 = vld [vmem:[%s1632_s1 + $0x1d8] sm:$0xff]   ;;  %v1307_v4 = vld [vmem:[%s1632_s1 + $0x140] sm:$0xff]  }
  0x14   :  { %1103 = vmatprep.subr.bf16.mxu0 %v1255_v20  ;;  %v1294_v56 = vld [vmem:[%s1633_s0 + $0x48] ss:$36 sps:$4 sm:$0xff]   ;;  %v1295_v57 = vld [vmem:[%s1632_s1 + $0x198] sm:$0xff]   ;;  %v1298_v59 = vld [vmem:[%s1632_s1 + $0x150] sm:$0xff]  }
  0x15   :  { %1130 = vmatpush3.bf16.msra.mxu1 %v1254_v19  ;;  %v1296_v58 = vld [vmem:[%s1633_s0 + $0x54] ss:$36 sps:$4 sm:$0xff]   ;;  %v1303_v0 = vld [vmem:[%s1632_s1 + $0x148] sm:$0xff]   ;;  %v1308_v5 = vld [vmem:[%s1632_s1 + $0x100] sm:$0xff]  }
  0x16   :  { %1131 = vmatprep.subr.bf16.mxu1 %v1257_v22  ;;  %v1299_v60 = vld [vmem:[%s1633_s0 + $0x50] ss:$36 sps:$4 sm:$0xff]   ;;  %v1304_v1 = vld [vmem:[%s1632_s1 + $0x108] sm:$0xff]   ;;  %v1309_v6 = vld [vmem:[%s1632_s1 + $0x1c0] sm:$0xff]  }
  0x17   :  { %1104 = vmatpush3.bf16.msra.mxu0 %v1256_v21  ;;  %v1300_v61 = vld [vmem:[%s1632_s1 + $0x110] sm:$0xff]   ;;  %v1305_v2 = vld [vmem:[%s1632_s1 + $0x1c8] sm:$0xff]   ;;  %v1313_v9 = vld [vmem:[%s1632_s1 + $0x180] sm:$0xff]  }
  0x18   :  { %1105 = vmatprep.subr.bf16.mxu0 %v1259_v24  ;;  %v1301_v62 = vld [vmem:[%s1632_s1 + $0x1d0] sm:$0xff]   ;;  %v1306_v3 = vld [vmem:[%s1632_s1 + $0x188] sm:$0xff]   ;;  %v1314_v10 = vld [vmem:[%s1632_s1 + $0x238] sm:$0xff]  }
  0x19   :  { %1132 = vmatpush3.bf16.msra.mxu1 %v1258_v23  ;;  %v1302_v63 = vld [vmem:[%s1632_s1 + $0x190] sm:$0xff]   ;;  %v1315_v11 = vld [vmem:[%s1633_s0 + $0x18] ss:$36 sps:$4 sm:$0xff]   ;;  %v1322_v16 = vld [vmem:[%s1632_s1 + $0x228] sm:$0xff]  }
  0x1a   :  { %1133 = vmatprep.subr.bf16.mxu1 %v1261_v26  ;;  %v1310_v7 = vld [vmem:[%s1633_s0 + $0x10] ss:$36 sps:$4 sm:$0xff]   ;;  %v1317_v12 = vld [vmem:[%s1633_s0 + $0x1c] ss:$36 sps:$4 sm:$0xff]   ;;  %v1323_v17 = vld [vmem:[%s1633_s0 + $0x64] ss:$36 sps:$4 sm:$0xff]  }
  0x1b   :  { %1106 = vmatpush3.bf16.msra.mxu0 %v1260_v25  ;;  %v1312_v8 = vld [vmem:[%s1633_s0 + $0x14] ss:$36 sps:$4 sm:$0xff]   ;;  %v1319_v14 = vld [vmem:[%s1633_s0 + $0x5c] ss:$36 sps:$4 sm:$0xff]   ;;  %v1329_v23 = vld [vmem:[%s1632_s1 + $0x208] sm:$0xff]  }
  0x1c   :  { %1107 = vmatprep.subr.bf16.mxu0 %v1263_v28  ;;  %v1318_v13 = vld [vmem:[%s1632_s1 + $0x230] sm:$0xff]   ;;  %v1321_v15 = vld [vmem:[%s1633_s0 + $0x58] ss:$36 sps:$4 sm:$0xff]   ;;  %v1325_v18 = vld [vmem:[%s1633_s0 + $0x60] ss:$36 sps:$4 sm:$0xff]  }
  0x1d   :  { %1134 = vmatpush3.bf16.msra.mxu1 %v1262_v27  ;;  %v1326_v19 = vld [vmem:[%s1632_s1 + $0x220] sm:$0xff]   ;;  %v1327_v20 = vld [vmem:[%s1632_s1 + $0x218] sm:$0xff]   ;;  %v1328_v22 = vld [vmem:[%s1632_s1 + $0x210] sm:$0xff]  }
  0x1e   :  { %1135 = vmatprep.subr.bf16.mxu1 %v1265_v30  ;;  %v1331_v21 = vld [vmem:[%s1633_s0 + $0x20] ss:$36 sps:$4 sm:$0xff]   ;;  %v1332_v25 = vld [vmem:[%s1633_s0 + $0x68] ss:$36 sps:$4 sm:$0xff]  }
  0x1f   :  { %1108 = vmatpush3.bf16.msra.mxu0 %v1264_v29  ;;  %v1330_v24 = vld [vmem:[%s1632_s1 + $0x200] sm:$0xff]  }
  0x20   :  { %1149 = vmatprep.subr.bf16.mxu0 %v1270_v34 }
  0x21   :  { %1136 = vmatpush3.bf16.msra.mxu1 %v1269_v33 }
  0x22   :  { %743 = vmatmul.mubr.bf16.vlgmr.msra.gmra.mxu0 %v1266_v31  ;;  %1177 = vmatprep.subr.bf16.mxu1 %v1275_v38 }
  0x23   :  { %1150 = vmatpush3.bf16.msra.mxu0 %v1274_v37  ;;  %750 = vmatprep.mubr.bf16.mxu0 %v1291_v54 }
  0x24   :  { %792 = vmatmul.mubr.bf16.vlgmr.msra.gmra.mxu1 %v1271_v35  ;;  %1151 = vmatprep.subr.bf16.mxu0 %v1277_v40 }
  0x25   :  { %1178 = vmatpush3.bf16.msra.mxu1 %v1276_v39  ;;  %799 = vmatprep.mubr.bf16.mxu1 %v1296_v58 }
  0x26   :  { %1179 = vmatprep.subr.bf16.mxu1 %v1279_v42 }
  0x27   :  { %1152 = vmatpush3.bf16.msra.mxu0 %v1278_v41 }
  0x28   :  { %1153 = vmatprep.subr.bf16.mxu0 %v1281_v44 }
  0x29   :  { %1180 = vmatpush3.bf16.msra.mxu1 %v1280_v43 }
  0x2a   :  { %1181 = vmatprep.subr.bf16.mxu1 %v1283_v46  ;;  %751 = vmatmul.mubr.bf16.gmra.mxu0 %v1294_v56 }
  0x2b   :  { %1154 = vmatpush3.bf16.msra.mxu0 %v1282_v45  ;;  %840 = vmatprep.mubr.bf16.mxu0 %v1312_v8 }
  0x2c   :  { %1155 = vmatprep.subr.bf16.mxu0 %v1285_v48  ;;  %800 = vmatmul.mubr.bf16.gmra.mxu1 %v1299_v60 }
  0x2d   :  { %1182 = vmatpush3.bf16.msra.mxu1 %v1284_v47  ;;  %889 = vmatprep.mubr.bf16.mxu1 %v1317_v12 }
  0x2e   :  { %1183 = vmatprep.subr.bf16.mxu1 %v1287_v50 }
  0x2f   :  { %1156 = vmatpush3.bf16.msra.mxu0 %v1286_v49 }
  0x30   :  { %1157 = vmatprep.subr.bf16.mxu0 %v1289_v52 }
  0x31   :  { %1184 = vmatpush3.bf16.msra.mxu1 %v1288_v51 }
  0x32   :  { %1185 = vmatprep.subr.bf16.mxu1 %v1293_v55 }
  0x33   :  { %1158 = vmatpush3.bf16.msra.mxu0 %v1290_v53 }
  0x34   :  { %1159 = vmatprep.subr.bf16.mxu0 %v1298_v59 }
  0x35   :  { %1186 = vmatpush3.bf16.msra.mxu1 %v1295_v57  ;;  %v983_v57 = vld [vmem:[%s1634_s2] ss:$0 sm:$0xff] }
  0x36   :  { %1187 = vmatprep.subr.bf16.mxu1 %v1301_v62 }
  0x37   :  { %1160 = vmatpush3.bf16.msra.mxu0 %v1300_v61 }
  0x38   :  { %1161 = vmatprep.subr.bf16.mxu0 %v1303_v0 }
  0x39   :  { %1188 = vmatpush3.bf16.msra.mxu1 %v1302_v63 }
  0x3a   :  { %1189 = vmatprep.subr.bf16.mxu1 %v1305_v2 }
  0x3b   :  { %1162 = vmatpush3.bf16.msra.mxu0 %v1304_v1 }
  0x3c   :  { %1163 = vmatprep.subr.bf16.mxu0 %v1307_v4 }
  0x3d   :  { %1190 = vmatpush3.bf16.msra.mxu1 %v1306_v3 }
  0x3e   :  { %1191 = vmatprep.subr.bf16.mxu1 %v1309_v6 }
  0x3f   :  { %1164 = vmatpush3.bf16.msra.mxu0 %v1308_v5 }
  0x40   :  { %1215 = vmatprep.subr.bf16.mxu0 %v1314_v10 }
  0x41   :  { %1192 = vmatpush3.bf16.msra.mxu1 %v1313_v9 }
  0x42   :  { %841 = vmatmul.mubr.bf16.vlgmr.msra.gmra.mxu0 %v1310_v7 }
  0x43   :  { %1216 = vmatpush3.bf16.msra.mxu0 %v1314_v10  ;;  %848 = vmatprep.mubr.bf16.mxu0 %v1319_v14 }
  0x44   :  { %890 = vmatmul.mubr.bf16.vlgmr.msra.gmra.mxu1 %v1315_v11  ;;  %1217 = vmatprep.subr.bf16.mxu0 %v1318_v13 }
  0x45   :  { %897 = vmatprep.mubr.bf16.mxu1 %v1323_v17 }
  0x47   :  { %1218 = vmatpush3.bf16.msra.mxu0 %v1318_v13 }
  0x48   :  { %1219 = vmatprep.subr.bf16.mxu0 %v1322_v16 }
  0x4a   :  { %849 = vmatmul.mubr.bf16.gmra.mxu0 %v1321_v15 }
  0x4b   :  { %1220 = vmatpush3.bf16.msra.mxu0 %v1322_v16  ;;  %1231 = vmatprep.mubr.bf16.mxu0 %v1331_v21 }
  0x4c   :  { %898 = vmatmul.mubr.bf16.gmra.mxu1 %v1325_v18  ;;  %1221 = vmatprep.subr.bf16.mxu0 %v1326_v19 }
  0x4f   :  { %1222 = vmatpush3.bf16.msra.mxu0 %v1326_v19 }
  0x50   :  { %1223 = vmatprep.subr.bf16.mxu0 %v1327_v20 }
  0x53   :  { %1224 = vmatpush3.bf16.msra.mxu0 %v1327_v20 }
  0x54   :  { %1225 = vmatprep.subr.bf16.mxu0 %v1328_v22 }
  0x57   :  { %1226 = vmatpush3.bf16.msra.mxu0 %v1328_v22 }
  0x58   :  { %1227 = vmatprep.subr.bf16.mxu0 %v1329_v23 }
  0x5b   :  { %1228 = vmatpush3.bf16.msra.mxu0 %v1329_v23 }
  0x5c   :  { %1229 = vmatprep.subr.bf16.mxu0 %v1330_v24 }
  0x5f   :  { %1230 = vmatpush3.bf16.msra.mxu0 %v1330_v24 }
  0x62   :  { %1232 = vmatmul.mubr.bf16.vlgmr.msra.gmra.mxu0 %v1332_v25 }
  0xe2   :  { %v1109_v26 = vpop.f32.mrf.mxu0 }
  0xe4   :  { %v1137_v27 = vpop.f32.mrf.mxu1  ;;  %v1110_v28 = vpop.f32.mrf.mxu0 }
  0xe5   :  { %v1111_v54 = vadd.f32 %v1110_v28, %v1109_v26 }
  0xe6   :  { %v1138_v29 = vpop.f32.mrf.mxu1  ;;  %v1112_v30 = vpop.f32.mrf.mxu0 }
  0xe7   :  { %v745_v62 = vadd.f32 %v1111_v54, %v983_v57  ;;  %v1139_v63 = vadd.f32 %v1138_v29, %v1137_v27 }
  0xe8   :  { %v1140_v31 = vpop.f32.mrf.mxu1  ;;  %v1113_v32 = vpop.f32.mrf.mxu0 }
  0xe9   :  { %v1114_v59 = vadd.f32 %v1113_v32, %v1112_v30  ;;  %v794_v10 = vadd.f32 %v1139_v63, %v745_v62 }
  0xea   :  { %v1115_v33 = vpop.f32.mrf.mxu0  ;;  %v1141_v34 = vpop.f32.mrf.mxu1 }
  0xeb   :  { %v748_v5 = vadd.f32 %v1114_v59, %v983_v57  ;;  %v1142_v6 = vadd.f32 %v1141_v34, %v1140_v31 }
  0xec   :  { %v1143_v35 = vpop.f32.mrf.mxu1  ;;  %v1116_v36 = vpop.f32.mrf.mxu0 }
  0xed   :  { %v1117_v53 = vadd.f32 %v1116_v36, %v1115_v33  ;;  %v797_v16 = vadd.f32 %v1142_v6, %v748_v5 }
  0xee   :  { %v1144_v37 = vpop.f32.mrf.mxu1  ;;  %v1118_v38 = vpop.f32.mrf.mxu0 }
  0xef   :  { %v753_v60 = vadd.f32 %v1117_v53, %v983_v57  ;;  %v1145_v61 = vadd.f32 %v1144_v37, %v1143_v35 }
  0xf0   :  { %v1146_v39 = vpop.f32.mrf.mxu1  ;;  %v1119_v40 = vpop.f32.mrf.mxu0 }
  0xf1   :  { %v1120_v58 = vadd.f32 %v1119_v40, %v1118_v38  ;;  %v802_v7 = vadd.f32 %v1145_v61, %v753_v60 }
  0xf2   :  { %v1147_v42 = vpop.f32.mrf.mxu1 }
  0xf3   :  { %v756_v2 = vadd.f32 %v1120_v58, %v983_v57  ;;  %v1148_v3 = vadd.f32 %v1147_v42, %v1146_v39 }
  0xf5   :  { %v805_v12 = vadd.f32 %v1148_v3, %v756_v2 }
 0x102   :  { %v1165_v41 = vpop.f32.mrf.mxu0 }
 0x104   :  { %v1166_v43 = vpop.f32.mrf.mxu0  ;;  %v1193_v44 = vpop.f32.mrf.mxu1 }
 0x105   :  { %v1167_v8 = vadd.f32 %v1166_v43, %v1165_v41 }
 0x106   :  { %v1168_v45 = vpop.f32.mrf.mxu0  ;;  %v1194_v46 = vpop.f32.mrf.mxu1 }
 0x107   :  { %v843_v17 = vadd.f32 %v1167_v8, %v794_v10  ;;  %v1195_v18 = vadd.f32 %v1194_v46, %v1193_v44 }
 0x108   :  { %v1169_v47 = vpop.f32.mrf.mxu0  ;;  %v1196_v48 = vpop.f32.mrf.mxu1 }
 0x109   :  { %v1170_v13 = vadd.f32 %v1169_v47, %v1168_v45  ;;  %v892_v27 = vadd.f32 %v1195_v18, %v843_v17 }
 0x10a   :  { %v1171_v49 = vpop.f32.mrf.mxu0  ;;  %v1197_v50 = vpop.f32.mrf.mxu1 }
 0x10b   :  { %v846_v22 = vadd.f32 %v1170_v13, %v797_v16  ;;  %v1198_v23 = vadd.f32 %v1197_v50, %v1196_v48 }
 0x10c   :  { %v1172_v51 = vpop.f32.mrf.mxu0  ;;  %v1199_v52 = vpop.f32.mrf.mxu1 }
 0x10d   :  { %v1173_v4 = vadd.f32 %v1172_v51, %v1171_v49  ;;  %v895_v32 = vadd.f32 %v1198_v23, %v846_v22 }
 0x10e   :  { %v1174_v55 = vpop.f32.mrf.mxu0  ;;  %v1200_v56 = vpop.f32.mrf.mxu1 }
 0x10f   :  { %v851_v14 = vadd.f32 %v1173_v4, %v802_v7  ;;  %v1201_v15 = vadd.f32 %v1200_v56, %v1199_v52 }
 0x110   :  { %v1175_v0 = vpop.f32.mrf.mxu0  ;;  %v1202_v1 = vpop.f32.mrf.mxu1 }
 0x111   :  { %v1176_v9 = vadd.f32 %v1175_v0, %v1174_v55  ;;  %v900_v24 = vadd.f32 %v1201_v15, %v851_v14 }
 0x112   :  { %v1203_v11 = vpop.f32.mrf.mxu1 }
 0x113   :  { %v854_v19 = vadd.f32 %v1176_v9, %v805_v12  ;;  %v1204_v20 = vadd.f32 %v1203_v11, %v1202_v1 }
 0x115   :  { %v903_v28 = vadd.f32 %v1204_v20, %v854_v19 }
 0x122   :  { %v1233_v21 = vpop.f32.mrf.mxu0 }
 0x123   :  { %v949_v26 = vadd.f32 %v1233_v21, %v900_v24 }
 0x124   :  { %v940_v25 = vpop.f32.mrf.mxu0 }
 0x125   :  { %v941_v30 = vadd.f32 %v940_v25, %v892_v27  ;;  %v957_v34 = vmax.f32 %v949_v26, 0.0 }
 0x126   :  { %v1234_v29 = vpop.f32.mrf.mxu0 }
 0x127   :  { %v952_v31 = vadd.f32 %v1234_v29, %v903_v28  ;;  %v955_v37 = vmax.f32 %v941_v30, 0.0 }
 0x128   :  { %v943_v33 = vpop.f32.mrf.mxu0 }
 0x129   :  { %v958_v35 = vmax.f32 %v952_v31, 0.0  ;;  %v944_v36 = vadd.f32 %v943_v33, %v895_v32 }
 0x12b   :  { %v1090_v38 = vpack.c.bf16 %v958_v35, %v957_v34  ;;  %v956_v39 = vmax.f32 %v944_v36, 0.0 }
 0x12d   :  { %1092 = vst [vmem:[%s1635_s3 + $0x8] sm:$0xff] %v1090_v38   ;;  %v1085_v40 = vpack.c.bf16 %v956_v39, %v955_v37 }
 0x12f   :  { %1086 = vst [vmem:[%s1635_s3] sm:$0xff] %v1085_v40  }

</bundles_post_ra>
